<compile_context>
chip_gen: v5e
topology: v5e:2x2
jax: 0.10.0
libtpu: 0.0.40
codegen_flags: <defaults>
</compile_context>

<pallas_src>
import functools

import jax
import jax.numpy as jnp
from jax import lax
from jax.experimental import pallas as pl
from jax.experimental.pallas import tpu as pltpu


# ----------------------------------------------------------------------------
# Host-side weight packing (quadrant-packed channel convention)
# ----------------------------------------------------------------------------
def _pack_full_conv_w(w):
    """(3,3,Cin,Cout) HWIO conv weight -> (9, 4*Cin, 4*Cout).

    Slot [s, qs*Cin+ci, qo*Cout+co] connects source quadrant qs of the
    (ry,rx) = (s//3-1, s%3-1) shifted window to output quadrant qo for a 3x3
    'same' conv expressed on quadrant-packed (hp, wp, 4*C) feature maps.
    """
    _, _, ci, co = w.shape
    wq = jnp.zeros((9, 4 * ci, 4 * co), w.dtype)
    for qy in range(2):
        for qx in range(2):
            qo = 2 * qy + qx
            for dy in range(3):
                for dx in range(3):
                    ty, tx = qy + dy - 1, qx + dx - 1
                    py, px = ty % 2, tx % 2
                    ry, rx = (ty - py) // 2, (tx - px) // 2
                    s = 3 * (ry + 1) + (rx + 1)
                    qs = 2 * py + px
                    wq = wq.at[s, qs * ci:(qs + 1) * ci,
                               qo * co:(qo + 1) * co].set(w[dy, dx])
    return wq


def _pack_trans_w(w_eq, nf):
    """Equivalent-forward ConvTranspose weight (3,3,2nf,nf) -> (4, 2nf, 4*nf).

    Exact subpixel decomposition of ConvTranspose2d(k3, s2, p1, op1): output
    parity (py,px) only sees the (ry,rx) in {0,1}^2 shifted windows of the
    bridge map; slot s2 = 2*ry + rx.
    """
    taps = (((0, 1),), ((0, 0), (1, 2)))   # parity -> ((shift r, w_eq idx d), ...)
    wt = jnp.zeros((4, 2 * nf, 4 * nf), w_eq.dtype)
    for py in range(2):
        for px in range(2):
            qo = 2 * py + px
            for ry, dy in taps[py]:
                for rx, dx in taps[px]:
                    wt = wt.at[2 * ry + rx, :,
                               qo * nf:(qo + 1) * nf].set(w_eq[dy, dx])
    return wt


def _tile_bias(b):
    # packed output channel index is qo*Cout + co  ->  bias b[co]
    return jnp.tile(b, 4).reshape(1, -1)


# ----------------------------------------------------------------------------
# Fully fused BabyUnet kernel (one program = `bn` images)
# ----------------------------------------------------------------------------
def _babyunet_kernel(xq_ref, wd_ref, bd_ref, wb_ref, bb_ref, wt_ref, bt_ref,
                     wut_ref, wud_ref, bu_ref, wo_ref, bo_ref,
                     o_ref,
                     xpad, dpad, ppad, brpad, tpad, upad,
                     *, bn, hp, wp, nf, outl):
    f32 = jnp.float32
    m = bn * hp * wp            # matmul M (rows) per program

    leaky = lambda v: jnp.where(v >= 0, v, 0.2 * v)

    def zero_halo(buf):
        # Interiors are fully overwritten each program; only the 1-pixel
        # zero-padding ring must be cleared.  Done every program so it is
        # correct under v7x megacore splitting of the parallel batch axis.
        b_, h_, w_, c_ = buf.shape
        row = jnp.zeros((b_, 1, w_, c_), buf.dtype)
        col = jnp.zeros((b_, h_, 1, c_), buf.dtype)
        buf[:, 0:1, :, :] = row
        buf[:, h_ - 1:h_, :, :] = row
        buf[:, :, 0:1, :] = col
        buf[:, :, w_ - 1:w_, :] = col

    for buf in (xpad, dpad, ppad, brpad, tpad, upad):
        zero_halo(buf)

    def window(pad, ry, rx):
        # Shifted (bn, hp, wp, C) window of a padded plane, flattened to (m, C).
        c = pad.shape[-1]
        return pad[:, 1 + ry:1 + ry + hp, 1 + rx:1 + rx + wp, :].reshape(m, c)

    def bias_rows(b_ref):
        # Bias hoisted once per stage into the f32 accumulator init.
        return jnp.broadcast_to(b_ref[...], (m, b_ref.shape[1])).astype(f32)

    def conv3x3(pad, w_ref, acc):
        # Full-res 3x3 'same' conv: 9 shifted windows, each a lane-dense
        # (m, 4*Cin) x (4*Cin, 4*Cout) MXU matmul accumulated in f32.
        for s in range(9):
            ry, rx = s // 3 - 1, s % 3 - 1
            acc = acc + jnp.dot(window(pad, ry, rx), w_ref[s],
                                preferred_element_type=f32)
        return acc

    # ---- stage 0: input block -> padded scratch interior ----------------------
    xpad[:, 1:hp + 1, 1:wp + 1, :] = xq_ref[...]

    # ---- down = LeakyReLU(conv3x3(cin -> nf)) ---------------------------------
    down = leaky(conv3x3(xpad, wd_ref, bias_rows(bd_ref)))          # (m, 4nf)
    dpad[:, 1:hp + 1, 1:wp + 1, :] = down.reshape(bn, hp, wp, 4 * nf)

    # ---- pool = MaxPool2d(2,2) == max over the 4 quadrant channel blocks ------
    pool = jnp.maximum(
        jnp.maximum(down[:, 0 * nf:1 * nf], down[:, 1 * nf:2 * nf]),
        jnp.maximum(down[:, 2 * nf:3 * nf], down[:, 3 * nf:4 * nf]))
    ppad[:, 1:hp + 1, 1:wp + 1, :] = pool.reshape(bn, hp, wp, nf)

    # ---- bridge = LeakyReLU(conv3x3(nf -> 2nf)) on the pooled half-res map ----
    bridge = leaky(conv3x3(ppad, wb_ref, bias_rows(bb_ref)))        # (m, 2nf)
    brpad[:, 1:hp + 1, 1:wp + 1, :] = bridge.reshape(bn, hp, wp, 2 * nf)

    # ---- trans = LeakyReLU(ConvTranspose2d(k3, s2, p1, op1)) ------------------
    # Exact subpixel decomposition: 4 shifted windows x (2nf, 4nf) packed
    # weights produce all four output parities at once, lane-dense.
    acct = bias_rows(bt_ref)
    for s2 in range(4):
        ry, rx = s2 // 2, s2 % 2
        acct = acct + jnp.dot(window(brpad, ry, rx), wt_ref[s2],
                              preferred_element_type=f32)
    trans = leaky(acct)                                             # (m, 4nf)
    tpad[:, 1:hp + 1, 1:wp + 1, :] = trans.reshape(bn, hp, wp, 4 * nf)

    # ---- up = LeakyReLU(conv3x3 on concat([trans, down])) ---------------------
    # concat is never materialized: split-K accumulation over the two sources.
    up = leaky(conv3x3(dpad, wud_ref,
                       conv3x3(tpad, wut_ref, bias_rows(bu_ref))))  # (m, 4nf)
    upad[:, 1:hp + 1, 1:wp + 1, :] = up.reshape(bn, hp, wp, 4 * nf)

    # ---- out = Tanh(conv3x3(nf -> cout)), N zero-padded to `outl` lanes -------
    acco = conv3x3(upad, wo_ref, bias_rows(bo_ref))                 # (m, outl)
    o_ref[...] = jnp.tanh(acco).reshape(bn, hp * wp, outl).astype(o_ref.dtype)


# ----------------------------------------------------------------------------
# Wrapper: layout glue + weight packing + pallas_call
# ----------------------------------------------------------------------------
def _pick_images_per_program(n):
    # Largest divisor of n that still leaves >= 2 grid programs, so both v7x
    # TensorCores get work; v5e/v6e simply get a bigger matmul M per program.
    for bn in range(n // 2, 0, -1):
        if n % bn == 0:
            return bn
    return 1


@functools.partial(jax.jit, static_argnames=("images_per_program",))
def baby_unet_forward(params, x_nchw, images_per_program=None):
    N, cin, H, W = x_nchw.shape
    nf = params["down_w"].shape[3]
    cout = params["out_w"].shape[3]
    hp, wp = H // 2, W // 2
    npq = hp * wp
    outl = max(128, ((4 * cout + 127) // 128) * 128)   # lane-dense output width
    bn = images_per_program or _pick_images_per_program(N)
    assert N % bn == 0

    # NCHW -> quadrant-packed channels (N, hp, wp, 4*cin); packed channel
    # index is (2*qy + qx)*cin + c  for pixel (2a+qy, 2b+qx).
    x_nhwc = jnp.transpose(x_nchw, (0, 2, 3, 1))
    x_q = (x_nhwc.reshape(N, hp, 2, wp, 2, cin)
                 .transpose(0, 1, 3, 2, 4, 5)
                 .reshape(N, hp, wp, 4 * cin))

    # Weight packing: lane-dense (shift, 4*Cin, 4*Cout) tiles, leading-indexed
    # in the kernel (no sub-tile 4-D weight slicing).
    wd = _pack_full_conv_w(params["down_w"])
    bd = _tile_bias(params["down_b"])
    wb = params["bridge_w"].reshape(9, nf, 2 * nf)      # half-res standard conv
    bb = params["bridge_b"].reshape(1, 2 * nf)
    # ConvTranspose weight -> equivalent forward-conv weight (flip + swap io).
    w_eq = jnp.transpose(params["trans_w"][:, :, ::-1, ::-1], (2, 3, 0, 1))
    wt = _pack_trans_w(w_eq, nf)
    bt = _tile_bias(params["trans_b"])
    wut = _pack_full_conv_w(params["up_w"][:, :, :nf, :])   # concat = [trans, down]
    wud = _pack_full_conv_w(params["up_w"][:, :, nf:, :])
    bu = _tile_bias(params["up_b"])
    wo = jnp.pad(_pack_full_conv_w(params["out_w"]),
                 ((0, 0), (0, 0), (0, outl - 4 * cout)))
    bo = jnp.pad(_tile_bias(params["out_b"]), ((0, 0), (0, outl - 4 * cout)))

    kernel = functools.partial(_babyunet_kernel,
                               bn=bn, hp=hp, wp=wp, nf=nf, outl=outl)

    def full(shape):
        return pl.BlockSpec(shape, lambda n: (0,) * len(shape))

    y = pl.pallas_call(
        kernel,
        out_shape=jax.ShapeDtypeStruct((N, npq, outl), jnp.float32),
        grid=(N // bn,),
        in_specs=[
            pl.BlockSpec((bn, hp, wp, 4 * cin), lambda n: (n, 0, 0, 0)),
            full(wd.shape), full(bd.shape),            # down
            full(wb.shape), full(bb.shape),            # bridge
            full(wt.shape), full(bt.shape),            # trans (subpixel)
            full(wut.shape), full(wud.shape), full(bu.shape),   # up (split-K)
            full(wo.shape), full(bo.shape),            # out (N padded to 128)
        ],
        out_specs=pl.BlockSpec((bn, npq, outl), lambda n: (n, 0, 0)),
        scratch_shapes=[
            pltpu.VMEM((bn, hp + 2, wp + 2, 4 * cin), jnp.float32),   # x
            pltpu.VMEM((bn, hp + 2, wp + 2, 4 * nf), jnp.float32),    # down
            pltpu.VMEM((bn, hp + 2, wp + 2, nf), jnp.float32),        # pool
            pltpu.VMEM((bn, hp + 2, wp + 2, 2 * nf), jnp.float32),    # bridge
            pltpu.VMEM((bn, hp + 2, wp + 2, 4 * nf), jnp.float32),    # trans
            pltpu.VMEM((bn, hp + 2, wp + 2, 4 * nf), jnp.float32),    # up
        ],
        compiler_params=pltpu.CompilerParams(
            dimension_semantics=("parallel",),
            vmem_limit_bytes=64 * 1024 * 1024),
        # TODO(synk): for large H*W*nf (e.g. 256x256 / nf=64) the per-image
        # all-resolutions-in-VMEM design exceeds v7x's 64 MiB VMEM; switch to
        # row-band spatial tiling with a 1-row halo at that point.
    )(x_q, wd, bd, wb, bb, wt, bt, wut, wud, bu, wo, bo)

    # Un-pack quadrants: (N, npq, outl) -> NCHW.
    y = y[..., :4 * cout].reshape(N, hp, wp, 2, 2, cout)
    y = jnp.transpose(y, (0, 5, 1, 3, 2, 4))
    return y.reshape(N, cout, H, W)


# ----------------------------------------------------------------------------
# Parameters (deterministic synthetic init; PyTorch layouts converted to HWIO)
# ----------------------------------------------------------------------------
def init_params(key, in_ch=3, out_ch=3, nf=24):
    ks = jax.random.split(key, 10)

    def conv_w(k, o, i):
        scale = 1.0 / jnp.sqrt(9.0 * i)
        return jax.random.normal(k, (3, 3, i, o), jnp.float32) * scale

    def bias(k, o):
        return jax.random.normal(k, (o,), jnp.float32) * 0.01

    trans_scale = 1.0 / jnp.sqrt(9.0 * (2 * nf))
    return {
        "down_w":   conv_w(ks[0], nf, in_ch),      "down_b":   bias(ks[1], nf),
        "bridge_w": conv_w(ks[2], 2 * nf, nf),     "bridge_b": bias(ks[3], 2 * nf),
        # trans weight kept in PyTorch ConvTranspose2d layout (Cin, Cout, 3, 3)
        "trans_w":  jax.random.normal(ks[4], (2 * nf, nf, 3, 3), jnp.float32) * trans_scale,
        "trans_b":  bias(ks[5], nf),
        "up_w":     conv_w(ks[6], nf, 2 * nf),     "up_b":     bias(ks[7], nf),
        "out_w":    conv_w(ks[8], out_ch, nf),     "out_b":    bias(ks[9], out_ch),
    }


# ----------------------------------------------------------------------------
# Pure-lax reference for verification
# ----------------------------------------------------------------------------
@jax.jit
def baby_unet_reference(params, x_nchw):
    dn = ("NHWC", "HWIO", "NHWC")
    x = jnp.transpose(x_nchw, (0, 2, 3, 1))

    def conv_act(a, w, b):
        y = lax.conv_general_dilated(a, w, (1, 1), "SAME", dimension_numbers=dn) + b
        return jax.nn.leaky_relu(y, 0.2)

    down = conv_act(x, params["down_w"], params["down_b"])
    pool = lax.reduce_window(down, -jnp.inf, lax.max, (1, 2, 2, 1), (1, 2, 2, 1), "VALID")
    bridge = conv_act(pool, params["bridge_w"], params["bridge_b"])
    w_eq = jnp.transpose(params["trans_w"][:, :, ::-1, ::-1], (2, 3, 0, 1))
    trans = jax.nn.leaky_relu(
        lax.conv_general_dilated(bridge, w_eq, (1, 1), ((1, 2), (1, 2)),
                                 lhs_dilation=(2, 2), dimension_numbers=dn)
        + params["trans_b"], 0.2)
    concat = jnp.concatenate([trans, down], axis=-1)
    up = conv_act(concat, params["up_w"], params["up_b"])
    out = jnp.tanh(
        lax.conv_general_dilated(up, params["out_w"], (1, 1), "SAME",
                                 dimension_numbers=dn) + params["out_b"])
    return jnp.transpose(out, (0, 3, 1, 2))


# ----------------------------------------------------------------------------
if __name__ == "__main__":
    key = jax.random.PRNGKey(0)
    k_in, k_params = jax.random.split(key)

    N, C, H, W = 2, 3, 16, 16
    x = jax.random.normal(k_in, (N, C, H, W), jnp.float32)
    params = init_params(k_params, in_ch=3, out_ch=3, nf=24)

    y = jax.block_until_ready(baby_unet_forward(params, x))
    assert y.shape == (N, 3, H, W), y.shape
    y_ref = jax.block_until_ready(baby_unet_reference(params, x))
    err = float(jnp.max(jnp.abs(y - y_ref)))
    assert jnp.allclose(y, y_ref, atol=2e-3, rtol=2e-3), err

    # Batched-into-M path: 4 images -> 2 images per program, still 2 parallel
    # grid programs (both v7x TensorCores), M = 128 rows per matmul.
    x4 = jax.random.normal(jax.random.PRNGKey(1), (4, C, H, W), jnp.float32)
    y4 = jax.block_until_ready(baby_unet_forward(params, x4))
    y4_ref = jax.block_until_ready(baby_unet_reference(params, x4))
    err4 = float(jnp.max(jnp.abs(y4 - y4_ref)))
    assert jnp.allclose(y4, y4_ref, atol=2e-3, rtol=2e-3), err4

    print("KERNEL_OK")
</pallas_src>

<mosaic_0001>
module attributes {stable_mosaic.version = 11 : i64} {
  func.func @_babyunet_kernel(%arg0: i32, %arg1: memref<1x8x8x12xf32, #tpu.memory_space<vmem>>, %arg2: memref<9x12x96xf32, #tpu.memory_space<vmem>>, %arg3: memref<1x96xf32, #tpu.memory_space<vmem>>, %arg4: memref<9x24x48xf32, #tpu.memory_space<vmem>>, %arg5: memref<1x48xf32, #tpu.memory_space<vmem>>, %arg6: memref<4x48x96xf32, #tpu.memory_space<vmem>>, %arg7: memref<1x96xf32, #tpu.memory_space<vmem>>, %arg8: memref<9x96x96xf32, #tpu.memory_space<vmem>>, %arg9: memref<9x96x96xf32, #tpu.memory_space<vmem>>, %arg10: memref<1x96xf32, #tpu.memory_space<vmem>>, %arg11: memref<9x96x128xf32, #tpu.memory_space<vmem>>, %arg12: memref<1x128xf32, #tpu.memory_space<vmem>>, %arg13: memref<1x64x128xf32, #tpu.memory_space<vmem>>, %arg14: memref<1x10x10x12xf32, #tpu.memory_space<vmem>>, %arg15: memref<1x10x10x96xf32, #tpu.memory_space<vmem>>, %arg16: memref<1x10x10x24xf32, #tpu.memory_space<vmem>>, %arg17: memref<1x10x10x48xf32, #tpu.memory_space<vmem>>, %arg18: memref<1x10x10x96xf32, #tpu.memory_space<vmem>>, %arg19: memref<1x10x10x96xf32, #tpu.memory_space<vmem>>) attributes {dimension_semantics = [#tpu.dimension_semantics<parallel>], iteration_bounds = array<i64: 2>, scalar_prefetch = 0 : i64, scratch_operands = 6 : i64, tpu.core_type = #tpu.core_type<tc>, window_params = [{transform_indices = @transform_0, window_bounds = array<i64: 1, 8, 8, 12>}, {pipeline_mode = #tpu.pipeline_mode<synchronous>, transform_indices = @transform_1, window_bounds = array<i64: 9, 12, 96>}, {pipeline_mode = #tpu.pipeline_mode<synchronous>, transform_indices = @transform_2, window_bounds = array<i64: 1, 96>}, {pipeline_mode = #tpu.pipeline_mode<synchronous>, transform_indices = @transform_3, window_bounds = array<i64: 9, 24, 48>}, {pipeline_mode = #tpu.pipeline_mode<synchronous>, transform_indices = @transform_4, window_bounds = array<i64: 1, 48>}, {pipeline_mode = #tpu.pipeline_mode<synchronous>, transform_indices = @transform_5, window_bounds = array<i64: 4, 48, 96>}, {pipeline_mode = #tpu.pipeline_mode<synchronous>, transform_indices = @transform_6, window_bounds = array<i64: 1, 96>}, {pipeline_mode = #tpu.pipeline_mode<synchronous>, transform_indices = @transform_7, window_bounds = array<i64: 9, 96, 96>}, {pipeline_mode = #tpu.pipeline_mode<synchronous>, transform_indices = @transform_8, window_bounds = array<i64: 9, 96, 96>}, {pipeline_mode = #tpu.pipeline_mode<synchronous>, transform_indices = @transform_9, window_bounds = array<i64: 1, 96>}, {pipeline_mode = #tpu.pipeline_mode<synchronous>, transform_indices = @transform_10, window_bounds = array<i64: 9, 96, 128>}, {pipeline_mode = #tpu.pipeline_mode<synchronous>, transform_indices = @transform_11, window_bounds = array<i64: 1, 128>}, {transform_indices = @transform_12, window_bounds = array<i64: 1, 64, 128>}]} {
    %cst = arith.constant 0.000000e+00 : f32
    %0 = vector.broadcast %cst : f32 to vector<1x1x10x12xf32>
    %cst_0 = arith.constant 0.000000e+00 : f32
    %1 = vector.broadcast %cst_0 : f32 to vector<1x10x1x12xf32>
    %c0 = arith.constant 0 : index
    %c0_1 = arith.constant 0 : index
    %c0_2 = arith.constant 0 : index
    %c0_3 = arith.constant 0 : index
    %2 = vector.load %arg14[%c0, %c0_1, %c0_2, %c0_3] : memref<1x10x10x12xf32, #tpu.memory_space<vmem>>, vector<1x1x10x12xf32>
    tpu.vector_store %arg14[%c0, %c0_1, %c0_2, %c0_3], %0 {strides = array<i32>} : memref<1x10x10x12xf32, #tpu.memory_space<vmem>>, vector<1x1x10x12xf32>,
    %c0_4 = arith.constant 0 : index
    %c9 = arith.constant 9 : index
    %c0_5 = arith.constant 0 : index
    %c0_6 = arith.constant 0 : index
    %3 = vector.load %arg14[%c0_4, %c9, %c0_5, %c0_6] : memref<1x10x10x12xf32, #tpu.memory_space<vmem>>, vector<1x1x10x12xf32>
    tpu.vector_store %arg14[%c0_4, %c9, %c0_5, %c0_6], %0 {strides = array<i32>} : memref<1x10x10x12xf32, #tpu.memory_space<vmem>>, vector<1x1x10x12xf32>,
    %c0_7 = arith.constant 0 : index
    %c0_8 = arith.constant 0 : index
    %c0_9 = arith.constant 0 : index
    %c0_10 = arith.constant 0 : index
    %4 = vector.load %arg14[%c0_7, %c0_8, %c0_9, %c0_10] : memref<1x10x10x12xf32, #tpu.memory_space<vmem>>, vector<1x10x1x12xf32>
    tpu.vector_store %arg14[%c0_7, %c0_8, %c0_9, %c0_10], %1 {strides = array<i32>} : memref<1x10x10x12xf32, #tpu.memory_space<vmem>>, vector<1x10x1x12xf32>,
    %c0_11 = arith.constant 0 : index
    %c0_12 = arith.constant 0 : index
    %c9_13 = arith.constant 9 : index
    %c0_14 = arith.constant 0 : index
    %5 = vector.load %arg14[%c0_11, %c0_12, %c9_13, %c0_14] : memref<1x10x10x12xf32, #tpu.memory_space<vmem>>, vector<1x10x1x12xf32>
    tpu.vector_store %arg14[%c0_11, %c0_12, %c9_13, %c0_14], %1 {strides = array<i32>} : memref<1x10x10x12xf32, #tpu.memory_space<vmem>>, vector<1x10x1x12xf32>,
    %cst_15 = arith.constant 0.000000e+00 : f32
    %6 = vector.broadcast %cst_15 : f32 to vector<1x1x10x96xf32>
    %cst_16 = arith.constant 0.000000e+00 : f32
    %7 = vector.broadcast %cst_16 : f32 to vector<1x10x1x96xf32>
    %c0_17 = arith.constant 0 : index
    %c0_18 = arith.constant 0 : index
    %c0_19 = arith.constant 0 : index
    %c0_20 = arith.constant 0 : index
    %8 = vector.load %arg15[%c0_17, %c0_18, %c0_19, %c0_20] : memref<1x10x10x96xf32, #tpu.memory_space<vmem>>, vector<1x1x10x96xf32>
    tpu.vector_store %arg15[%c0_17, %c0_18, %c0_19, %c0_20], %6 {strides = array<i32>} : memref<1x10x10x96xf32, #tpu.memory_space<vmem>>, vector<1x1x10x96xf32>,
    %c0_21 = arith.constant 0 : index
    %c9_22 = arith.constant 9 : index
    %c0_23 = arith.constant 0 : index
    %c0_24 = arith.constant 0 : index
    %9 = vector.load %arg15[%c0_21, %c9_22, %c0_23, %c0_24] : memref<1x10x10x96xf32, #tpu.memory_space<vmem>>, vector<1x1x10x96xf32>
    tpu.vector_store %arg15[%c0_21, %c9_22, %c0_23, %c0_24], %6 {strides = array<i32>} : memref<1x10x10x96xf32, #tpu.memory_space<vmem>>, vector<1x1x10x96xf32>,
    %c0_25 = arith.constant 0 : index
    %c0_26 = arith.constant 0 : index
    %c0_27 = arith.constant 0 : index
    %c0_28 = arith.constant 0 : index
    %10 = vector.load %arg15[%c0_25, %c0_26, %c0_27, %c0_28] : memref<1x10x10x96xf32, #tpu.memory_space<vmem>>, vector<1x10x1x96xf32>
    tpu.vector_store %arg15[%c0_25, %c0_26, %c0_27, %c0_28], %7 {strides = array<i32>} : memref<1x10x10x96xf32, #tpu.memory_space<vmem>>, vector<1x10x1x96xf32>,
    %c0_29 = arith.constant 0 : index
    %c0_30 = arith.constant 0 : index
    %c9_31 = arith.constant 9 : index
    %c0_32 = arith.constant 0 : index
    %11 = vector.load %arg15[%c0_29, %c0_30, %c9_31, %c0_32] : memref<1x10x10x96xf32, #tpu.memory_space<vmem>>, vector<1x10x1x96xf32>
    tpu.vector_store %arg15[%c0_29, %c0_30, %c9_31, %c0_32], %7 {strides = array<i32>} : memref<1x10x10x96xf32, #tpu.memory_space<vmem>>, vector<1x10x1x96xf32>,
    %cst_33 = arith.constant 0.000000e+00 : f32
    %12 = vector.broadcast %cst_33 : f32 to vector<1x1x10x24xf32>
    %cst_34 = arith.constant 0.000000e+00 : f32
    %13 = vector.broadcast %cst_34 : f32 to vector<1x10x1x24xf32>
    %c0_35 = arith.constant 0 : index
    %c0_36 = arith.constant 0 : index
    %c0_37 = arith.constant 0 : index
    %c0_38 = arith.constant 0 : index
    %14 = vector.load %arg16[%c0_35, %c0_36, %c0_37, %c0_38] : memref<1x10x10x24xf32, #tpu.memory_space<vmem>>, vector<1x1x10x24xf32>
    tpu.vector_store %arg16[%c0_35, %c0_36, %c0_37, %c0_38], %12 {strides = array<i32>} : memref<1x10x10x24xf32, #tpu.memory_space<vmem>>, vector<1x1x10x24xf32>,
    %c0_39 = arith.constant 0 : index
    %c9_40 = arith.constant 9 : index
    %c0_41 = arith.constant 0 : index
    %c0_42 = arith.constant 0 : index
    %15 = vector.load %arg16[%c0_39, %c9_40, %c0_41, %c0_42] : memref<1x10x10x24xf32, #tpu.memory_space<vmem>>, vector<1x1x10x24xf32>
    tpu.vector_store %arg16[%c0_39, %c9_40, %c0_41, %c0_42], %12 {strides = array<i32>} : memref<1x10x10x24xf32, #tpu.memory_space<vmem>>, vector<1x1x10x24xf32>,
    %c0_43 = arith.constant 0 : index
    %c0_44 = arith.constant 0 : index
    %c0_45 = arith.constant 0 : index
    %c0_46 = arith.constant 0 : index
    %16 = vector.load %arg16[%c0_43, %c0_44, %c0_45, %c0_46] : memref<1x10x10x24xf32, #tpu.memory_space<vmem>>, vector<1x10x1x24xf32>
    tpu.vector_store %arg16[%c0_43, %c0_44, %c0_45, %c0_46], %13 {strides = array<i32>} : memref<1x10x10x24xf32, #tpu.memory_space<vmem>>, vector<1x10x1x24xf32>,
    %c0_47 = arith.constant 0 : index
    %c0_48 = arith.constant 0 : index
    %c9_49 = arith.constant 9 : index
    %c0_50 = arith.constant 0 : index
    %17 = vector.load %arg16[%c0_47, %c0_48, %c9_49, %c0_50] : memref<1x10x10x24xf32, #tpu.memory_space<vmem>>, vector<1x10x1x24xf32>
    tpu.vector_store %arg16[%c0_47, %c0_48, %c9_49, %c0_50], %13 {strides = array<i32>} : memref<1x10x10x24xf32, #tpu.memory_space<vmem>>, vector<1x10x1x24xf32>,
    %cst_51 = arith.constant 0.000000e+00 : f32
    %18 = vector.broadcast %cst_51 : f32 to vector<1x1x10x48xf32>
    %cst_52 = arith.constant 0.000000e+00 : f32
    %19 = vector.broadcast %cst_52 : f32 to vector<1x10x1x48xf32>
    %c0_53 = arith.constant 0 : index
    %c0_54 = arith.constant 0 : index
    %c0_55 = arith.constant 0 : index
    %c0_56 = arith.constant 0 : index
    %20 = vector.load %arg17[%c0_53, %c0_54, %c0_55, %c0_56] : memref<1x10x10x48xf32, #tpu.memory_space<vmem>>, vector<1x1x10x48xf32>
    tpu.vector_store %arg17[%c0_53, %c0_54, %c0_55, %c0_56], %18 {strides = array<i32>} : memref<1x10x10x48xf32, #tpu.memory_space<vmem>>, vector<1x1x10x48xf32>,
    %c0_57 = arith.constant 0 : index
    %c9_58 = arith.constant 9 : index
    %c0_59 = arith.constant 0 : index
    %c0_60 = arith.constant 0 : index
    %21 = vector.load %arg17[%c0_57, %c9_58, %c0_59, %c0_60] : memref<1x10x10x48xf32, #tpu.memory_space<vmem>>, vector<1x1x10x48xf32>
    tpu.vector_store %arg17[%c0_57, %c9_58, %c0_59, %c0_60], %18 {strides = array<i32>} : memref<1x10x10x48xf32, #tpu.memory_space<vmem>>, vector<1x1x10x48xf32>,
    %c0_61 = arith.constant 0 : index
    %c0_62 = arith.constant 0 : index
    %c0_63 = arith.constant 0 : index
    %c0_64 = arith.constant 0 : index
    %22 = vector.load %arg17[%c0_61, %c0_62, %c0_63, %c0_64] : memref<1x10x10x48xf32, #tpu.memory_space<vmem>>, vector<1x10x1x48xf32>
    tpu.vector_store %arg17[%c0_61, %c0_62, %c0_63, %c0_64], %19 {strides = array<i32>} : memref<1x10x10x48xf32, #tpu.memory_space<vmem>>, vector<1x10x1x48xf32>,
    %c0_65 = arith.constant 0 : index
    %c0_66 = arith.constant 0 : index
    %c9_67 = arith.constant 9 : index
    %c0_68 = arith.constant 0 : index
    %23 = vector.load %arg17[%c0_65, %c0_66, %c9_67, %c0_68] : memref<1x10x10x48xf32, #tpu.memory_space<vmem>>, vector<1x10x1x48xf32>
    tpu.vector_store %arg17[%c0_65, %c0_66, %c9_67, %c0_68], %19 {strides = array<i32>} : memref<1x10x10x48xf32, #tpu.memory_space<vmem>>, vector<1x10x1x48xf32>,
    %cst_69 = arith.constant 0.000000e+00 : f32
    %24 = vector.broadcast %cst_69 : f32 to vector<1x1x10x96xf32>
    %cst_70 = arith.constant 0.000000e+00 : f32
    %25 = vector.broadcast %cst_70 : f32 to vector<1x10x1x96xf32>
    %c0_71 = arith.constant 0 : index
    %c0_72 = arith.constant 0 : index
    %c0_73 = arith.constant 0 : index
    %c0_74 = arith.constant 0 : index
    %26 = vector.load %arg18[%c0_71, %c0_72, %c0_73, %c0_74] : memref<1x10x10x96xf32, #tpu.memory_space<vmem>>, vector<1x1x10x96xf32>
    tpu.vector_store %arg18[%c0_71, %c0_72, %c0_73, %c0_74], %24 {strides = array<i32>} : memref<1x10x10x96xf32, #tpu.memory_space<vmem>>, vector<1x1x10x96xf32>,
    %c0_75 = arith.constant 0 : index
    %c9_76 = arith.constant 9 : index
    %c0_77 = arith.constant 0 : index
    %c0_78 = arith.constant 0 : index
    %27 = vector.load %arg18[%c0_75, %c9_76, %c0_77, %c0_78] : memref<1x10x10x96xf32, #tpu.memory_space<vmem>>, vector<1x1x10x96xf32>
    tpu.vector_store %arg18[%c0_75, %c9_76, %c0_77, %c0_78], %24 {strides = array<i32>} : memref<1x10x10x96xf32, #tpu.memory_space<vmem>>, vector<1x1x10x96xf32>,
    %c0_79 = arith.constant 0 : index
    %c0_80 = arith.constant 0 : index
    %c0_81 = arith.constant 0 : index
    %c0_82 = arith.constant 0 : index
    %28 = vector.load %arg18[%c0_79, %c0_80, %c0_81, %c0_82] : memref<1x10x10x96xf32, #tpu.memory_space<vmem>>, vector<1x10x1x96xf32>
    tpu.vector_store %arg18[%c0_79, %c0_80, %c0_81, %c0_82], %25 {strides = array<i32>} : memref<1x10x10x96xf32, #tpu.memory_space<vmem>>, vector<1x10x1x96xf32>,
    %c0_83 = arith.constant 0 : index
    %c0_84 = arith.constant 0 : index
    %c9_85 = arith.constant 9 : index
    %c0_86 = arith.constant 0 : index
    %29 = vector.load %arg18[%c0_83, %c0_84, %c9_85, %c0_86] : memref<1x10x10x96xf32, #tpu.memory_space<vmem>>, vector<1x10x1x96xf32>
    tpu.vector_store %arg18[%c0_83, %c0_84, %c9_85, %c0_86], %25 {strides = array<i32>} : memref<1x10x10x96xf32, #tpu.memory_space<vmem>>, vector<1x10x1x96xf32>,
    %cst_87 = arith.constant 0.000000e+00 : f32
    %30 = vector.broadcast %cst_87 : f32 to vector<1x1x10x96xf32>
    %cst_88 = arith.constant 0.000000e+00 : f32
    %31 = vector.broadcast %cst_88 : f32 to vector<1x10x1x96xf32>
    %c0_89 = arith.constant 0 : index
    %c0_90 = arith.constant 0 : index
    %c0_91 = arith.constant 0 : index
    %c0_92 = arith.constant 0 : index
    %32 = vector.load %arg19[%c0_89, %c0_90, %c0_91, %c0_92] : memref<1x10x10x96xf32, #tpu.memory_space<vmem>>, vector<1x1x10x96xf32>
    tpu.vector_store %arg19[%c0_89, %c0_90, %c0_91, %c0_92], %30 {strides = array<i32>} : memref<1x10x10x96xf32, #tpu.memory_space<vmem>>, vector<1x1x10x96xf32>,
    %c0_93 = arith.constant 0 : index
    %c9_94 = arith.constant 9 : index
    %c0_95 = arith.constant 0 : index
    %c0_96 = arith.constant 0 : index
    %33 = vector.load %arg19[%c0_93, %c9_94, %c0_95, %c0_96] : memref<1x10x10x96xf32, #tpu.memory_space<vmem>>, vector<1x1x10x96xf32>
    tpu.vector_store %arg19[%c0_93, %c9_94, %c0_95, %c0_96], %30 {strides = array<i32>} : memref<1x10x10x96xf32, #tpu.memory_space<vmem>>, vector<1x1x10x96xf32>,
    %c0_97 = arith.constant 0 : index
    %c0_98 = arith.constant 0 : index
    %c0_99 = arith.constant 0 : index
    %c0_100 = arith.constant 0 : index
    %34 = vector.load %arg19[%c0_97, %c0_98, %c0_99, %c0_100] : memref<1x10x10x96xf32, #tpu.memory_space<vmem>>, vector<1x10x1x96xf32>
    tpu.vector_store %arg19[%c0_97, %c0_98, %c0_99, %c0_100], %31 {strides = array<i32>} : memref<1x10x10x96xf32, #tpu.memory_space<vmem>>, vector<1x10x1x96xf32>,
    %c0_101 = arith.constant 0 : index
    %c0_102 = arith.constant 0 : index
    %c9_103 = arith.constant 9 : index
    %c0_104 = arith.constant 0 : index
    %35 = vector.load %arg19[%c0_101, %c0_102, %c9_103, %c0_104] : memref<1x10x10x96xf32, #tpu.memory_space<vmem>>, vector<1x10x1x96xf32>
    tpu.vector_store %arg19[%c0_101, %c0_102, %c9_103, %c0_104], %31 {strides = array<i32>} : memref<1x10x10x96xf32, #tpu.memory_space<vmem>>, vector<1x10x1x96xf32>,
    %c0_105 = arith.constant 0 : index
    %c0_106 = arith.constant 0 : index
    %c0_107 = arith.constant 0 : index
    %c0_108 = arith.constant 0 : index
    %36 = vector.load %arg1[%c0_105, %c0_106, %c0_107, %c0_108] : memref<1x8x8x12xf32, #tpu.memory_space<vmem>>, vector<1x8x8x12xf32>
    %c0_109 = arith.constant 0 : index
    %c1 = arith.constant 1 : index
    %c1_110 = arith.constant 1 : index
    %c0_111 = arith.constant 0 : index
    %37 = vector.load %arg14[%c0_109, %c1, %c1_110, %c0_111] : memref<1x10x10x12xf32, #tpu.memory_space<vmem>>, vector<1x8x8x12xf32>
    tpu.vector_store %arg14[%c0_109, %c1, %c1_110, %c0_111], %36 {strides = array<i32>} : memref<1x10x10x12xf32, #tpu.memory_space<vmem>>, vector<1x8x8x12xf32>,
    %c0_112 = arith.constant 0 : index
    %c0_113 = arith.constant 0 : index
    %38 = vector.load %arg3[%c0_112, %c0_113] : memref<1x96xf32, #tpu.memory_space<vmem>>, vector<1x96xf32>
    %39 = vector.shape_cast %38 : vector<1x96xf32> to vector<1x96xf32>
    %40 = vector.broadcast %39 : vector<1x96xf32> to vector<64x96xf32>
    %c0_114 = arith.constant 0 : index
    %c0_115 = arith.constant 0 : index
    %c0_116 = arith.constant 0 : index
    %c0_117 = arith.constant 0 : index
    %41 = vector.load %arg14[%c0_114, %c0_115, %c0_116, %c0_117] : memref<1x10x10x12xf32, #tpu.memory_space<vmem>>, vector<1x8x8x12xf32>
    %42 = vector.shape_cast %41 : vector<1x8x8x12xf32> to vector<64x12xf32>
    %c0_118 = arith.constant 0 : index
    %c0_119 = arith.constant 0 : index
    %c0_120 = arith.constant 0 : index
    %43 = vector.load %arg2[%c0_118, %c0_119, %c0_120] : memref<9x12x96xf32, #tpu.memory_space<vmem>>, vector<1x12x96xf32>
    %44 = vector.shape_cast %43 : vector<1x12x96xf32> to vector<12x96xf32>
    %cst_121 = arith.constant dense<0.000000e+00> : vector<64x96xf32>
    %45 = tpu.matmul %42, %44, %cst_121 {dimension_numbers = #tpu.dot_dimension_numbers<[1], [0], [0], [1], [0, 0, 1, 1], [], []>} : vector<64x12xf32>, vector<12x96xf32>, vector<64x96xf32> -> vector<64x96xf32>
    %46 = arith.addf %40, %45 : vector<64x96xf32>
    %c0_122 = arith.constant 0 : index
    %c0_123 = arith.constant 0 : index
    %c1_124 = arith.constant 1 : index
    %c0_125 = arith.constant 0 : index
    %47 = vector.load %arg14[%c0_122, %c0_123, %c1_124, %c0_125] : memref<1x10x10x12xf32, #tpu.memory_space<vmem>>, vector<1x8x8x12xf32>
    %48 = vector.shape_cast %47 : vector<1x8x8x12xf32> to vector<64x12xf32>
    %c1_126 = arith.constant 1 : index
    %c0_127 = arith.constant 0 : index
    %c0_128 = arith.constant 0 : index
    %49 = vector.load %arg2[%c1_126, %c0_127, %c0_128] : memref<9x12x96xf32, #tpu.memory_space<vmem>>, vector<1x12x96xf32>
    %50 = vector.shape_cast %49 : vector<1x12x96xf32> to vector<12x96xf32>
    %cst_129 = arith.constant dense<0.000000e+00> : vector<64x96xf32>
    %51 = tpu.matmul %48, %50, %cst_129 {dimension_numbers = #tpu.dot_dimension_numbers<[1], [0], [0], [1], [0, 0, 1, 1], [], []>} : vector<64x12xf32>, vector<12x96xf32>, vector<64x96xf32> -> vector<64x96xf32>
    %52 = arith.addf %46, %51 : vector<64x96xf32>
    %c0_130 = arith.constant 0 : index
    %c0_131 = arith.constant 0 : index
    %c2 = arith.constant 2 : index
    %c0_132 = arith.constant 0 : index
    %53 = vector.load %arg14[%c0_130, %c0_131, %c2, %c0_132] : memref<1x10x10x12xf32, #tpu.memory_space<vmem>>, vector<1x8x8x12xf32>
    %54 = vector.shape_cast %53 : vector<1x8x8x12xf32> to vector<64x12xf32>
    %c2_133 = arith.constant 2 : index
    %c0_134 = arith.constant 0 : index
    %c0_135 = arith.constant 0 : index
    %55 = vector.load %arg2[%c2_133, %c0_134, %c0_135] : memref<9x12x96xf32, #tpu.memory_space<vmem>>, vector<1x12x96xf32>
    %56 = vector.shape_cast %55 : vector<1x12x96xf32> to vector<12x96xf32>
    %cst_136 = arith.constant dense<0.000000e+00> : vector<64x96xf32>
    %57 = tpu.matmul %54, %56, %cst_136 {dimension_numbers = #tpu.dot_dimension_numbers<[1], [0], [0], [1], [0, 0, 1, 1], [], []>} : vector<64x12xf32>, vector<12x96xf32>, vector<64x96xf32> -> vector<64x96xf32>
    %58 = arith.addf %52, %57 : vector<64x96xf32>
    %c0_137 = arith.constant 0 : index
    %c1_138 = arith.constant 1 : index
    %c0_139 = arith.constant 0 : index
    %c0_140 = arith.constant 0 : index
    %59 = vector.load %arg14[%c0_137, %c1_138, %c0_139, %c0_140] : memref<1x10x10x12xf32, #tpu.memory_space<vmem>>, vector<1x8x8x12xf32>
    %60 = vector.shape_cast %59 : vector<1x8x8x12xf32> to vector<64x12xf32>
    %c3 = arith.constant 3 : index
    %c0_141 = arith.constant 0 : index
    %c0_142 = arith.constant 0 : index
    %61 = vector.load %arg2[%c3, %c0_141, %c0_142] : memref<9x12x96xf32, #tpu.memory_space<vmem>>, vector<1x12x96xf32>
    %62 = vector.shape_cast %61 : vector<1x12x96xf32> to vector<12x96xf32>
    %cst_143 = arith.constant dense<0.000000e+00> : vector<64x96xf32>
    %63 = tpu.matmul %60, %62, %cst_143 {dimension_numbers = #tpu.dot_dimension_numbers<[1], [0], [0], [1], [0, 0, 1, 1], [], []>} : vector<64x12xf32>, vector<12x96xf32>, vector<64x96xf32> -> vector<64x96xf32>
    %64 = arith.addf %58, %63 : vector<64x96xf32>
    %c0_144 = arith.constant 0 : index
    %c1_145 = arith.constant 1 : index
    %c1_146 = arith.constant 1 : index
    %c0_147 = arith.constant 0 : index
    %65 = vector.load %arg14[%c0_144, %c1_145, %c1_146, %c0_147] : memref<1x10x10x12xf32, #tpu.memory_space<vmem>>, vector<1x8x8x12xf32>
    %66 = vector.shape_cast %65 : vector<1x8x8x12xf32> to vector<64x12xf32>
    %c4 = arith.constant 4 : index
    %c0_148 = arith.constant 0 : index
    %c0_149 = arith.constant 0 : index
    %67 = vector.load %arg2[%c4, %c0_148, %c0_149] : memref<9x12x96xf32, #tpu.memory_space<vmem>>, vector<1x12x96xf32>
    %68 = vector.shape_cast %67 : vector<1x12x96xf32> to vector<12x96xf32>
    %cst_150 = arith.constant dense<0.000000e+00> : vector<64x96xf32>
    %69 = tpu.matmul %66, %68, %cst_150 {dimension_numbers = #tpu.dot_dimension_numbers<[1], [0], [0], [1], [0, 0, 1, 1], [], []>} : vector<64x12xf32>, vector<12x96xf32>, vector<64x96xf32> -> vector<64x96xf32>
    %70 = arith.addf %64, %69 : vector<64x96xf32>
    %c0_151 = arith.constant 0 : index
    %c1_152 = arith.constant 1 : index
    %c2_153 = arith.constant 2 : index
    %c0_154 = arith.constant 0 : index
    %71 = vector.load %arg14[%c0_151, %c1_152, %c2_153, %c0_154] : memref<1x10x10x12xf32, #tpu.memory_space<vmem>>, vector<1x8x8x12xf32>
    %72 = vector.shape_cast %71 : vector<1x8x8x12xf32> to vector<64x12xf32>
    %c5 = arith.constant 5 : index
    %c0_155 = arith.constant 0 : index
    %c0_156 = arith.constant 0 : index
    %73 = vector.load %arg2[%c5, %c0_155, %c0_156] : memref<9x12x96xf32, #tpu.memory_space<vmem>>, vector<1x12x96xf32>
    %74 = vector.shape_cast %73 : vector<1x12x96xf32> to vector<12x96xf32>
    %cst_157 = arith.constant dense<0.000000e+00> : vector<64x96xf32>
    %75 = tpu.matmul %72, %74, %cst_157 {dimension_numbers = #tpu.dot_dimension_numbers<[1], [0], [0], [1], [0, 0, 1, 1], [], []>} : vector<64x12xf32>, vector<12x96xf32>, vector<64x96xf32> -> vector<64x96xf32>
    %76 = arith.addf %70, %75 : vector<64x96xf32>
    %c0_158 = arith.constant 0 : index
    %c2_159 = arith.constant 2 : index
    %c0_160 = arith.constant 0 : index
    %c0_161 = arith.constant 0 : index
    %77 = vector.load %arg14[%c0_158, %c2_159, %c0_160, %c0_161] : memref<1x10x10x12xf32, #tpu.memory_space<vmem>>, vector<1x8x8x12xf32>
    %78 = vector.shape_cast %77 : vector<1x8x8x12xf32> to vector<64x12xf32>
    %c6 = arith.constant 6 : index
    %c0_162 = arith.constant 0 : index
    %c0_163 = arith.constant 0 : index
    %79 = vector.load %arg2[%c6, %c0_162, %c0_163] : memref<9x12x96xf32, #tpu.memory_space<vmem>>, vector<1x12x96xf32>
    %80 = vector.shape_cast %79 : vector<1x12x96xf32> to vector<12x96xf32>
    %cst_164 = arith.constant dense<0.000000e+00> : vector<64x96xf32>
    %81 = tpu.matmul %78, %80, %cst_164 {dimension_numbers = #tpu.dot_dimension_numbers<[1], [0], [0], [1], [0, 0, 1, 1], [], []>} : vector<64x12xf32>, vector<12x96xf32>, vector<64x96xf32> -> vector<64x96xf32>
    %82 = arith.addf %76, %81 : vector<64x96xf32>
    %c0_165 = arith.constant 0 : index
    %c2_166 = arith.constant 2 : index
    %c1_167 = arith.constant 1 : index
    %c0_168 = arith.constant 0 : index
    %83 = vector.load %arg14[%c0_165, %c2_166, %c1_167, %c0_168] : memref<1x10x10x12xf32, #tpu.memory_space<vmem>>, vector<1x8x8x12xf32>
    %84 = vector.shape_cast %83 : vector<1x8x8x12xf32> to vector<64x12xf32>
    %c7 = arith.constant 7 : index
    %c0_169 = arith.constant 0 : index
    %c0_170 = arith.constant 0 : index
    %85 = vector.load %arg2[%c7, %c0_169, %c0_170] : memref<9x12x96xf32, #tpu.memory_space<vmem>>, vector<1x12x96xf32>
    %86 = vector.shape_cast %85 : vector<1x12x96xf32> to vector<12x96xf32>
    %cst_171 = arith.constant dense<0.000000e+00> : vector<64x96xf32>
    %87 = tpu.matmul %84, %86, %cst_171 {dimension_numbers = #tpu.dot_dimension_numbers<[1], [0], [0], [1], [0, 0, 1, 1], [], []>} : vector<64x12xf32>, vector<12x96xf32>, vector<64x96xf32> -> vector<64x96xf32>
    %88 = arith.addf %82, %87 : vector<64x96xf32>
    %c0_172 = arith.constant 0 : index
    %c2_173 = arith.constant 2 : index
    %c2_174 = arith.constant 2 : index
    %c0_175 = arith.constant 0 : index
    %89 = vector.load %arg14[%c0_172, %c2_173, %c2_174, %c0_175] : memref<1x10x10x12xf32, #tpu.memory_space<vmem>>, vector<1x8x8x12xf32>
    %90 = vector.shape_cast %89 : vector<1x8x8x12xf32> to vector<64x12xf32>
    %c8 = arith.constant 8 : index
    %c0_176 = arith.constant 0 : index
    %c0_177 = arith.constant 0 : index
    %91 = vector.load %arg2[%c8, %c0_176, %c0_177] : memref<9x12x96xf32, #tpu.memory_space<vmem>>, vector<1x12x96xf32>
    %92 = vector.shape_cast %91 : vector<1x12x96xf32> to vector<12x96xf32>
    %cst_178 = arith.constant dense<0.000000e+00> : vector<64x96xf32>
    %93 = tpu.matmul %90, %92, %cst_178 {dimension_numbers = #tpu.dot_dimension_numbers<[1], [0], [0], [1], [0, 0, 1, 1], [], []>} : vector<64x12xf32>, vector<12x96xf32>, vector<64x96xf32> -> vector<64x96xf32>
    %94 = arith.addf %88, %93 : vector<64x96xf32>
    %cst_179 = arith.constant 0.000000e+00 : f32
    %95 = vector.broadcast %cst_179 : f32 to vector<64x96xf32>
    %96 = arith.cmpf oge, %94, %95 : vector<64x96xf32>
    %cst_180 = arith.constant 2.000000e-01 : f32
    %97 = vector.broadcast %cst_180 : f32 to vector<64x96xf32>
    %98 = arith.mulf %97, %94 : vector<64x96xf32>
    %99 = arith.select %96, %94, %98 : vector<64x96xi1>, vector<64x96xf32>
    %100 = vector.shape_cast %99 : vector<64x96xf32> to vector<1x8x8x96xf32>
    %c0_181 = arith.constant 0 : index
    %c1_182 = arith.constant 1 : index
    %c1_183 = arith.constant 1 : index
    %c0_184 = arith.constant 0 : index
    %101 = vector.load %arg15[%c0_181, %c1_182, %c1_183, %c0_184] : memref<1x10x10x96xf32, #tpu.memory_space<vmem>>, vector<1x8x8x96xf32>
    tpu.vector_store %arg15[%c0_181, %c1_182, %c1_183, %c0_184], %100 {strides = array<i32>} : memref<1x10x10x96xf32, #tpu.memory_space<vmem>>, vector<1x8x8x96xf32>,
    %102 = vector.extract_strided_slice %99 {offsets = [0, 0], sizes = [64, 24], strides = [1, 1]} : vector<64x96xf32> to vector<64x24xf32>
    %103 = vector.extract_strided_slice %99 {offsets = [0, 24], sizes = [64, 24], strides = [1, 1]} : vector<64x96xf32> to vector<64x24xf32>
    %104 = arith.maximumf %102, %103 : vector<64x24xf32>
    %105 = vector.extract_strided_slice %99 {offsets = [0, 48], sizes = [64, 24], strides = [1, 1]} : vector<64x96xf32> to vector<64x24xf32>
    %106 = vector.extract_strided_slice %99 {offsets = [0, 72], sizes = [64, 24], strides = [1, 1]} : vector<64x96xf32> to vector<64x24xf32>
    %107 = arith.maximumf %105, %106 : vector<64x24xf32>
    %108 = arith.maximumf %104, %107 : vector<64x24xf32>
    %109 = vector.shape_cast %108 : vector<64x24xf32> to vector<1x8x8x24xf32>
    %c0_185 = arith.constant 0 : index
    %c1_186 = arith.constant 1 : index
    %c1_187 = arith.constant 1 : index
    %c0_188 = arith.constant 0 : index
    %110 = vector.load %arg16[%c0_185, %c1_186, %c1_187, %c0_188] : memref<1x10x10x24xf32, #tpu.memory_space<vmem>>, vector<1x8x8x24xf32>
    tpu.vector_store %arg16[%c0_185, %c1_186, %c1_187, %c0_188], %109 {strides = array<i32>} : memref<1x10x10x24xf32, #tpu.memory_space<vmem>>, vector<1x8x8x24xf32>,
    %c0_189 = arith.constant 0 : index
    %c0_190 = arith.constant 0 : index
    %111 = vector.load %arg5[%c0_189, %c0_190] : memref<1x48xf32, #tpu.memory_space<vmem>>, vector<1x48xf32>
    %112 = vector.shape_cast %111 : vector<1x48xf32> to vector<1x48xf32>
    %113 = vector.broadcast %112 : vector<1x48xf32> to vector<64x48xf32>
    %c0_191 = arith.constant 0 : index
    %c0_192 = arith.constant 0 : index
    %c0_193 = arith.constant 0 : index
    %c0_194 = arith.constant 0 : index
    %114 = vector.load %arg16[%c0_191, %c0_192, %c0_193, %c0_194] : memref<1x10x10x24xf32, #tpu.memory_space<vmem>>, vector<1x8x8x24xf32>
    %115 = vector.shape_cast %114 : vector<1x8x8x24xf32> to vector<64x24xf32>
    %c0_195 = arith.constant 0 : index
    %c0_196 = arith.constant 0 : index
    %c0_197 = arith.constant 0 : index
    %116 = vector.load %arg4[%c0_195, %c0_196, %c0_197] : memref<9x24x48xf32, #tpu.memory_space<vmem>>, vector<1x24x48xf32>
    %117 = vector.shape_cast %116 : vector<1x24x48xf32> to vector<24x48xf32>
    %cst_198 = arith.constant dense<0.000000e+00> : vector<64x48xf32>
    %118 = tpu.matmul %115, %117, %cst_198 {dimension_numbers = #tpu.dot_dimension_numbers<[1], [0], [0], [1], [0, 0, 1, 1], [], []>} : vector<64x24xf32>, vector<24x48xf32>, vector<64x48xf32> -> vector<64x48xf32>
    %119 = arith.addf %113, %118 : vector<64x48xf32>
    %c0_199 = arith.constant 0 : index
    %c0_200 = arith.constant 0 : index
    %c1_201 = arith.constant 1 : index
    %c0_202 = arith.constant 0 : index
    %120 = vector.load %arg16[%c0_199, %c0_200, %c1_201, %c0_202] : memref<1x10x10x24xf32, #tpu.memory_space<vmem>>, vector<1x8x8x24xf32>
    %121 = vector.shape_cast %120 : vector<1x8x8x24xf32> to vector<64x24xf32>
    %c1_203 = arith.constant 1 : index
    %c0_204 = arith.constant 0 : index
    %c0_205 = arith.constant 0 : index
    %122 = vector.load %arg4[%c1_203, %c0_204, %c0_205] : memref<9x24x48xf32, #tpu.memory_space<vmem>>, vector<1x24x48xf32>
    %123 = vector.shape_cast %122 : vector<1x24x48xf32> to vector<24x48xf32>
    %cst_206 = arith.constant dense<0.000000e+00> : vector<64x48xf32>
    %124 = tpu.matmul %121, %123, %cst_206 {dimension_numbers = #tpu.dot_dimension_numbers<[1], [0], [0], [1], [0, 0, 1, 1], [], []>} : vector<64x24xf32>, vector<24x48xf32>, vector<64x48xf32> -> vector<64x48xf32>
    %125 = arith.addf %119, %124 : vector<64x48xf32>
    %c0_207 = arith.constant 0 : index
    %c0_208 = arith.constant 0 : index
    %c2_209 = arith.constant 2 : index
    %c0_210 = arith.constant 0 : index
    %126 = vector.load %arg16[%c0_207, %c0_208, %c2_209, %c0_210] : memref<1x10x10x24xf32, #tpu.memory_space<vmem>>, vector<1x8x8x24xf32>
    %127 = vector.shape_cast %126 : vector<1x8x8x24xf32> to vector<64x24xf32>
    %c2_211 = arith.constant 2 : index
    %c0_212 = arith.constant 0 : index
    %c0_213 = arith.constant 0 : index
    %128 = vector.load %arg4[%c2_211, %c0_212, %c0_213] : memref<9x24x48xf32, #tpu.memory_space<vmem>>, vector<1x24x48xf32>
    %129 = vector.shape_cast %128 : vector<1x24x48xf32> to vector<24x48xf32>
    %cst_214 = arith.constant dense<0.000000e+00> : vector<64x48xf32>
    %130 = tpu.matmul %127, %129, %cst_214 {dimension_numbers = #tpu.dot_dimension_numbers<[1], [0], [0], [1], [0, 0, 1, 1], [], []>} : vector<64x24xf32>, vector<24x48xf32>, vector<64x48xf32> -> vector<64x48xf32>
    %131 = arith.addf %125, %130 : vector<64x48xf32>
    %c0_215 = arith.constant 0 : index
    %c1_216 = arith.constant 1 : index
    %c0_217 = arith.constant 0 : index
    %c0_218 = arith.constant 0 : index
    %132 = vector.load %arg16[%c0_215, %c1_216, %c0_217, %c0_218] : memref<1x10x10x24xf32, #tpu.memory_space<vmem>>, vector<1x8x8x24xf32>
    %133 = vector.shape_cast %132 : vector<1x8x8x24xf32> to vector<64x24xf32>
    %c3_219 = arith.constant 3 : index
    %c0_220 = arith.constant 0 : index
    %c0_221 = arith.constant 0 : index
    %134 = vector.load %arg4[%c3_219, %c0_220, %c0_221] : memref<9x24x48xf32, #tpu.memory_space<vmem>>, vector<1x24x48xf32>
    %135 = vector.shape_cast %134 : vector<1x24x48xf32> to vector<24x48xf32>
    %cst_222 = arith.constant dense<0.000000e+00> : vector<64x48xf32>
    %136 = tpu.matmul %133, %135, %cst_222 {dimension_numbers = #tpu.dot_dimension_numbers<[1], [0], [0], [1], [0, 0, 1, 1], [], []>} : vector<64x24xf32>, vector<24x48xf32>, vector<64x48xf32> -> vector<64x48xf32>
    %137 = arith.addf %131, %136 : vector<64x48xf32>
    %c0_223 = arith.constant 0 : index
    %c1_224 = arith.constant 1 : index
    %c1_225 = arith.constant 1 : index
    %c0_226 = arith.constant 0 : index
    %138 = vector.load %arg16[%c0_223, %c1_224, %c1_225, %c0_226] : memref<1x10x10x24xf32, #tpu.memory_space<vmem>>, vector<1x8x8x24xf32>
    %139 = vector.shape_cast %138 : vector<1x8x8x24xf32> to vector<64x24xf32>
    %c4_227 = arith.constant 4 : index
    %c0_228 = arith.constant 0 : index
    %c0_229 = arith.constant 0 : index
    %140 = vector.load %arg4[%c4_227, %c0_228, %c0_229] : memref<9x24x48xf32, #tpu.memory_space<vmem>>, vector<1x24x48xf32>
    %141 = vector.shape_cast %140 : vector<1x24x48xf32> to vector<24x48xf32>
    %cst_230 = arith.constant dense<0.000000e+00> : vector<64x48xf32>
    %142 = tpu.matmul %139, %141, %cst_230 {dimension_numbers = #tpu.dot_dimension_numbers<[1], [0], [0], [1], [0, 0, 1, 1], [], []>} : vector<64x24xf32>, vector<24x48xf32>, vector<64x48xf32> -> vector<64x48xf32>
    %143 = arith.addf %137, %142 : vector<64x48xf32>
    %c0_231 = arith.constant 0 : index
    %c1_232 = arith.constant 1 : index
    %c2_233 = arith.constant 2 : index
    %c0_234 = arith.constant 0 : index
    %144 = vector.load %arg16[%c0_231, %c1_232, %c2_233, %c0_234] : memref<1x10x10x24xf32, #tpu.memory_space<vmem>>, vector<1x8x8x24xf32>
    %145 = vector.shape_cast %144 : vector<1x8x8x24xf32> to vector<64x24xf32>
    %c5_235 = arith.constant 5 : index
    %c0_236 = arith.constant 0 : index
    %c0_237 = arith.constant 0 : index
    %146 = vector.load %arg4[%c5_235, %c0_236, %c0_237] : memref<9x24x48xf32, #tpu.memory_space<vmem>>, vector<1x24x48xf32>
    %147 = vector.shape_cast %146 : vector<1x24x48xf32> to vector<24x48xf32>
    %cst_238 = arith.constant dense<0.000000e+00> : vector<64x48xf32>
    %148 = tpu.matmul %145, %147, %cst_238 {dimension_numbers = #tpu.dot_dimension_numbers<[1], [0], [0], [1], [0, 0, 1, 1], [], []>} : vector<64x24xf32>, vector<24x48xf32>, vector<64x48xf32> -> vector<64x48xf32>
    %149 = arith.addf %143, %148 : vector<64x48xf32>
    %c0_239 = arith.constant 0 : index
    %c2_240 = arith.constant 2 : index
    %c0_241 = arith.constant 0 : index
    %c0_242 = arith.constant 0 : index
    %150 = vector.load %arg16[%c0_239, %c2_240, %c0_241, %c0_242] : memref<1x10x10x24xf32, #tpu.memory_space<vmem>>, vector<1x8x8x24xf32>
    %151 = vector.shape_cast %150 : vector<1x8x8x24xf32> to vector<64x24xf32>
    %c6_243 = arith.constant 6 : index
    %c0_244 = arith.constant 0 : index
    %c0_245 = arith.constant 0 : index
    %152 = vector.load %arg4[%c6_243, %c0_244, %c0_245] : memref<9x24x48xf32, #tpu.memory_space<vmem>>, vector<1x24x48xf32>
    %153 = vector.shape_cast %152 : vector<1x24x48xf32> to vector<24x48xf32>
    %cst_246 = arith.constant dense<0.000000e+00> : vector<64x48xf32>
    %154 = tpu.matmul %151, %153, %cst_246 {dimension_numbers = #tpu.dot_dimension_numbers<[1], [0], [0], [1], [0, 0, 1, 1], [], []>} : vector<64x24xf32>, vector<24x48xf32>, vector<64x48xf32> -> vector<64x48xf32>
    %155 = arith.addf %149, %154 : vector<64x48xf32>
    %c0_247 = arith.constant 0 : index
    %c2_248 = arith.constant 2 : index
    %c1_249 = arith.constant 1 : index
    %c0_250 = arith.constant 0 : index
    %156 = vector.load %arg16[%c0_247, %c2_248, %c1_249, %c0_250] : memref<1x10x10x24xf32, #tpu.memory_space<vmem>>, vector<1x8x8x24xf32>
    %157 = vector.shape_cast %156 : vector<1x8x8x24xf32> to vector<64x24xf32>
    %c7_251 = arith.constant 7 : index
    %c0_252 = arith.constant 0 : index
    %c0_253 = arith.constant 0 : index
    %158 = vector.load %arg4[%c7_251, %c0_252, %c0_253] : memref<9x24x48xf32, #tpu.memory_space<vmem>>, vector<1x24x48xf32>
    %159 = vector.shape_cast %158 : vector<1x24x48xf32> to vector<24x48xf32>
    %cst_254 = arith.constant dense<0.000000e+00> : vector<64x48xf32>
    %160 = tpu.matmul %157, %159, %cst_254 {dimension_numbers = #tpu.dot_dimension_numbers<[1], [0], [0], [1], [0, 0, 1, 1], [], []>} : vector<64x24xf32>, vector<24x48xf32>, vector<64x48xf32> -> vector<64x48xf32>
    %161 = arith.addf %155, %160 : vector<64x48xf32>
    %c0_255 = arith.constant 0 : index
    %c2_256 = arith.constant 2 : index
    %c2_257 = arith.constant 2 : index
    %c0_258 = arith.constant 0 : index
    %162 = vector.load %arg16[%c0_255, %c2_256, %c2_257, %c0_258] : memref<1x10x10x24xf32, #tpu.memory_space<vmem>>, vector<1x8x8x24xf32>
    %163 = vector.shape_cast %162 : vector<1x8x8x24xf32> to vector<64x24xf32>
    %c8_259 = arith.constant 8 : index
    %c0_260 = arith.constant 0 : index
    %c0_261 = arith.constant 0 : index
    %164 = vector.load %arg4[%c8_259, %c0_260, %c0_261] : memref<9x24x48xf32, #tpu.memory_space<vmem>>, vector<1x24x48xf32>
    %165 = vector.shape_cast %164 : vector<1x24x48xf32> to vector<24x48xf32>
    %cst_262 = arith.constant dense<0.000000e+00> : vector<64x48xf32>
    %166 = tpu.matmul %163, %165, %cst_262 {dimension_numbers = #tpu.dot_dimension_numbers<[1], [0], [0], [1], [0, 0, 1, 1], [], []>} : vector<64x24xf32>, vector<24x48xf32>, vector<64x48xf32> -> vector<64x48xf32>
    %167 = arith.addf %161, %166 : vector<64x48xf32>
    %cst_263 = arith.constant 0.000000e+00 : f32
    %168 = vector.broadcast %cst_263 : f32 to vector<64x48xf32>
    %169 = arith.cmpf oge, %167, %168 : vector<64x48xf32>
    %cst_264 = arith.constant 2.000000e-01 : f32
    %170 = vector.broadcast %cst_264 : f32 to vector<64x48xf32>
    %171 = arith.mulf %170, %167 : vector<64x48xf32>
    %172 = arith.select %169, %167, %171 : vector<64x48xi1>, vector<64x48xf32>
    %173 = vector.shape_cast %172 : vector<64x48xf32> to vector<1x8x8x48xf32>
    %c0_265 = arith.constant 0 : index
    %c1_266 = arith.constant 1 : index
    %c1_267 = arith.constant 1 : index
    %c0_268 = arith.constant 0 : index
    %174 = vector.load %arg17[%c0_265, %c1_266, %c1_267, %c0_268] : memref<1x10x10x48xf32, #tpu.memory_space<vmem>>, vector<1x8x8x48xf32>
    tpu.vector_store %arg17[%c0_265, %c1_266, %c1_267, %c0_268], %173 {strides = array<i32>} : memref<1x10x10x48xf32, #tpu.memory_space<vmem>>, vector<1x8x8x48xf32>,
    %c0_269 = arith.constant 0 : index
    %c0_270 = arith.constant 0 : index
    %175 = vector.load %arg7[%c0_269, %c0_270] : memref<1x96xf32, #tpu.memory_space<vmem>>, vector<1x96xf32>
    %176 = vector.shape_cast %175 : vector<1x96xf32> to vector<1x96xf32>
    %177 = vector.broadcast %176 : vector<1x96xf32> to vector<64x96xf32>
    %c0_271 = arith.constant 0 : index
    %c1_272 = arith.constant 1 : index
    %c1_273 = arith.constant 1 : index
    %c0_274 = arith.constant 0 : index
    %178 = vector.load %arg17[%c0_271, %c1_272, %c1_273, %c0_274] : memref<1x10x10x48xf32, #tpu.memory_space<vmem>>, vector<1x8x8x48xf32>
    %179 = vector.shape_cast %178 : vector<1x8x8x48xf32> to vector<64x48xf32>
    %c0_275 = arith.constant 0 : index
    %c0_276 = arith.constant 0 : index
    %c0_277 = arith.constant 0 : index
    %180 = vector.load %arg6[%c0_275, %c0_276, %c0_277] : memref<4x48x96xf32, #tpu.memory_space<vmem>>, vector<1x48x96xf32>
    %181 = vector.shape_cast %180 : vector<1x48x96xf32> to vector<48x96xf32>
    %cst_278 = arith.constant dense<0.000000e+00> : vector<64x96xf32>
    %182 = tpu.matmul %179, %181, %cst_278 {dimension_numbers = #tpu.dot_dimension_numbers<[1], [0], [0], [1], [0, 0, 1, 1], [], []>} : vector<64x48xf32>, vector<48x96xf32>, vector<64x96xf32> -> vector<64x96xf32>
    %183 = arith.addf %177, %182 : vector<64x96xf32>
    %c0_279 = arith.constant 0 : index
    %c1_280 = arith.constant 1 : index
    %c2_281 = arith.constant 2 : index
    %c0_282 = arith.constant 0 : index
    %184 = vector.load %arg17[%c0_279, %c1_280, %c2_281, %c0_282] : memref<1x10x10x48xf32, #tpu.memory_space<vmem>>, vector<1x8x8x48xf32>
    %185 = vector.shape_cast %184 : vector<1x8x8x48xf32> to vector<64x48xf32>
    %c1_283 = arith.constant 1 : index
    %c0_284 = arith.constant 0 : index
    %c0_285 = arith.constant 0 : index
    %186 = vector.load %arg6[%c1_283, %c0_284, %c0_285] : memref<4x48x96xf32, #tpu.memory_space<vmem>>, vector<1x48x96xf32>
    %187 = vector.shape_cast %186 : vector<1x48x96xf32> to vector<48x96xf32>
    %cst_286 = arith.constant dense<0.000000e+00> : vector<64x96xf32>
    %188 = tpu.matmul %185, %187, %cst_286 {dimension_numbers = #tpu.dot_dimension_numbers<[1], [0], [0], [1], [0, 0, 1, 1], [], []>} : vector<64x48xf32>, vector<48x96xf32>, vector<64x96xf32> -> vector<64x96xf32>
    %189 = arith.addf %183, %188 : vector<64x96xf32>
    %c0_287 = arith.constant 0 : index
    %c2_288 = arith.constant 2 : index
    %c1_289 = arith.constant 1 : index
    %c0_290 = arith.constant 0 : index
    %190 = vector.load %arg17[%c0_287, %c2_288, %c1_289, %c0_290] : memref<1x10x10x48xf32, #tpu.memory_space<vmem>>, vector<1x8x8x48xf32>
    %191 = vector.shape_cast %190 : vector<1x8x8x48xf32> to vector<64x48xf32>
    %c2_291 = arith.constant 2 : index
    %c0_292 = arith.constant 0 : index
    %c0_293 = arith.constant 0 : index
    %192 = vector.load %arg6[%c2_291, %c0_292, %c0_293] : memref<4x48x96xf32, #tpu.memory_space<vmem>>, vector<1x48x96xf32>
    %193 = vector.shape_cast %192 : vector<1x48x96xf32> to vector<48x96xf32>
    %cst_294 = arith.constant dense<0.000000e+00> : vector<64x96xf32>
    %194 = tpu.matmul %191, %193, %cst_294 {dimension_numbers = #tpu.dot_dimension_numbers<[1], [0], [0], [1], [0, 0, 1, 1], [], []>} : vector<64x48xf32>, vector<48x96xf32>, vector<64x96xf32> -> vector<64x96xf32>
    %195 = arith.addf %189, %194 : vector<64x96xf32>
    %c0_295 = arith.constant 0 : index
    %c2_296 = arith.constant 2 : index
    %c2_297 = arith.constant 2 : index
    %c0_298 = arith.constant 0 : index
    %196 = vector.load %arg17[%c0_295, %c2_296, %c2_297, %c0_298] : memref<1x10x10x48xf32, #tpu.memory_space<vmem>>, vector<1x8x8x48xf32>
    %197 = vector.shape_cast %196 : vector<1x8x8x48xf32> to vector<64x48xf32>
    %c3_299 = arith.constant 3 : index
    %c0_300 = arith.constant 0 : index
    %c0_301 = arith.constant 0 : index
    %198 = vector.load %arg6[%c3_299, %c0_300, %c0_301] : memref<4x48x96xf32, #tpu.memory_space<vmem>>, vector<1x48x96xf32>
    %199 = vector.shape_cast %198 : vector<1x48x96xf32> to vector<48x96xf32>
    %cst_302 = arith.constant dense<0.000000e+00> : vector<64x96xf32>
    %200 = tpu.matmul %197, %199, %cst_302 {dimension_numbers = #tpu.dot_dimension_numbers<[1], [0], [0], [1], [0, 0, 1, 1], [], []>} : vector<64x48xf32>, vector<48x96xf32>, vector<64x96xf32> -> vector<64x96xf32>
    %201 = arith.addf %195, %200 : vector<64x96xf32>
    %cst_303 = arith.constant 0.000000e+00 : f32
    %202 = vector.broadcast %cst_303 : f32 to vector<64x96xf32>
    %203 = arith.cmpf oge, %201, %202 : vector<64x96xf32>
    %cst_304 = arith.constant 2.000000e-01 : f32
    %204 = vector.broadcast %cst_304 : f32 to vector<64x96xf32>
    %205 = arith.mulf %204, %201 : vector<64x96xf32>
    %206 = arith.select %203, %201, %205 : vector<64x96xi1>, vector<64x96xf32>
    %207 = vector.shape_cast %206 : vector<64x96xf32> to vector<1x8x8x96xf32>
    %c0_305 = arith.constant 0 : index
    %c1_306 = arith.constant 1 : index
    %c1_307 = arith.constant 1 : index
    %c0_308 = arith.constant 0 : index
    %208 = vector.load %arg18[%c0_305, %c1_306, %c1_307, %c0_308] : memref<1x10x10x96xf32, #tpu.memory_space<vmem>>, vector<1x8x8x96xf32>
    tpu.vector_store %arg18[%c0_305, %c1_306, %c1_307, %c0_308], %207 {strides = array<i32>} : memref<1x10x10x96xf32, #tpu.memory_space<vmem>>, vector<1x8x8x96xf32>,
    %c0_309 = arith.constant 0 : index
    %c0_310 = arith.constant 0 : index
    %209 = vector.load %arg10[%c0_309, %c0_310] : memref<1x96xf32, #tpu.memory_space<vmem>>, vector<1x96xf32>
    %210 = vector.shape_cast %209 : vector<1x96xf32> to vector<1x96xf32>
    %211 = vector.broadcast %210 : vector<1x96xf32> to vector<64x96xf32>
    %c0_311 = arith.constant 0 : index
    %c0_312 = arith.constant 0 : index
    %c0_313 = arith.constant 0 : index
    %c0_314 = arith.constant 0 : index
    %212 = vector.load %arg18[%c0_311, %c0_312, %c0_313, %c0_314] : memref<1x10x10x96xf32, #tpu.memory_space<vmem>>, vector<1x8x8x96xf32>
    %213 = vector.shape_cast %212 : vector<1x8x8x96xf32> to vector<64x96xf32>
    %c0_315 = arith.constant 0 : index
    %c0_316 = arith.constant 0 : index
    %c0_317 = arith.constant 0 : index
    %214 = vector.load %arg8[%c0_315, %c0_316, %c0_317] : memref<9x96x96xf32, #tpu.memory_space<vmem>>, vector<1x96x96xf32>
    %215 = vector.shape_cast %214 : vector<1x96x96xf32> to vector<96x96xf32>
    %cst_318 = arith.constant dense<0.000000e+00> : vector<64x96xf32>
    %216 = tpu.matmul %213, %215, %cst_318 {dimension_numbers = #tpu.dot_dimension_numbers<[1], [0], [0], [1], [0, 0, 1, 1], [], []>} : vector<64x96xf32>, vector<96x96xf32>, vector<64x96xf32> -> vector<64x96xf32>
    %217 = arith.addf %211, %216 : vector<64x96xf32>
    %c0_319 = arith.constant 0 : index
    %c0_320 = arith.constant 0 : index
    %c1_321 = arith.constant 1 : index
    %c0_322 = arith.constant 0 : index
    %218 = vector.load %arg18[%c0_319, %c0_320, %c1_321, %c0_322] : memref<1x10x10x96xf32, #tpu.memory_space<vmem>>, vector<1x8x8x96xf32>
    %219 = vector.shape_cast %218 : vector<1x8x8x96xf32> to vector<64x96xf32>
    %c1_323 = arith.constant 1 : index
    %c0_324 = arith.constant 0 : index
    %c0_325 = arith.constant 0 : index
    %220 = vector.load %arg8[%c1_323, %c0_324, %c0_325] : memref<9x96x96xf32, #tpu.memory_space<vmem>>, vector<1x96x96xf32>
    %221 = vector.shape_cast %220 : vector<1x96x96xf32> to vector<96x96xf32>
    %cst_326 = arith.constant dense<0.000000e+00> : vector<64x96xf32>
    %222 = tpu.matmul %219, %221, %cst_326 {dimension_numbers = #tpu.dot_dimension_numbers<[1], [0], [0], [1], [0, 0, 1, 1], [], []>} : vector<64x96xf32>, vector<96x96xf32>, vector<64x96xf32> -> vector<64x96xf32>
    %223 = arith.addf %217, %222 : vector<64x96xf32>
    %c0_327 = arith.constant 0 : index
    %c0_328 = arith.constant 0 : index
    %c2_329 = arith.constant 2 : index
    %c0_330 = arith.constant 0 : index
    %224 = vector.load %arg18[%c0_327, %c0_328, %c2_329, %c0_330] : memref<1x10x10x96xf32, #tpu.memory_space<vmem>>, vector<1x8x8x96xf32>
    %225 = vector.shape_cast %224 : vector<1x8x8x96xf32> to vector<64x96xf32>
    %c2_331 = arith.constant 2 : index
    %c0_332 = arith.constant 0 : index
    %c0_333 = arith.constant 0 : index
    %226 = vector.load %arg8[%c2_331, %c0_332, %c0_333] : memref<9x96x96xf32, #tpu.memory_space<vmem>>, vector<1x96x96xf32>
    %227 = vector.shape_cast %226 : vector<1x96x96xf32> to vector<96x96xf32>
    %cst_334 = arith.constant dense<0.000000e+00> : vector<64x96xf32>
    %228 = tpu.matmul %225, %227, %cst_334 {dimension_numbers = #tpu.dot_dimension_numbers<[1], [0], [0], [1], [0, 0, 1, 1], [], []>} : vector<64x96xf32>, vector<96x96xf32>, vector<64x96xf32> -> vector<64x96xf32>
    %229 = arith.addf %223, %228 : vector<64x96xf32>
    %c0_335 = arith.constant 0 : index
    %c1_336 = arith.constant 1 : index
    %c0_337 = arith.constant 0 : index
    %c0_338 = arith.constant 0 : index
    %230 = vector.load %arg18[%c0_335, %c1_336, %c0_337, %c0_338] : memref<1x10x10x96xf32, #tpu.memory_space<vmem>>, vector<1x8x8x96xf32>
    %231 = vector.shape_cast %230 : vector<1x8x8x96xf32> to vector<64x96xf32>
    %c3_339 = arith.constant 3 : index
    %c0_340 = arith.constant 0 : index
    %c0_341 = arith.constant 0 : index
    %232 = vector.load %arg8[%c3_339, %c0_340, %c0_341] : memref<9x96x96xf32, #tpu.memory_space<vmem>>, vector<1x96x96xf32>
    %233 = vector.shape_cast %232 : vector<1x96x96xf32> to vector<96x96xf32>
    %cst_342 = arith.constant dense<0.000000e+00> : vector<64x96xf32>
    %234 = tpu.matmul %231, %233, %cst_342 {dimension_numbers = #tpu.dot_dimension_numbers<[1], [0], [0], [1], [0, 0, 1, 1], [], []>} : vector<64x96xf32>, vector<96x96xf32>, vector<64x96xf32> -> vector<64x96xf32>
    %235 = arith.addf %229, %234 : vector<64x96xf32>
    %c0_343 = arith.constant 0 : index
    %c1_344 = arith.constant 1 : index
    %c1_345 = arith.constant 1 : index
    %c0_346 = arith.constant 0 : index
    %236 = vector.load %arg18[%c0_343, %c1_344, %c1_345, %c0_346] : memref<1x10x10x96xf32, #tpu.memory_space<vmem>>, vector<1x8x8x96xf32>
    %237 = vector.shape_cast %236 : vector<1x8x8x96xf32> to vector<64x96xf32>
    %c4_347 = arith.constant 4 : index
    %c0_348 = arith.constant 0 : index
    %c0_349 = arith.constant 0 : index
    %238 = vector.load %arg8[%c4_347, %c0_348, %c0_349] : memref<9x96x96xf32, #tpu.memory_space<vmem>>, vector<1x96x96xf32>
    %239 = vector.shape_cast %238 : vector<1x96x96xf32> to vector<96x96xf32>
    %cst_350 = arith.constant dense<0.000000e+00> : vector<64x96xf32>
    %240 = tpu.matmul %237, %239, %cst_350 {dimension_numbers = #tpu.dot_dimension_numbers<[1], [0], [0], [1], [0, 0, 1, 1], [], []>} : vector<64x96xf32>, vector<96x96xf32>, vector<64x96xf32> -> vector<64x96xf32>
    %241 = arith.addf %235, %240 : vector<64x96xf32>
    %c0_351 = arith.constant 0 : index
    %c1_352 = arith.constant 1 : index
    %c2_353 = arith.constant 2 : index
    %c0_354 = arith.constant 0 : index
    %242 = vector.load %arg18[%c0_351, %c1_352, %c2_353, %c0_354] : memref<1x10x10x96xf32, #tpu.memory_space<vmem>>, vector<1x8x8x96xf32>
    %243 = vector.shape_cast %242 : vector<1x8x8x96xf32> to vector<64x96xf32>
    %c5_355 = arith.constant 5 : index
    %c0_356 = arith.constant 0 : index
    %c0_357 = arith.constant 0 : index
    %244 = vector.load %arg8[%c5_355, %c0_356, %c0_357] : memref<9x96x96xf32, #tpu.memory_space<vmem>>, vector<1x96x96xf32>
    %245 = vector.shape_cast %244 : vector<1x96x96xf32> to vector<96x96xf32>
    %cst_358 = arith.constant dense<0.000000e+00> : vector<64x96xf32>
    %246 = tpu.matmul %243, %245, %cst_358 {dimension_numbers = #tpu.dot_dimension_numbers<[1], [0], [0], [1], [0, 0, 1, 1], [], []>} : vector<64x96xf32>, vector<96x96xf32>, vector<64x96xf32> -> vector<64x96xf32>
    %247 = arith.addf %241, %246 : vector<64x96xf32>
    %c0_359 = arith.constant 0 : index
    %c2_360 = arith.constant 2 : index
    %c0_361 = arith.constant 0 : index
    %c0_362 = arith.constant 0 : index
    %248 = vector.load %arg18[%c0_359, %c2_360, %c0_361, %c0_362] : memref<1x10x10x96xf32, #tpu.memory_space<vmem>>, vector<1x8x8x96xf32>
    %249 = vector.shape_cast %248 : vector<1x8x8x96xf32> to vector<64x96xf32>
    %c6_363 = arith.constant 6 : index
    %c0_364 = arith.constant 0 : index
    %c0_365 = arith.constant 0 : index
    %250 = vector.load %arg8[%c6_363, %c0_364, %c0_365] : memref<9x96x96xf32, #tpu.memory_space<vmem>>, vector<1x96x96xf32>
    %251 = vector.shape_cast %250 : vector<1x96x96xf32> to vector<96x96xf32>
    %cst_366 = arith.constant dense<0.000000e+00> : vector<64x96xf32>
    %252 = tpu.matmul %249, %251, %cst_366 {dimension_numbers = #tpu.dot_dimension_numbers<[1], [0], [0], [1], [0, 0, 1, 1], [], []>} : vector<64x96xf32>, vector<96x96xf32>, vector<64x96xf32> -> vector<64x96xf32>
    %253 = arith.addf %247, %252 : vector<64x96xf32>
    %c0_367 = arith.constant 0 : index
    %c2_368 = arith.constant 2 : index
    %c1_369 = arith.constant 1 : index
    %c0_370 = arith.constant 0 : index
    %254 = vector.load %arg18[%c0_367, %c2_368, %c1_369, %c0_370] : memref<1x10x10x96xf32, #tpu.memory_space<vmem>>, vector<1x8x8x96xf32>
    %255 = vector.shape_cast %254 : vector<1x8x8x96xf32> to vector<64x96xf32>
    %c7_371 = arith.constant 7 : index
    %c0_372 = arith.constant 0 : index
    %c0_373 = arith.constant 0 : index
    %256 = vector.load %arg8[%c7_371, %c0_372, %c0_373] : memref<9x96x96xf32, #tpu.memory_space<vmem>>, vector<1x96x96xf32>
    %257 = vector.shape_cast %256 : vector<1x96x96xf32> to vector<96x96xf32>
    %cst_374 = arith.constant dense<0.000000e+00> : vector<64x96xf32>
    %258 = tpu.matmul %255, %257, %cst_374 {dimension_numbers = #tpu.dot_dimension_numbers<[1], [0], [0], [1], [0, 0, 1, 1], [], []>} : vector<64x96xf32>, vector<96x96xf32>, vector<64x96xf32> -> vector<64x96xf32>
    %259 = arith.addf %253, %258 : vector<64x96xf32>
    %c0_375 = arith.constant 0 : index
    %c2_376 = arith.constant 2 : index
    %c2_377 = arith.constant 2 : index
    %c0_378 = arith.constant 0 : index
    %260 = vector.load %arg18[%c0_375, %c2_376, %c2_377, %c0_378] : memref<1x10x10x96xf32, #tpu.memory_space<vmem>>, vector<1x8x8x96xf32>
    %261 = vector.shape_cast %260 : vector<1x8x8x96xf32> to vector<64x96xf32>
    %c8_379 = arith.constant 8 : index
    %c0_380 = arith.constant 0 : index
    %c0_381 = arith.constant 0 : index
    %262 = vector.load %arg8[%c8_379, %c0_380, %c0_381] : memref<9x96x96xf32, #tpu.memory_space<vmem>>, vector<1x96x96xf32>
    %263 = vector.shape_cast %262 : vector<1x96x96xf32> to vector<96x96xf32>
    %cst_382 = arith.constant dense<0.000000e+00> : vector<64x96xf32>
    %264 = tpu.matmul %261, %263, %cst_382 {dimension_numbers = #tpu.dot_dimension_numbers<[1], [0], [0], [1], [0, 0, 1, 1], [], []>} : vector<64x96xf32>, vector<96x96xf32>, vector<64x96xf32> -> vector<64x96xf32>
    %265 = arith.addf %259, %264 : vector<64x96xf32>
    %c0_383 = arith.constant 0 : index
    %c0_384 = arith.constant 0 : index
    %c0_385 = arith.constant 0 : index
    %c0_386 = arith.constant 0 : index
    %266 = vector.load %arg15[%c0_383, %c0_384, %c0_385, %c0_386] : memref<1x10x10x96xf32, #tpu.memory_space<vmem>>, vector<1x8x8x96xf32>
    %267 = vector.shape_cast %266 : vector<1x8x8x96xf32> to vector<64x96xf32>
    %c0_387 = arith.constant 0 : index
    %c0_388 = arith.constant 0 : index
    %c0_389 = arith.constant 0 : index
    %268 = vector.load %arg9[%c0_387, %c0_388, %c0_389] : memref<9x96x96xf32, #tpu.memory_space<vmem>>, vector<1x96x96xf32>
    %269 = vector.shape_cast %268 : vector<1x96x96xf32> to vector<96x96xf32>
    %cst_390 = arith.constant dense<0.000000e+00> : vector<64x96xf32>
    %270 = tpu.matmul %267, %269, %cst_390 {dimension_numbers = #tpu.dot_dimension_numbers<[1], [0], [0], [1], [0, 0, 1, 1], [], []>} : vector<64x96xf32>, vector<96x96xf32>, vector<64x96xf32> -> vector<64x96xf32>
    %271 = arith.addf %265, %270 : vector<64x96xf32>
    %c0_391 = arith.constant 0 : index
    %c0_392 = arith.constant 0 : index
    %c1_393 = arith.constant 1 : index
    %c0_394 = arith.constant 0 : index
    %272 = vector.load %arg15[%c0_391, %c0_392, %c1_393, %c0_394] : memref<1x10x10x96xf32, #tpu.memory_space<vmem>>, vector<1x8x8x96xf32>
    %273 = vector.shape_cast %272 : vector<1x8x8x96xf32> to vector<64x96xf32>
    %c1_395 = arith.constant 1 : index
    %c0_396 = arith.constant 0 : index
    %c0_397 = arith.constant 0 : index
    %274 = vector.load %arg9[%c1_395, %c0_396, %c0_397] : memref<9x96x96xf32, #tpu.memory_space<vmem>>, vector<1x96x96xf32>
    %275 = vector.shape_cast %274 : vector<1x96x96xf32> to vector<96x96xf32>
    %cst_398 = arith.constant dense<0.000000e+00> : vector<64x96xf32>
    %276 = tpu.matmul %273, %275, %cst_398 {dimension_numbers = #tpu.dot_dimension_numbers<[1], [0], [0], [1], [0, 0, 1, 1], [], []>} : vector<64x96xf32>, vector<96x96xf32>, vector<64x96xf32> -> vector<64x96xf32>
    %277 = arith.addf %271, %276 : vector<64x96xf32>
    %c0_399 = arith.constant 0 : index
    %c0_400 = arith.constant 0 : index
    %c2_401 = arith.constant 2 : index
    %c0_402 = arith.constant 0 : index
    %278 = vector.load %arg15[%c0_399, %c0_400, %c2_401, %c0_402] : memref<1x10x10x96xf32, #tpu.memory_space<vmem>>, vector<1x8x8x96xf32>
    %279 = vector.shape_cast %278 : vector<1x8x8x96xf32> to vector<64x96xf32>
    %c2_403 = arith.constant 2 : index
    %c0_404 = arith.constant 0 : index
    %c0_405 = arith.constant 0 : index
    %280 = vector.load %arg9[%c2_403, %c0_404, %c0_405] : memref<9x96x96xf32, #tpu.memory_space<vmem>>, vector<1x96x96xf32>
    %281 = vector.shape_cast %280 : vector<1x96x96xf32> to vector<96x96xf32>
    %cst_406 = arith.constant dense<0.000000e+00> : vector<64x96xf32>
    %282 = tpu.matmul %279, %281, %cst_406 {dimension_numbers = #tpu.dot_dimension_numbers<[1], [0], [0], [1], [0, 0, 1, 1], [], []>} : vector<64x96xf32>, vector<96x96xf32>, vector<64x96xf32> -> vector<64x96xf32>
    %283 = arith.addf %277, %282 : vector<64x96xf32>
    %c0_407 = arith.constant 0 : index
    %c1_408 = arith.constant 1 : index
    %c0_409 = arith.constant 0 : index
    %c0_410 = arith.constant 0 : index
    %284 = vector.load %arg15[%c0_407, %c1_408, %c0_409, %c0_410] : memref<1x10x10x96xf32, #tpu.memory_space<vmem>>, vector<1x8x8x96xf32>
    %285 = vector.shape_cast %284 : vector<1x8x8x96xf32> to vector<64x96xf32>
    %c3_411 = arith.constant 3 : index
    %c0_412 = arith.constant 0 : index
    %c0_413 = arith.constant 0 : index
    %286 = vector.load %arg9[%c3_411, %c0_412, %c0_413] : memref<9x96x96xf32, #tpu.memory_space<vmem>>, vector<1x96x96xf32>
    %287 = vector.shape_cast %286 : vector<1x96x96xf32> to vector<96x96xf32>
    %cst_414 = arith.constant dense<0.000000e+00> : vector<64x96xf32>
    %288 = tpu.matmul %285, %287, %cst_414 {dimension_numbers = #tpu.dot_dimension_numbers<[1], [0], [0], [1], [0, 0, 1, 1], [], []>} : vector<64x96xf32>, vector<96x96xf32>, vector<64x96xf32> -> vector<64x96xf32>
    %289 = arith.addf %283, %288 : vector<64x96xf32>
    %c0_415 = arith.constant 0 : index
    %c1_416 = arith.constant 1 : index
    %c1_417 = arith.constant 1 : index
    %c0_418 = arith.constant 0 : index
    %290 = vector.load %arg15[%c0_415, %c1_416, %c1_417, %c0_418] : memref<1x10x10x96xf32, #tpu.memory_space<vmem>>, vector<1x8x8x96xf32>
    %291 = vector.shape_cast %290 : vector<1x8x8x96xf32> to vector<64x96xf32>
    %c4_419 = arith.constant 4 : index
    %c0_420 = arith.constant 0 : index
    %c0_421 = arith.constant 0 : index
    %292 = vector.load %arg9[%c4_419, %c0_420, %c0_421] : memref<9x96x96xf32, #tpu.memory_space<vmem>>, vector<1x96x96xf32>
    %293 = vector.shape_cast %292 : vector<1x96x96xf32> to vector<96x96xf32>
    %cst_422 = arith.constant dense<0.000000e+00> : vector<64x96xf32>
    %294 = tpu.matmul %291, %293, %cst_422 {dimension_numbers = #tpu.dot_dimension_numbers<[1], [0], [0], [1], [0, 0, 1, 1], [], []>} : vector<64x96xf32>, vector<96x96xf32>, vector<64x96xf32> -> vector<64x96xf32>
    %295 = arith.addf %289, %294 : vector<64x96xf32>
    %c0_423 = arith.constant 0 : index
    %c1_424 = arith.constant 1 : index
    %c2_425 = arith.constant 2 : index
    %c0_426 = arith.constant 0 : index
    %296 = vector.load %arg15[%c0_423, %c1_424, %c2_425, %c0_426] : memref<1x10x10x96xf32, #tpu.memory_space<vmem>>, vector<1x8x8x96xf32>
    %297 = vector.shape_cast %296 : vector<1x8x8x96xf32> to vector<64x96xf32>
    %c5_427 = arith.constant 5 : index
    %c0_428 = arith.constant 0 : index
    %c0_429 = arith.constant 0 : index
    %298 = vector.load %arg9[%c5_427, %c0_428, %c0_429] : memref<9x96x96xf32, #tpu.memory_space<vmem>>, vector<1x96x96xf32>
    %299 = vector.shape_cast %298 : vector<1x96x96xf32> to vector<96x96xf32>
    %cst_430 = arith.constant dense<0.000000e+00> : vector<64x96xf32>
    %300 = tpu.matmul %297, %299, %cst_430 {dimension_numbers = #tpu.dot_dimension_numbers<[1], [0], [0], [1], [0, 0, 1, 1], [], []>} : vector<64x96xf32>, vector<96x96xf32>, vector<64x96xf32> -> vector<64x96xf32>
    %301 = arith.addf %295, %300 : vector<64x96xf32>
    %c0_431 = arith.constant 0 : index
    %c2_432 = arith.constant 2 : index
    %c0_433 = arith.constant 0 : index
    %c0_434 = arith.constant 0 : index
    %302 = vector.load %arg15[%c0_431, %c2_432, %c0_433, %c0_434] : memref<1x10x10x96xf32, #tpu.memory_space<vmem>>, vector<1x8x8x96xf32>
    %303 = vector.shape_cast %302 : vector<1x8x8x96xf32> to vector<64x96xf32>
    %c6_435 = arith.constant 6 : index
    %c0_436 = arith.constant 0 : index
    %c0_437 = arith.constant 0 : index
    %304 = vector.load %arg9[%c6_435, %c0_436, %c0_437] : memref<9x96x96xf32, #tpu.memory_space<vmem>>, vector<1x96x96xf32>
    %305 = vector.shape_cast %304 : vector<1x96x96xf32> to vector<96x96xf32>
    %cst_438 = arith.constant dense<0.000000e+00> : vector<64x96xf32>
    %306 = tpu.matmul %303, %305, %cst_438 {dimension_numbers = #tpu.dot_dimension_numbers<[1], [0], [0], [1], [0, 0, 1, 1], [], []>} : vector<64x96xf32>, vector<96x96xf32>, vector<64x96xf32> -> vector<64x96xf32>
    %307 = arith.addf %301, %306 : vector<64x96xf32>
    %c0_439 = arith.constant 0 : index
    %c2_440 = arith.constant 2 : index
    %c1_441 = arith.constant 1 : index
    %c0_442 = arith.constant 0 : index
    %308 = vector.load %arg15[%c0_439, %c2_440, %c1_441, %c0_442] : memref<1x10x10x96xf32, #tpu.memory_space<vmem>>, vector<1x8x8x96xf32>
    %309 = vector.shape_cast %308 : vector<1x8x8x96xf32> to vector<64x96xf32>
    %c7_443 = arith.constant 7 : index
    %c0_444 = arith.constant 0 : index
    %c0_445 = arith.constant 0 : index
    %310 = vector.load %arg9[%c7_443, %c0_444, %c0_445] : memref<9x96x96xf32, #tpu.memory_space<vmem>>, vector<1x96x96xf32>
    %311 = vector.shape_cast %310 : vector<1x96x96xf32> to vector<96x96xf32>
    %cst_446 = arith.constant dense<0.000000e+00> : vector<64x96xf32>
    %312 = tpu.matmul %309, %311, %cst_446 {dimension_numbers = #tpu.dot_dimension_numbers<[1], [0], [0], [1], [0, 0, 1, 1], [], []>} : vector<64x96xf32>, vector<96x96xf32>, vector<64x96xf32> -> vector<64x96xf32>
    %313 = arith.addf %307, %312 : vector<64x96xf32>
    %c0_447 = arith.constant 0 : index
    %c2_448 = arith.constant 2 : index
    %c2_449 = arith.constant 2 : index
    %c0_450 = arith.constant 0 : index
    %314 = vector.load %arg15[%c0_447, %c2_448, %c2_449, %c0_450] : memref<1x10x10x96xf32, #tpu.memory_space<vmem>>, vector<1x8x8x96xf32>
    %315 = vector.shape_cast %314 : vector<1x8x8x96xf32> to vector<64x96xf32>
    %c8_451 = arith.constant 8 : index
    %c0_452 = arith.constant 0 : index
    %c0_453 = arith.constant 0 : index
    %316 = vector.load %arg9[%c8_451, %c0_452, %c0_453] : memref<9x96x96xf32, #tpu.memory_space<vmem>>, vector<1x96x96xf32>
    %317 = vector.shape_cast %316 : vector<1x96x96xf32> to vector<96x96xf32>
    %cst_454 = arith.constant dense<0.000000e+00> : vector<64x96xf32>
    %318 = tpu.matmul %315, %317, %cst_454 {dimension_numbers = #tpu.dot_dimension_numbers<[1], [0], [0], [1], [0, 0, 1, 1], [], []>} : vector<64x96xf32>, vector<96x96xf32>, vector<64x96xf32> -> vector<64x96xf32>
    %319 = arith.addf %313, %318 : vector<64x96xf32>
    %cst_455 = arith.constant 0.000000e+00 : f32
    %320 = vector.broadcast %cst_455 : f32 to vector<64x96xf32>
    %321 = arith.cmpf oge, %319, %320 : vector<64x96xf32>
    %cst_456 = arith.constant 2.000000e-01 : f32
    %322 = vector.broadcast %cst_456 : f32 to vector<64x96xf32>
    %323 = arith.mulf %322, %319 : vector<64x96xf32>
    %324 = arith.select %321, %319, %323 : vector<64x96xi1>, vector<64x96xf32>
    %325 = vector.shape_cast %324 : vector<64x96xf32> to vector<1x8x8x96xf32>
    %c0_457 = arith.constant 0 : index
    %c1_458 = arith.constant 1 : index
    %c1_459 = arith.constant 1 : index
    %c0_460 = arith.constant 0 : index
    %326 = vector.load %arg19[%c0_457, %c1_458, %c1_459, %c0_460] : memref<1x10x10x96xf32, #tpu.memory_space<vmem>>, vector<1x8x8x96xf32>
    tpu.vector_store %arg19[%c0_457, %c1_458, %c1_459, %c0_460], %325 {strides = array<i32>} : memref<1x10x10x96xf32, #tpu.memory_space<vmem>>, vector<1x8x8x96xf32>,
    %c0_461 = arith.constant 0 : index
    %c0_462 = arith.constant 0 : index
    %327 = vector.load %arg12[%c0_461, %c0_462] : memref<1x128xf32, #tpu.memory_space<vmem>>, vector<1x128xf32>
    %328 = vector.shape_cast %327 : vector<1x128xf32> to vector<1x128xf32>
    %329 = vector.broadcast %328 : vector<1x128xf32> to vector<64x128xf32>
    %c0_463 = arith.constant 0 : index
    %c0_464 = arith.constant 0 : index
    %c0_465 = arith.constant 0 : index
    %c0_466 = arith.constant 0 : index
    %330 = vector.load %arg19[%c0_463, %c0_464, %c0_465, %c0_466] : memref<1x10x10x96xf32, #tpu.memory_space<vmem>>, vector<1x8x8x96xf32>
    %331 = vector.shape_cast %330 : vector<1x8x8x96xf32> to vector<64x96xf32>
    %c0_467 = arith.constant 0 : index
    %c0_468 = arith.constant 0 : index
    %c0_469 = arith.constant 0 : index
    %332 = vector.load %arg11[%c0_467, %c0_468, %c0_469] : memref<9x96x128xf32, #tpu.memory_space<vmem>>, vector<1x96x128xf32>
    %333 = vector.shape_cast %332 : vector<1x96x128xf32> to vector<96x128xf32>
    %cst_470 = arith.constant dense<0.000000e+00> : vector<64x128xf32>
    %334 = tpu.matmul %331, %333, %cst_470 {dimension_numbers = #tpu.dot_dimension_numbers<[1], [0], [0], [1], [0, 0, 1, 1], [], []>} : vector<64x96xf32>, vector<96x128xf32>, vector<64x128xf32> -> vector<64x128xf32>
    %335 = arith.addf %329, %334 : vector<64x128xf32>
    %c0_471 = arith.constant 0 : index
    %c0_472 = arith.constant 0 : index
    %c1_473 = arith.constant 1 : index
    %c0_474 = arith.constant 0 : index
    %336 = vector.load %arg19[%c0_471, %c0_472, %c1_473, %c0_474] : memref<1x10x10x96xf32, #tpu.memory_space<vmem>>, vector<1x8x8x96xf32>
    %337 = vector.shape_cast %336 : vector<1x8x8x96xf32> to vector<64x96xf32>
    %c1_475 = arith.constant 1 : index
    %c0_476 = arith.constant 0 : index
    %c0_477 = arith.constant 0 : index
    %338 = vector.load %arg11[%c1_475, %c0_476, %c0_477] : memref<9x96x128xf32, #tpu.memory_space<vmem>>, vector<1x96x128xf32>
    %339 = vector.shape_cast %338 : vector<1x96x128xf32> to vector<96x128xf32>
    %cst_478 = arith.constant dense<0.000000e+00> : vector<64x128xf32>
    %340 = tpu.matmul %337, %339, %cst_478 {dimension_numbers = #tpu.dot_dimension_numbers<[1], [0], [0], [1], [0, 0, 1, 1], [], []>} : vector<64x96xf32>, vector<96x128xf32>, vector<64x128xf32> -> vector<64x128xf32>
    %341 = arith.addf %335, %340 : vector<64x128xf32>
    %c0_479 = arith.constant 0 : index
    %c0_480 = arith.constant 0 : index
    %c2_481 = arith.constant 2 : index
    %c0_482 = arith.constant 0 : index
    %342 = vector.load %arg19[%c0_479, %c0_480, %c2_481, %c0_482] : memref<1x10x10x96xf32, #tpu.memory_space<vmem>>, vector<1x8x8x96xf32>
    %343 = vector.shape_cast %342 : vector<1x8x8x96xf32> to vector<64x96xf32>
    %c2_483 = arith.constant 2 : index
    %c0_484 = arith.constant 0 : index
    %c0_485 = arith.constant 0 : index
    %344 = vector.load %arg11[%c2_483, %c0_484, %c0_485] : memref<9x96x128xf32, #tpu.memory_space<vmem>>, vector<1x96x128xf32>
    %345 = vector.shape_cast %344 : vector<1x96x128xf32> to vector<96x128xf32>
    %cst_486 = arith.constant dense<0.000000e+00> : vector<64x128xf32>
    %346 = tpu.matmul %343, %345, %cst_486 {dimension_numbers = #tpu.dot_dimension_numbers<[1], [0], [0], [1], [0, 0, 1, 1], [], []>} : vector<64x96xf32>, vector<96x128xf32>, vector<64x128xf32> -> vector<64x128xf32>
    %347 = arith.addf %341, %346 : vector<64x128xf32>
    %c0_487 = arith.constant 0 : index
    %c1_488 = arith.constant 1 : index
    %c0_489 = arith.constant 0 : index
    %c0_490 = arith.constant 0 : index
    %348 = vector.load %arg19[%c0_487, %c1_488, %c0_489, %c0_490] : memref<1x10x10x96xf32, #tpu.memory_space<vmem>>, vector<1x8x8x96xf32>
    %349 = vector.shape_cast %348 : vector<1x8x8x96xf32> to vector<64x96xf32>
    %c3_491 = arith.constant 3 : index
    %c0_492 = arith.constant 0 : index
    %c0_493 = arith.constant 0 : index
    %350 = vector.load %arg11[%c3_491, %c0_492, %c0_493] : memref<9x96x128xf32, #tpu.memory_space<vmem>>, vector<1x96x128xf32>
    %351 = vector.shape_cast %350 : vector<1x96x128xf32> to vector<96x128xf32>
    %cst_494 = arith.constant dense<0.000000e+00> : vector<64x128xf32>
    %352 = tpu.matmul %349, %351, %cst_494 {dimension_numbers = #tpu.dot_dimension_numbers<[1], [0], [0], [1], [0, 0, 1, 1], [], []>} : vector<64x96xf32>, vector<96x128xf32>, vector<64x128xf32> -> vector<64x128xf32>
    %353 = arith.addf %347, %352 : vector<64x128xf32>
    %c0_495 = arith.constant 0 : index
    %c1_496 = arith.constant 1 : index
    %c1_497 = arith.constant 1 : index
    %c0_498 = arith.constant 0 : index
    %354 = vector.load %arg19[%c0_495, %c1_496, %c1_497, %c0_498] : memref<1x10x10x96xf32, #tpu.memory_space<vmem>>, vector<1x8x8x96xf32>
    %355 = vector.shape_cast %354 : vector<1x8x8x96xf32> to vector<64x96xf32>
    %c4_499 = arith.constant 4 : index
    %c0_500 = arith.constant 0 : index
    %c0_501 = arith.constant 0 : index
    %356 = vector.load %arg11[%c4_499, %c0_500, %c0_501] : memref<9x96x128xf32, #tpu.memory_space<vmem>>, vector<1x96x128xf32>
    %357 = vector.shape_cast %356 : vector<1x96x128xf32> to vector<96x128xf32>
    %cst_502 = arith.constant dense<0.000000e+00> : vector<64x128xf32>
    %358 = tpu.matmul %355, %357, %cst_502 {dimension_numbers = #tpu.dot_dimension_numbers<[1], [0], [0], [1], [0, 0, 1, 1], [], []>} : vector<64x96xf32>, vector<96x128xf32>, vector<64x128xf32> -> vector<64x128xf32>
    %359 = arith.addf %353, %358 : vector<64x128xf32>
    %c0_503 = arith.constant 0 : index
    %c1_504 = arith.constant 1 : index
    %c2_505 = arith.constant 2 : index
    %c0_506 = arith.constant 0 : index
    %360 = vector.load %arg19[%c0_503, %c1_504, %c2_505, %c0_506] : memref<1x10x10x96xf32, #tpu.memory_space<vmem>>, vector<1x8x8x96xf32>
    %361 = vector.shape_cast %360 : vector<1x8x8x96xf32> to vector<64x96xf32>
    %c5_507 = arith.constant 5 : index
    %c0_508 = arith.constant 0 : index
    %c0_509 = arith.constant 0 : index
    %362 = vector.load %arg11[%c5_507, %c0_508, %c0_509] : memref<9x96x128xf32, #tpu.memory_space<vmem>>, vector<1x96x128xf32>
    %363 = vector.shape_cast %362 : vector<1x96x128xf32> to vector<96x128xf32>
    %cst_510 = arith.constant dense<0.000000e+00> : vector<64x128xf32>
    %364 = tpu.matmul %361, %363, %cst_510 {dimension_numbers = #tpu.dot_dimension_numbers<[1], [0], [0], [1], [0, 0, 1, 1], [], []>} : vector<64x96xf32>, vector<96x128xf32>, vector<64x128xf32> -> vector<64x128xf32>
    %365 = arith.addf %359, %364 : vector<64x128xf32>
    %c0_511 = arith.constant 0 : index
    %c2_512 = arith.constant 2 : index
    %c0_513 = arith.constant 0 : index
    %c0_514 = arith.constant 0 : index
    %366 = vector.load %arg19[%c0_511, %c2_512, %c0_513, %c0_514] : memref<1x10x10x96xf32, #tpu.memory_space<vmem>>, vector<1x8x8x96xf32>
    %367 = vector.shape_cast %366 : vector<1x8x8x96xf32> to vector<64x96xf32>
    %c6_515 = arith.constant 6 : index
    %c0_516 = arith.constant 0 : index
    %c0_517 = arith.constant 0 : index
    %368 = vector.load %arg11[%c6_515, %c0_516, %c0_517] : memref<9x96x128xf32, #tpu.memory_space<vmem>>, vector<1x96x128xf32>
    %369 = vector.shape_cast %368 : vector<1x96x128xf32> to vector<96x128xf32>
    %cst_518 = arith.constant dense<0.000000e+00> : vector<64x128xf32>
    %370 = tpu.matmul %367, %369, %cst_518 {dimension_numbers = #tpu.dot_dimension_numbers<[1], [0], [0], [1], [0, 0, 1, 1], [], []>} : vector<64x96xf32>, vector<96x128xf32>, vector<64x128xf32> -> vector<64x128xf32>
    %371 = arith.addf %365, %370 : vector<64x128xf32>
    %c0_519 = arith.constant 0 : index
    %c2_520 = arith.constant 2 : index
    %c1_521 = arith.constant 1 : index
    %c0_522 = arith.constant 0 : index
    %372 = vector.load %arg19[%c0_519, %c2_520, %c1_521, %c0_522] : memref<1x10x10x96xf32, #tpu.memory_space<vmem>>, vector<1x8x8x96xf32>
    %373 = vector.shape_cast %372 : vector<1x8x8x96xf32> to vector<64x96xf32>
    %c7_523 = arith.constant 7 : index
    %c0_524 = arith.constant 0 : index
    %c0_525 = arith.constant 0 : index
    %374 = vector.load %arg11[%c7_523, %c0_524, %c0_525] : memref<9x96x128xf32, #tpu.memory_space<vmem>>, vector<1x96x128xf32>
    %375 = vector.shape_cast %374 : vector<1x96x128xf32> to vector<96x128xf32>
    %cst_526 = arith.constant dense<0.000000e+00> : vector<64x128xf32>
    %376 = tpu.matmul %373, %375, %cst_526 {dimension_numbers = #tpu.dot_dimension_numbers<[1], [0], [0], [1], [0, 0, 1, 1], [], []>} : vector<64x96xf32>, vector<96x128xf32>, vector<64x128xf32> -> vector<64x128xf32>
    %377 = arith.addf %371, %376 : vector<64x128xf32>
    %c0_527 = arith.constant 0 : index
    %c2_528 = arith.constant 2 : index
    %c2_529 = arith.constant 2 : index
    %c0_530 = arith.constant 0 : index
    %378 = vector.load %arg19[%c0_527, %c2_528, %c2_529, %c0_530] : memref<1x10x10x96xf32, #tpu.memory_space<vmem>>, vector<1x8x8x96xf32>
    %379 = vector.shape_cast %378 : vector<1x8x8x96xf32> to vector<64x96xf32>
    %c8_531 = arith.constant 8 : index
    %c0_532 = arith.constant 0 : index
    %c0_533 = arith.constant 0 : index
    %380 = vector.load %arg11[%c8_531, %c0_532, %c0_533] : memref<9x96x128xf32, #tpu.memory_space<vmem>>, vector<1x96x128xf32>
    %381 = vector.shape_cast %380 : vector<1x96x128xf32> to vector<96x128xf32>
    %cst_534 = arith.constant dense<0.000000e+00> : vector<64x128xf32>
    %382 = tpu.matmul %379, %381, %cst_534 {dimension_numbers = #tpu.dot_dimension_numbers<[1], [0], [0], [1], [0, 0, 1, 1], [], []>} : vector<64x96xf32>, vector<96x128xf32>, vector<64x128xf32> -> vector<64x128xf32>
    %383 = arith.addf %377, %382 : vector<64x128xf32>
    %384 = math.tanh %383 : vector<64x128xf32>
    %385 = vector.shape_cast %384 : vector<64x128xf32> to vector<1x64x128xf32>
    %c0_535 = arith.constant 0 : index
    %c0_536 = arith.constant 0 : index
    %c0_537 = arith.constant 0 : index
    %386 = vector.load %arg13[%c0_535, %c0_536, %c0_537] : memref<1x64x128xf32, #tpu.memory_space<vmem>>, vector<1x64x128xf32>
    tpu.vector_store %arg13[%c0_535, %c0_536, %c0_537], %385 {strides = array<i32>} : memref<1x64x128xf32, #tpu.memory_space<vmem>>, vector<1x64x128xf32>,
    return
  }
  func.func @transform_0(%arg0: i32) -> (i32, i32, i32, i32) {
    %c0_i32 = arith.constant 0 : i32
    %c0_i32_0 = arith.constant 0 : i32
    %c0_i32_1 = arith.constant 0 : i32
    %c0_i32_2 = arith.constant 0 : i32
    return %arg0, %c0_i32, %c0_i32_0, %c0_i32_1 : i32, i32, i32, i32
  }
  func.func @transform_1(%arg0: i32) -> (i32, i32, i32) {
    %c0_i32 = arith.constant 0 : i32
    %c0_i32_0 = arith.constant 0 : i32
    %c0_i32_1 = arith.constant 0 : i32
    %c0_i32_2 = arith.constant 0 : i32
    return %c0_i32, %c0_i32_0, %c0_i32_1 : i32, i32, i32
  }
  func.func @transform_2(%arg0: i32) -> (i32, i32) {
    %c0_i32 = arith.constant 0 : i32
    %c0_i32_0 = arith.constant 0 : i32
    %c0_i32_1 = arith.constant 0 : i32
    return %c0_i32, %c0_i32_0 : i32, i32
  }
  func.func @transform_3(%arg0: i32) -> (i32, i32, i32) {
    %c0_i32 = arith.constant 0 : i32
    %c0_i32_0 = arith.constant 0 : i32
    %c0_i32_1 = arith.constant 0 : i32
    %c0_i32_2 = arith.constant 0 : i32
    return %c0_i32, %c0_i32_0, %c0_i32_1 : i32, i32, i32
  }
  func.func @transform_4(%arg0: i32) -> (i32, i32) {
    %c0_i32 = arith.constant 0 : i32
    %c0_i32_0 = arith.constant 0 : i32
    %c0_i32_1 = arith.constant 0 : i32
    return %c0_i32, %c0_i32_0 : i32, i32
  }
  func.func @transform_5(%arg0: i32) -> (i32, i32, i32) {
    %c0_i32 = arith.constant 0 : i32
    %c0_i32_0 = arith.constant 0 : i32
    %c0_i32_1 = arith.constant 0 : i32
    %c0_i32_2 = arith.constant 0 : i32
    return %c0_i32, %c0_i32_0, %c0_i32_1 : i32, i32, i32
  }
  func.func @transform_6(%arg0: i32) -> (i32, i32) {
    %c0_i32 = arith.constant 0 : i32
    %c0_i32_0 = arith.constant 0 : i32
    %c0_i32_1 = arith.constant 0 : i32
    return %c0_i32, %c0_i32_0 : i32, i32
  }
  func.func @transform_7(%arg0: i32) -> (i32, i32, i32) {
    %c0_i32 = arith.constant 0 : i32
    %c0_i32_0 = arith.constant 0 : i32
    %c0_i32_1 = arith.constant 0 : i32
    %c0_i32_2 = arith.constant 0 : i32
    return %c0_i32, %c0_i32_0, %c0_i32_1 : i32, i32, i32
  }
  func.func @transform_8(%arg0: i32) -> (i32, i32, i32) {
    %c0_i32 = arith.constant 0 : i32
    %c0_i32_0 = arith.constant 0 : i32
    %c0_i32_1 = arith.constant 0 : i32
    %c0_i32_2 = arith.constant 0 : i32
    return %c0_i32, %c0_i32_0, %c0_i32_1 : i32, i32, i32
  }
  func.func @transform_9(%arg0: i32) -> (i32, i32) {
    %c0_i32 = arith.constant 0 : i32
    %c0_i32_0 = arith.constant 0 : i32
    %c0_i32_1 = arith.constant 0 : i32
    return %c0_i32, %c0_i32_0 : i32, i32
  }
  func.func @transform_10(%arg0: i32) -> (i32, i32, i32) {
    %c0_i32 = arith.constant 0 : i32
    %c0_i32_0 = arith.constant 0 : i32
    %c0_i32_1 = arith.constant 0 : i32
    %c0_i32_2 = arith.constant 0 : i32
    return %c0_i32, %c0_i32_0, %c0_i32_1 : i32, i32, i32
  }
  func.func @transform_11(%arg0: i32) -> (i32, i32) {
    %c0_i32 = arith.constant 0 : i32
    %c0_i32_0 = arith.constant 0 : i32
    %c0_i32_1 = arith.constant 0 : i32
    return %c0_i32, %c0_i32_0 : i32, i32
  }
  func.func @transform_12(%arg0: i32) -> (i32, i32, i32) {
    %c0_i32 = arith.constant 0 : i32
    %c0_i32_0 = arith.constant 0 : i32
    %c0_i32_1 = arith.constant 0 : i32
    return %arg0, %c0_i32, %c0_i32_0 : i32, i32, i32
  }
}

</mosaic_0001>

<bundles_post_ra>
// kernel: tile.38
= control target key start
LH: loop header
LB: loop body
LE: loop exit
PB: predicated region body
PF: predicated region fallthrough
CT: control target
= control target key end

     0   :  { %s22_s0 = inlined_call_operand.vmem [shape: f32[3], index: 0, kind: input, shape index: {}]   ;;  %s23_s1 = inlined_call_operand.vmem [shape: f32[4,3], index: 1, kind: output, shape index: {}]  }
   0x1   :  { %v4_v0 = vld [vmem:[%s22_s0] ss:$0 sm:$0xff] }
   0x2   :  { %5 = vst [vmem:[%s23_s1] sm:$0xf] %v4_v0 }

// kernel: tile.39
= control target key start
LH: loop header
LB: loop body
LE: loop exit
PB: predicated region body
PF: predicated region fallthrough
CT: control target
= control target key end

     0   :  { %s37_s8 = smov 3   ;;  %s38_s9 = smov 6   ;;  %vm7_vm0 = vcmask 23552   ;;  %vm13_vm1 = vcmask 97352   ;;  %vm19_vm2 = vcmask 72752   ;;  %vm25_vm3 = vcmask 48152   ;;  %s55_s0 = inlined_call_operand.vmem [shape: f32[4,3], index: 0, kind: input, shape index: {}]   ;;  %s56_s1 = inlined_call_operand.vmem [shape: f32[1,12], index: 1, kind: output, shape index: {}]  }
   0x1   :  { %v4_v0 = vld [vmem:[%s55_s0] sm:$0xf]  ;;  %s36_s0 = smov 9  }
   0x2   :  { %5 = vst [vmem:[#allocation1] sm:$0xf] %v4_v0 }
   0x9   :  { %v10_v1 = vld [vmem:[#allocation1 + $0x3] sm:$0x1]   ;;  %v22_v2 = vld [vmem:[#allocation1 + $0x1] sm:$0x1]   ;;  %v16_v3 = vld [vmem:[#allocation1 + $0x2] sm:$0x1]  }
   0xa   :  { %11 = vrot.lane.b32.xlu0 %v10_v1, %s36_s0  ;;  %23 = vrot.lane.b32.xlu1 %v22_v2, %s37_s8  ;;  %v6_v4 = vld [vmem:[#allocation1] sm:$0x1]  }
   0xb   :  { %8 = vst.msk [vmem:[#allocation0] sm:$0x1] %vm7_vm0, %v6_v4  }
  0x12   :  { %17 = vrot.lane.b32.xlu0 %v16_v3, %s38_s9 }
  0x7c   :  { %v12_v5 = vpop.permute.xlu0 %11   ;;  %v24_v6 = vpop.permute.xlu1 %23  }
  0x7d   :  { %14 = vst.msk [vmem:[#allocation0] sm:$0x1] %vm13_vm1, %v12_v5  }
  0x84   :  { %v18_v7 = vpop.permute.xlu0 %17  }
  0x85   :  { %20 = vst.msk [vmem:[#allocation0] sm:$0x1] %vm19_vm2, %v18_v7  }
  0x86   :  { %26 = vst.msk [vmem:[#allocation0] sm:$0x1] %vm25_vm3, %v24_v6  }
  0x8d   :  { %v29_v8 = vld [vmem:[#allocation0] sm:$0x1] }
  0x8e   :  { %32 = vst [vmem:[%s56_s1] sm:$0x1] %v29_v8 }

// kernel: tile.23
= control target key start
LH: loop header
LB: loop body
LE: loop exit
PB: predicated region body
PF: predicated region fallthrough
CT: control target
= control target key end

     0   :  { %s22_s0 = inlined_call_operand.vmem [shape: f32[24], index: 0, kind: input, shape index: {}]   ;;  %s23_s1 = inlined_call_operand.vmem [shape: f32[4,24], index: 1, kind: output, shape index: {}]  }
   0x1   :  { %v4_v0 = vld [vmem:[%s22_s0] ss:$0 sm:$0xff] }
   0x2   :  { %5 = vst [vmem:[%s23_s1] sm:$0xf] %v4_v0 }

// kernel: tile.24
= control target key start
LH: loop header
LB: loop body
LE: loop exit
PB: predicated region body
PF: predicated region fallthrough
CT: control target
= control target key end

     0   :  { %s37_s8 = smov 24   ;;  %s38_s9 = smov 48   ;;  %vm7_vm0 = vcmask 195584   ;;  %vm13_vm1 = vcmask 785984   ;;  %vm19_vm2 = vcmask 589184   ;;  %vm25_vm3 = vcmask 392384   ;;  %s55_s0 = inlined_call_operand.vmem [shape: f32[4,24], index: 0, kind: input, shape index: {}]   ;;  %s56_s1 = inlined_call_operand.vmem [shape: f32[1,96], index: 1, kind: output, shape index: {}]  }
   0x1   :  { %v4_v0 = vld [vmem:[%s55_s0] sm:$0xf]  ;;  %s36_s0 = smov 72  }
   0x2   :  { %5 = vst [vmem:[#allocation1] sm:$0xf] %v4_v0 }
   0x9   :  { %v10_v1 = vld [vmem:[#allocation1 + $0x3] sm:$0x1]   ;;  %v22_v2 = vld [vmem:[#allocation1 + $0x1] sm:$0x1]   ;;  %v16_v3 = vld [vmem:[#allocation1 + $0x2] sm:$0x1]  }
   0xa   :  { %11 = vrot.lane.b32.xlu0 %v10_v1, %s36_s0  ;;  %23 = vrot.lane.b32.xlu1 %v22_v2, %s37_s8  ;;  %v6_v4 = vld [vmem:[#allocation1] sm:$0x1]  }
   0xb   :  { %8 = vst.msk [vmem:[#allocation0] sm:$0x1] %vm7_vm0, %v6_v4  }
  0x12   :  { %17 = vrot.lane.b32.xlu0 %v16_v3, %s38_s9 }
  0x7c   :  { %v12_v5 = vpop.permute.xlu0 %11   ;;  %v24_v6 = vpop.permute.xlu1 %23  }
  0x7d   :  { %14 = vst.msk [vmem:[#allocation0] sm:$0x1] %vm13_vm1, %v12_v5  }
  0x84   :  { %v18_v7 = vpop.permute.xlu0 %17  }
  0x85   :  { %20 = vst.msk [vmem:[#allocation0] sm:$0x1] %vm19_vm2, %v18_v7  }
  0x86   :  { %26 = vst.msk [vmem:[#allocation0] sm:$0x1] %vm25_vm3, %v24_v6  }
  0x8d   :  { %v29_v8 = vld [vmem:[#allocation0] sm:$0x1] }
  0x8e   :  { %32 = vst [vmem:[%s56_s1] sm:$0x1] %v29_v8 }

// kernel: baby_unet_forward.1
= control target key start
LH: loop header
LB: loop body
LE: loop exit
PB: predicated region body
PF: predicated region fallthrough
CT: control target
= control target key end

     0   :  { %s6224_s21 = smov 0   ;;  %s9260_s0 = inlined_call_operand.vmem [shape: f32[2,8,8,12], index: 0, kind: input, shape index: {}]   ;;  %s9261_s1 = inlined_call_operand.vmem [shape: f32[9,12,96], index: 1, kind: input, shape index: {}]   ;;  %s9262_s2 = inlined_call_operand.vmem [shape: f32[1,96], index: 2, kind: input, shape index: {}]   ;;  %s9263_s3 = inlined_call_operand.vmem [shape: f32[9,24,48], index: 3, kind: input, shape index: {}]   ;;  %s9264_s4 = inlined_call_operand.vmem [shape: f32[1,48], index: 4, kind: input, shape index: {}]   ;;  %s9265_s5 = inlined_call_operand.vmem [shape: f32[4,48,96], index: 5, kind: input, shape index: {}]   ;;  %s9266_s6 = inlined_call_operand.vmem [shape: f32[1,96], index: 6, kind: input, shape index: {}]   ;;  %s9267_s7 = inlined_call_operand.vmem [shape: f32[9,96,96], index: 7, kind: input, shape index: {}]   ;;  %s9268_s8 = inlined_call_operand.vmem [shape: f32[9,96,96], index: 8, kind: input, shape index: {}]   ;;  %s9269_s9 = inlined_call_operand.vmem [shape: f32[1,96], index: 9, kind: input, shape index: {}]   ;;  %s9270_s10 = inlined_call_operand.vmem [shape: f32[9,96,128], index: 10, kind: input, shape index: {}]   ;;  %s9271_s11 = inlined_call_operand.vmem [shape: f32[1,128], index: 11, kind: input, shape index: {}]   ;;  %s9272_s12 = inlined_call_operand.vmem [shape: f32[2,64,128], index: 12, kind: output, shape index: {}]  }
   0x1 LB: > { %s5344_s22 = sadd.s32 4294967295, %s6154_s21   ;;  %p5348_p0 = scmp.ge.s32.totalorder %s6154_s21, 1  ;;  %s6154_s21 = sphi %s6224_s21, %s22_s21  }
   0x2   : > { %p362_p1 = scmp.lt.s32.totalorder %s6154_s21, 3 }
   0x4   : > { %p363_p2 = pnand %p5348_p0, %p362_p1 }
   0x6   : > { %366 = sbr.rel (%p363_p2) target bundleno = 1716 (0x6b4), region = 68 }
   0xb   : > { %v606_v0 = vld [vmem:[%s9261_s1 + $0x8] sm:$0xf]  ;;  %vm631_vm0 = vcmask 1043456   ;;  %v605_v1 = vld [vmem:[%s9261_s1] sm:$0xff]  ;;  %v5363_v2 = vld [vmem:[%s9261_s1 + $0x18] sm:$0xf] }
   0xc   : > { %5353 = vmatpush.msk.msra.mxu0 %vm631_vm0, %v606_v0  ;;  %5364 = vmatpush.msk.msra.mxu1 %vm631_vm0, %v5363_v2  ;;  %vm414_vm1 = vcmask 97280   ;;  %vm421_vm2 = vcmask 90112   ;;  %v5396_v3 = vld [vmem:[%s9261_s1 + $0x48] sm:$0xf]  ;;  %v5362_v4 = vld [vmem:[%s9261_s1 + $0x10] sm:$0xff]  ;;  %v6156_v5 = vmov 0.0  }
   0xd   : > { %415 = vst.msk [vmem:[#allocation2] sm:$0xff] %vm414_vm1, %v6156_v5  ;;  %6106 = vmatpush.msk.msra.mxu2 %vm631_vm0, %v5363_v2  ;;  %6104 = vmatpush.msk.msra.mxu3 %vm631_vm0, %v606_v0  ;;  %p404_p3 = scmp.lt.s32.totalorder %s5344_s22, 1  ;;  %v5374_v7 = vld [vmem:[%s9261_s1 + $0x28] sm:$0xf]  ;;  %v5373_v8 = vld [vmem:[%s9261_s1 + $0x20] sm:$0xff]  ;;  %vm416_vm3 = vcmask 91136  }
   0xe   : > { %650 = vmatpush.msra.mxu0 %v605_v1  ;;  %422 = vst.msk [vmem:[#allocation2] sm:$0x1] %vm421_vm2, %v6156_v5  ;;  %737 = vmatpush.msra.mxu1 %v5362_v4  ;;  %v5395_v9 = vld [vmem:[%s9261_s1 + $0x40] sm:$0xff]  ;;  %v5385_v19 = vld [vmem:[%s9261_s1 + $0x38] sm:$0xf]  ;;  %v5384_v23 = vld [vmem:[%s9261_s1 + $0x30] sm:$0xff] }
   0xf   : > { %419 = vst.msk [vmem:[#allocation2 + $0x90] sm:$0xff] %vm414_vm1, %v6156_v5  ;;  %6108 = vmatpush.msra.mxu2 %v5362_v4  ;;  %6105 = vmatpush.msra.mxu3 %v605_v1  ;;  %s9296_s22 = smov (!%p404_p3, %s5344_s22), 1  ;;  %v5418_v27 = vld [vmem:[%s9261_s1 + $0x68] sm:$0xf]  ;;  %v5429_v29 = vld [vmem:[%s9261_s1 + $0x78] sm:$0xf] }
  0x10   : > { %5397 = vmatpush.msk.msrb.mxu0 %vm631_vm0, %v5396_v3  ;;  %423 = vst.msk [vmem:[#allocation2 + $0x10] sm:$0x1] %vm421_vm2, %v6156_v5  ;;  %s6102_s19 = sshll.u32 %s9296_s22, 6  ;;  %v5407_v33 = vld [vmem:[%s9261_s1 + $0x58] sm:$0xf]  ;;  %v5406_v35 = vld [vmem:[%s9261_s1 + $0x50] sm:$0xff] }
  0x11   : > { %424 = vst.msk [vmem:[#allocation2 + $0x20] sm:$0x1] %vm421_vm2, %v6156_v5  ;;  %6107 = vmatpush.msk.msrb.mxu3 %vm631_vm0, %v5363_v2  ;;  %5375 = vmatpush.msk.msrb.mxu2 %vm631_vm0, %v5374_v7  ;;  %s6311_s24 = scalar_lea.vmem %s9260_s0, %s6102_s19  ;;  %v5440_v34 = vld [vmem:[%s9261_s1 + $0x88] sm:$0xf]  ;;  %v5417_v44 = vld [vmem:[%s9261_s1 + $0x60] sm:$0xff]  ;;  %v5428_v45 = vld [vmem:[%s9261_s1 + $0x70] sm:$0xff]  ;;  %s9221_s14 = scalar_lea.vmem %s9272_s12, %s6102_s19 }
  0x12   : > { %425 = vst.msk [vmem:[#allocation2 + $0x30] sm:$0x1] %vm421_vm2, %v6156_v5  ;;  %v580_v10 = vld [vmem:[%s6311_s24 + $0x20] sm:$0xff]  ;;  %998 = vmatpush.msrb.mxu0 %v5395_v9  ;;  %v582_v11 = vld [vmem:[%s6311_s24 + $0x30] sm:$0xff]  ;;  %v581_v13 = vld [vmem:[%s6311_s24 + $0x28] sm:$0xff]  ;;  %5408 = vmatpush.msk.msrb.mxu1 %vm631_vm0, %v5407_v33  ;;  %vm442_vm4 = vcmask 785408  }
  0x13   : > { %426 = vst.msk [vmem:[#allocation2 + $0x40] sm:$0x1] %vm421_vm2, %v6156_v5  ;;  %6109 = vmatpush.msrb.mxu3 %v5362_v4  ;;  %824 = vmatpush.msrb.mxu2 %v5373_v8  ;;  %v576_v12 = vld [vmem:[%s6311_s24] sm:$0xff]  ;;  %v577_v14 = vld [vmem:[%s6311_s24 + $0x8] sm:$0xff]  ;;  %v578_v15 = vld [vmem:[%s6311_s24 + $0x10] sm:$0xff]  ;;  %vm449_vm5 = vcmask 778240  }
  0x14   : > { %427 = vst.msk [vmem:[#allocation2 + $0x50] sm:$0x1] %vm421_vm2, %v6156_v5  ;;  %v579_v17 = vld [vmem:[%s6311_s24 + $0x18] sm:$0xff]  ;;  %1085 = vmatpush.msrb.mxu1 %v5406_v35  ;;  %v5439_v47 = vld [vmem:[%s9261_s1 + $0x80] sm:$0xff]  ;;  %s6157_s16 = smov 104   ;;  %s6158_s17 = smov 80  }
  0x15   : > { %v597_v6 = vld [vmem:[#allocation2] sm:$0xff]  ;;  %428 = vst.msk [vmem:[#allocation2 + $0x60] sm:$0x1] %vm421_vm2, %v6156_v5  ;;  %v583_v41 = vld [vmem:[%s6311_s24 + $0x38] sm:$0xff]  ;;  %vm470_vm14 = vcmask 195584   ;;  %vm477_vm15 = vcmask 188416  }
  0x16   : > { %5354 = vmatmul.msk.f32.vlgmr.msra.gmra.mxu0 %vm414_vm1, %v597_v6  ;;  %429 = vst.msk [vmem:[#allocation2 + $0x70] sm:$0x1] %vm421_vm2, %v6156_v5 }
  0x17   : > { %430 = vst.msk [vmem:[#allocation2 + $0x80] sm:$0x1] %vm421_vm2, %v6156_v5  ;;  %5441 = vmatpush.msk.msra.mxu0 %vm631_vm0, %v5440_v34 }
  0x18   : > { %433 = vst.msk [vmem:[#allocation2 + $0x19] sm:$0x1] %vm421_vm2, %v6156_v5 }
  0x19   : > { %434 = vst.msk [vmem:[#allocation2 + $0x29] sm:$0x1] %vm421_vm2, %v6156_v5  ;;  %1347 = vmatpush.msra.mxu0 %v5439_v47 }
  0x1a   : > { %435 = vst.msk [vmem:[#allocation2 + $0x39] sm:$0x1] %vm421_vm2, %v6156_v5 }
  0x1b   : > { %436 = vst.msk [vmem:[#allocation2 + $0x49] sm:$0x1] %vm421_vm2, %v6156_v5 }
  0x1c   : > { %437 = vst.msk [vmem:[#allocation2 + $0x59] sm:$0x1] %vm421_vm2, %v6156_v5 }
  0x1d   : > { %438 = vst.msk [vmem:[#allocation2 + $0x69] sm:$0x1] %vm421_vm2, %v6156_v5 }
  0x1e   : > { %439 = vst.msk [vmem:[#allocation2 + $0x79] sm:$0x1] %vm421_vm2, %v6156_v5 }
  0x1f   : > { %440 = vst.msk [vmem:[#allocation2 + $0x89] sm:$0x1] %vm421_vm2, %v6156_v5 }
  0x20   : > { %431 = vst.msk [vmem:[#allocation2 + $0x90] sm:$0x1] %vm421_vm2, %v6156_v5 }
  0x21   : > { %417 = vst.msk [vmem:[#allocation2 + $0x8] sm:$0x3] %vm416_vm3, %v6156_v5 }
  0x22   : > { %420 = vst.msk [vmem:[#allocation2 + $0x98] sm:$0x3] %vm416_vm3, %v6156_v5 }
  0x23   : > { %432 = vst.msk [vmem:[#allocation2 + $0x9] sm:$0x1] %vm421_vm2, %v6156_v5 }
  0x24   : > { %441 = vst.msk [vmem:[#allocation2 + $0x99] sm:$0x1] %vm421_vm2, %v6156_v5  ;;  %vm505_vm2 = vcmask 385024  }
  0x25   : > { %589 = vst.msk [vmem:[#allocation2 + $0x51] sm:$0xff] %vm414_vm1, %v580_v10 }
  0x26   : > { %591 = vst.msk [vmem:[#allocation2 + $0x71] sm:$0xff] %vm414_vm1, %v582_v11 }
  0x27   : > { %585 = vst.msk [vmem:[#allocation2 + $0x11] sm:$0xff] %vm414_vm1, %v576_v12  ;;  %v1127_v58 = vld [vmem:[#allocation2 + $0x90] sm:$0xff] }
  0x28   : > { %v684_v16 = vld [vmem:[#allocation2 + $0x1] sm:$0xff]  ;;  %590 = vst.msk [vmem:[#allocation2 + $0x61] sm:$0xff] %vm414_vm1, %v581_v13 }
  0x29   : > { %5365 = vmatmul.msk.f32.vlgmr.msra.gmra.mxu1 %vm414_vm1, %v684_v16  ;;  %586 = vst.msk [vmem:[#allocation2 + $0x21] sm:$0xff] %vm414_vm1, %v577_v14  ;;  %v1214_v59 = vld [vmem:[#allocation2 + $0x91] sm:$0xff] }
  0x2a   : > { %587 = vst.msk [vmem:[#allocation2 + $0x31] sm:$0xff] %vm414_vm1, %v578_v15  ;;  %v771_v30 = vld [vmem:[#allocation2 + $0x2] sm:$0xff] }
  0x2b   : > { %588 = vst.msk [vmem:[#allocation2 + $0x41] sm:$0xff] %vm414_vm1, %v579_v17  ;;  %v1301_v11 = vld [vmem:[#allocation2 + $0x92] sm:$0xff] }
  0x2c   : > { %v6339_v18 = vld [vmem:[#allocation2 + $0x51] sm:$0xff]  ;;  %592 = vst.msk [vmem:[#allocation2 + $0x81] sm:$0xff] %vm414_vm1, %v583_v41 }
  0x2d   : > { %5370 = vmatmul.msk.f32.vlgmr.msra.gmra.mxu2 %vm414_vm1, %v6339_v18  ;;  %v6346_v20 = vld [vmem:[#allocation2 + $0x70] sm:$0xff]  ;;  %443 = vst.msk [vmem:[#allocation3] sm:$0xff] %vm442_vm4, %v6156_v5 }
  0x2e   : > { %5361 = vmatmul.msk.f32.vlgmr.msra.gmra.mxu3 %vm414_vm1, %v6346_v20  ;;  %v598_v21 = vld [vmem:[#allocation2 + $0x10] sm:$0xff]  ;;  %5419 = vmatpush.msk.msra.mxu2 %vm631_vm0, %v5418_v27  ;;  %447 = vst.msk [vmem:[#allocation3 + $0x90] sm:$0xff] %vm442_vm4, %v6156_v5 }
  0x2f   : > { %v685_v22 = vld [vmem:[#allocation2 + $0x11] sm:$0xff]  ;;  %5355 = vmatmul.msk.f32.gmra.mxu0 %vm414_vm1, %v598_v21  ;;  %5386 = vmatpush.msk.msra.mxu3 %vm631_vm0, %v5385_v19  ;;  %v6356_v24 = vld [vmem:[#allocation2 + $0x61] sm:$0xff]  ;;  %526 = vst.msk [vmem:[#allocation6] sm:$0xff] %vm442_vm4, %v6156_v5 }
  0x30   : > { %v6358_v25 = vld [vmem:[#allocation2 + $0x71] sm:$0xff]  ;;  %v6360_v26 = vld [vmem:[#allocation2 + $0x20] sm:$0xff]  ;;  %1173 = vmatpush.msra.mxu2 %v5417_v44  ;;  %529 = vst.msk [vmem:[#allocation6 + $0x90] sm:$0xff] %vm442_vm4, %v6156_v5 }
  0x31   : > { %5366 = vmatmul.msk.f32.gmra.mxu1 %vm414_vm1, %v685_v22  ;;  %911 = vmatpush.msra.mxu3 %v5384_v23  ;;  %v6369_v28 = vld [vmem:[#allocation2 + $0x21] sm:$0xff]  ;;  %v6380_v31 = vld [vmem:[#allocation2 + $0x30] sm:$0xff]  ;;  %551 = vst.msk [vmem:[#allocation7] sm:$0xff] %vm442_vm4, %v6156_v5 }
  0x32   : > { %v687_v32 = vld [vmem:[#allocation2 + $0x31] sm:$0xff]  ;;  %v601_v37 = vld [vmem:[#allocation2 + $0x40] sm:$0xff]  ;;  %554 = vst.msk [vmem:[#allocation7 + $0x90] sm:$0xff] %vm442_vm4, %v6156_v5 }
  0x33   : > { %v772_v36 = vld [vmem:[#allocation2 + $0x12] sm:$0xff]  ;;  %v688_v38 = vld [vmem:[#allocation2 + $0x41] sm:$0xff]  ;;  %531 = vst.msk [vmem:[#allocation6] sm:$0x1] %vm449_vm5, %v6156_v5 }
  0x34   : > { %v773_v39 = vld [vmem:[#allocation2 + $0x22] sm:$0xff]  ;;  %v602_v40 = vld [vmem:[#allocation2 + $0x50] sm:$0xff]  ;;  %450 = vst.msk [vmem:[#allocation3] sm:$0x1] %vm449_vm5, %v6156_v5 }
  0x35   : > { %5371 = vmatmul.msk.f32.gmra.mxu2 %vm414_vm1, %v6356_v24  ;;  %v774_v42 = vld [vmem:[#allocation2 + $0x32] sm:$0xff]  ;;  %v603_v43 = vld [vmem:[#allocation2 + $0x60] sm:$0xff]  ;;  %451 = vst.msk [vmem:[#allocation3 + $0x10] sm:$0x1] %vm449_vm5, %v6156_v5 }
  0x36   : > { %5372 = vmatmul.msk.f32.vlgmr.msrb.gmra.mxu3 %vm414_vm1, %v6358_v25  ;;  %v775_v46 = vld [vmem:[#allocation2 + $0x42] sm:$0xff]  ;;  %v776_v48 = vld [vmem:[#allocation2 + $0x52] sm:$0xff]  ;;  %452 = vst.msk [vmem:[#allocation3 + $0x20] sm:$0x1] %vm449_vm5, %v6156_v5 }
  0x37   : > { %5356 = vmatmul.msk.f32.gmra.mxu0 %vm414_vm1, %v6360_v26  ;;  %5430 = vmatpush.msk.msrb.mxu3 %vm631_vm0, %v5429_v29  ;;  %v777_v49 = vld [vmem:[#allocation2 + $0x62] sm:$0xff]  ;;  %v778_v50 = vld [vmem:[#allocation2 + $0x72] sm:$0xff]  ;;  %453 = vst.msk [vmem:[#allocation3 + $0x30] sm:$0x1] %vm449_vm5, %v6156_v5  ;;  %vm472_vm0 = vcmask 189440  }
  0x38   : > { %v865_v51 = vld [vmem:[#allocation2 + $0x80] sm:$0xff]  ;;  %454 = vst.msk [vmem:[#allocation3 + $0x40] sm:$0x1] %vm449_vm5, %v6156_v5 }
  0x39   : > { %5367 = vmatmul.msk.f32.gmra.mxu1 %vm414_vm1, %v6369_v28  ;;  %1260 = vmatpush.msrb.mxu3 %v5428_v45  ;;  %v1039_v52 = vld [vmem:[#allocation2 + $0x82] sm:$0xff]  ;;  %455 = vst.msk [vmem:[#allocation3 + $0x50] sm:$0x1] %vm449_vm5, %v6156_v5 }
  0x3a   : > { %v952_v53 = vld [vmem:[#allocation2 + $0x81] sm:$0xff]  ;;  %456 = vst.msk [vmem:[#allocation3 + $0x60] sm:$0x1] %vm449_vm5, %v6156_v5 }
  0x3b   : > { %457 = vst.msk [vmem:[#allocation3 + $0x70] sm:$0x1] %vm449_vm5, %v6156_v5 }
  0x3c   : > { %458 = vst.msk [vmem:[#allocation3 + $0x80] sm:$0x1] %vm449_vm5, %v6156_v5 }
  0x3d   : > { %5376 = vmatmul.msk.f32.vlgmr.msrb.gmra.mxu2 %vm414_vm1, %v771_v30  ;;  %459 = vst.msk [vmem:[#allocation3 + $0x90] sm:$0x1] %vm449_vm5, %v6156_v5 }
  0x3e   : > { %5387 = vmatmul.msk.f32.vlgmr.msra.gmra.mxu3 %vm414_vm1, %v598_v21  ;;  %461 = vst.msk [vmem:[#allocation3 + $0x19] sm:$0x1] %vm449_vm5, %v6156_v5 }
  0x3f   : > { %5357 = vmatmul.msk.f32.gmra.mxu0 %vm414_vm1, %v6380_v31  ;;  %462 = vst.msk [vmem:[#allocation3 + $0x29] sm:$0x1] %vm449_vm5, %v6156_v5 }
  0x40   : > { %463 = vst.msk [vmem:[#allocation3 + $0x39] sm:$0x1] %vm449_vm5, %v6156_v5 }
  0x41   : > { %5368 = vmatmul.msk.f32.gmra.mxu1 %vm414_vm1, %v687_v32  ;;  %464 = vst.msk [vmem:[#allocation3 + $0x49] sm:$0x1] %vm449_vm5, %v6156_v5 }
  0x42   : > { %465 = vst.msk [vmem:[#allocation3 + $0x59] sm:$0x1] %vm449_vm5, %v6156_v5 }
  0x43   : > { %466 = vst.msk [vmem:[#allocation3 + $0x69] sm:$0x1] %vm449_vm5, %v6156_v5 }
  0x44   : > { %467 = vst.msk [vmem:[#allocation3 + $0x79] sm:$0x1] %vm449_vm5, %v6156_v5 }
  0x45   : > { %5377 = vmatmul.msk.f32.gmra.mxu2 %vm414_vm1, %v772_v36  ;;  %468 = vst.msk [vmem:[#allocation3 + $0x89] sm:$0x1] %vm449_vm5, %v6156_v5 }
  0x46   : > { %5388 = vmatmul.msk.f32.gmra.mxu3 %vm414_vm1, %v6360_v26  ;;  %532 = vst.msk [vmem:[#allocation6 + $0x10] sm:$0x1] %vm449_vm5, %v6156_v5 }
  0x47   : > { %5358 = vmatmul.msk.f32.gmra.mxu0 %vm414_vm1, %v601_v37  ;;  %533 = vst.msk [vmem:[#allocation6 + $0x20] sm:$0x1] %vm449_vm5, %v6156_v5 }
  0x48   : > { %534 = vst.msk [vmem:[#allocation6 + $0x30] sm:$0x1] %vm449_vm5, %v6156_v5 }
  0x49   : > { %5369 = vmatmul.msk.f32.gmra.mxu1 %vm414_vm1, %v688_v38  ;;  %535 = vst.msk [vmem:[#allocation6 + $0x40] sm:$0x1] %vm449_vm5, %v6156_v5 }
  0x4a   : > { %536 = vst.msk [vmem:[#allocation6 + $0x50] sm:$0x1] %vm449_vm5, %v6156_v5 }
  0x4b   : > { %537 = vst.msk [vmem:[#allocation6 + $0x60] sm:$0x1] %vm449_vm5, %v6156_v5 }
  0x4c   : > { %538 = vst.msk [vmem:[#allocation6 + $0x70] sm:$0x1] %vm449_vm5, %v6156_v5 }
  0x4d   : > { %5378 = vmatmul.msk.f32.gmra.mxu2 %vm414_vm1, %v773_v39  ;;  %539 = vst.msk [vmem:[#allocation6 + $0x80] sm:$0x1] %vm449_vm5, %v6156_v5 }
  0x4e   : > { %5389 = vmatmul.msk.f32.gmra.mxu3 %vm414_vm1, %v6380_v31  ;;  %540 = vst.msk [vmem:[#allocation6 + $0x90] sm:$0x1] %vm449_vm5, %v6156_v5 }
  0x4f   : > { %5359 = vmatmul.msk.f32.gmra.mxu0 %vm414_vm1, %v602_v40  ;;  %542 = vst.msk [vmem:[#allocation6 + $0x19] sm:$0x1] %vm449_vm5, %v6156_v5 }
  0x50   : > { %543 = vst.msk [vmem:[#allocation6 + $0x29] sm:$0x1] %vm449_vm5, %v6156_v5 }
  0x51   : > { %5409 = vmatmul.msk.f32.vlgmr.msrb.gmra.mxu1 %vm414_vm1, %v772_v36  ;;  %544 = vst.msk [vmem:[#allocation6 + $0x39] sm:$0x1] %vm449_vm5, %v6156_v5 }
  0x52   : > { %545 = vst.msk [vmem:[#allocation6 + $0x49] sm:$0x1] %vm449_vm5, %v6156_v5 }
  0x53   : > { %546 = vst.msk [vmem:[#allocation6 + $0x59] sm:$0x1] %vm449_vm5, %v6156_v5 }
  0x54   : > { %547 = vst.msk [vmem:[#allocation6 + $0x69] sm:$0x1] %vm449_vm5, %v6156_v5 }
  0x55   : > { %5379 = vmatmul.msk.f32.gmra.mxu2 %vm414_vm1, %v774_v42  ;;  %548 = vst.msk [vmem:[#allocation6 + $0x79] sm:$0x1] %vm449_vm5, %v6156_v5 }
  0x56   : > { %5390 = vmatmul.msk.f32.gmra.mxu3 %vm414_vm1, %v601_v37  ;;  %549 = vst.msk [vmem:[#allocation6 + $0x89] sm:$0x1] %vm449_vm5, %v6156_v5 }
  0x57   : > { %5360 = vmatmul.msk.f32.gmra.mxu0 %vm414_vm1, %v603_v43  ;;  %556 = vst.msk [vmem:[#allocation7] sm:$0x1] %vm449_vm5, %v6156_v5 }
  0x58   : > { %557 = vst.msk [vmem:[#allocation7 + $0x10] sm:$0x1] %vm449_vm5, %v6156_v5 }
  0x59   : > { %5410 = vmatmul.msk.f32.gmra.mxu1 %vm414_vm1, %v773_v39  ;;  %558 = vst.msk [vmem:[#allocation7 + $0x20] sm:$0x1] %vm449_vm5, %v6156_v5 }
  0x5a   : > { %559 = vst.msk [vmem:[#allocation7 + $0x30] sm:$0x1] %vm449_vm5, %v6156_v5 }
  0x5b   : > { %560 = vst.msk [vmem:[#allocation7 + $0x40] sm:$0x1] %vm449_vm5, %v6156_v5 }
  0x5c   : > { %561 = vst.msk [vmem:[#allocation7 + $0x50] sm:$0x1] %vm449_vm5, %v6156_v5 }
  0x5d   : > { %5380 = vmatmul.msk.f32.gmra.mxu2 %vm414_vm1, %v775_v46  ;;  %562 = vst.msk [vmem:[#allocation7 + $0x60] sm:$0x1] %vm449_vm5, %v6156_v5 }
  0x5e   : > { %5391 = vmatmul.msk.f32.gmra.mxu3 %vm414_vm1, %v602_v40  ;;  %563 = vst.msk [vmem:[#allocation7 + $0x70] sm:$0x1] %vm449_vm5, %v6156_v5 }
  0x5f   : > { %5398 = vmatmul.msk.f32.vlgmr.msrb.gmra.mxu0 %vm414_vm1, %v685_v22  ;;  %564 = vst.msk [vmem:[#allocation7 + $0x80] sm:$0x1] %vm449_vm5, %v6156_v5 }
  0x60   : > { %565 = vst.msk [vmem:[#allocation7 + $0x90] sm:$0x1] %vm449_vm5, %v6156_v5 }
  0x61   : > { %5411 = vmatmul.msk.f32.gmra.mxu1 %vm414_vm1, %v774_v42  ;;  %567 = vst.msk [vmem:[#allocation7 + $0x19] sm:$0x1] %vm449_vm5, %v6156_v5 }
  0x62   : > { %568 = vst.msk [vmem:[#allocation7 + $0x29] sm:$0x1] %vm449_vm5, %v6156_v5 }
  0x63   : > { %569 = vst.msk [vmem:[#allocation7 + $0x39] sm:$0x1] %vm449_vm5, %v6156_v5 }
  0x64   : > { %570 = vst.msk [vmem:[#allocation7 + $0x49] sm:$0x1] %vm449_vm5, %v6156_v5 }
  0x65   : > { %5381 = vmatmul.msk.f32.gmra.mxu2 %vm414_vm1, %v776_v48  ;;  %571 = vst.msk [vmem:[#allocation7 + $0x59] sm:$0x1] %vm449_vm5, %v6156_v5 }
  0x66   : > { %5392 = vmatmul.msk.f32.gmra.mxu3 %vm414_vm1, %v603_v43  ;;  %572 = vst.msk [vmem:[#allocation7 + $0x69] sm:$0x1] %vm449_vm5, %v6156_v5 }
  0x67   : > { %5399 = vmatmul.msk.f32.gmra.mxu0 %vm414_vm1, %v6369_v28  ;;  %573 = vst.msk [vmem:[#allocation7 + $0x79] sm:$0x1] %vm449_vm5, %v6156_v5 }
  0x68   : > { %574 = vst.msk [vmem:[#allocation7 + $0x89] sm:$0x1] %vm449_vm5, %v6156_v5 }
  0x69   : > { %5412 = vmatmul.msk.f32.gmra.mxu1 %vm414_vm1, %v775_v46  ;;  %471 = vst.msk [vmem:[#allocation4] sm:$0xff] %vm470_vm14, %v6156_v5 }
  0x6a   : > { %475 = vst.msk [vmem:[#allocation4 + $0x90] sm:$0xff] %vm470_vm14, %v6156_v5 }
  0x6b   : > { %478 = vst.msk [vmem:[#allocation4] sm:$0x1] %vm477_vm15, %v6156_v5 }
  0x6c   : > { %479 = vst.msk [vmem:[#allocation4 + $0x10] sm:$0x1] %vm477_vm15, %v6156_v5 }
  0x6d   : > { %5382 = vmatmul.msk.f32.gmra.mxu2 %vm414_vm1, %v777_v49  ;;  %480 = vst.msk [vmem:[#allocation4 + $0x20] sm:$0x1] %vm477_vm15, %v6156_v5 }
  0x6e   : > { %5393 = vmatmul.msk.f32.gmra.mxu3 %vm414_vm1, %v6346_v20  ;;  %481 = vst.msk [vmem:[#allocation4 + $0x30] sm:$0x1] %vm477_vm15, %v6156_v5 }
  0x6f   : > { %5400 = vmatmul.msk.f32.gmra.mxu0 %vm414_vm1, %v687_v32  ;;  %482 = vst.msk [vmem:[#allocation4 + $0x40] sm:$0x1] %vm477_vm15, %v6156_v5 }
  0x70   : > { %483 = vst.msk [vmem:[#allocation4 + $0x50] sm:$0x1] %vm477_vm15, %v6156_v5 }
  0x71   : > { %5413 = vmatmul.msk.f32.gmra.mxu1 %vm414_vm1, %v776_v48  ;;  %473 = vst.msk [vmem:[#allocation4 + $0x8] sm:$0x3] %vm472_vm0, %v6156_v5 }
  0x72   : > { %476 = vst.msk [vmem:[#allocation4 + $0x98] sm:$0x3] %vm472_vm0, %v6156_v5 }
  0x73   : > { %484 = vst.msk [vmem:[#allocation4 + $0x60] sm:$0x1] %vm477_vm15, %v6156_v5 }
  0x74   : > { %485 = vst.msk [vmem:[#allocation4 + $0x70] sm:$0x1] %vm477_vm15, %v6156_v5 }
  0x75   : > { %5383 = vmatmul.msk.f32.gmra.mxu2 %vm414_vm1, %v778_v50  ;;  %486 = vst.msk [vmem:[#allocation4 + $0x80] sm:$0x1] %vm477_vm15, %v6156_v5 }
  0x76   : > { %5394 = vmatmul.msk.f32.gmra.mxu3 %vm414_vm1, %v865_v51  ;;  %487 = vst.msk [vmem:[#allocation4 + $0x90] sm:$0x1] %vm477_vm15, %v6156_v5 }
  0x77   : > { %5401 = vmatmul.msk.f32.gmra.mxu0 %vm414_vm1, %v688_v38  ;;  %488 = vst.msk [vmem:[#allocation4 + $0x9] sm:$0x1] %vm477_vm15, %v6156_v5 }
  0x78   : > { %489 = vst.msk [vmem:[#allocation4 + $0x19] sm:$0x1] %vm477_vm15, %v6156_v5 }
  0x79   : > { %5414 = vmatmul.msk.f32.gmra.mxu1 %vm414_vm1, %v777_v49  ;;  %490 = vst.msk [vmem:[#allocation4 + $0x29] sm:$0x1] %vm477_vm15, %v6156_v5 }
  0x7a   : > { %491 = vst.msk [vmem:[#allocation4 + $0x39] sm:$0x1] %vm477_vm15, %v6156_v5 }
  0x7b   : > { %492 = vst.msk [vmem:[#allocation4 + $0x49] sm:$0x1] %vm477_vm15, %v6156_v5 }
  0x7c   : > { %493 = vst.msk [vmem:[#allocation4 + $0x59] sm:$0x1] %vm477_vm15, %v6156_v5 }
  0x7d   : > { %5420 = vmatmul.msk.f32.vlgmr.msra.gmra.mxu2 %vm414_vm1, %v6360_v26  ;;  %494 = vst.msk [vmem:[#allocation4 + $0x69] sm:$0x1] %vm477_vm15, %v6156_v5 }
  0x7e   : > { %5431 = vmatmul.msk.f32.vlgmr.msrb.gmra.mxu3 %vm414_vm1, %v6369_v28  ;;  %495 = vst.msk [vmem:[#allocation4 + $0x79] sm:$0x1] %vm477_vm15, %v6156_v5 }
  0x7f   : > { %5402 = vmatmul.msk.f32.gmra.mxu0 %vm414_vm1, %v6339_v18  ;;  %496 = vst.msk [vmem:[#allocation4 + $0x89] sm:$0x1] %vm477_vm15, %v6156_v5 }
  0x80   : > { %497 = vst.msk [vmem:[#allocation4 + $0x99] sm:$0x1] %vm477_vm15, %v6156_v5 }
  0x81   : > { %5415 = vmatmul.msk.f32.gmra.mxu1 %vm414_vm1, %v778_v50  ;;  %517 = vst.msk [vmem:[#allocation5 + $0x19] sm:$0x1] %vm505_vm2, %v6156_v5 }
  0x82   : > { %518 = vst.msk [vmem:[#allocation5 + $0x29] sm:$0x1] %vm505_vm2, %v6156_v5 }
  0x83   : > { %519 = vst.msk [vmem:[#allocation5 + $0x39] sm:$0x1] %vm505_vm2, %v6156_v5 }
  0x84   : > { %520 = vst.msk [vmem:[#allocation5 + $0x49] sm:$0x1] %vm505_vm2, %v6156_v5 }
  0x85   : > { %5421 = vmatmul.msk.f32.gmra.mxu2 %vm414_vm1, %v6380_v31  ;;  %v6540_v31 = vld [vmem:[%s9262_s2] ss:$0 sm:$0xff]  ;;  %521 = vst.msk [vmem:[#allocation5 + $0x59] sm:$0x1] %vm505_vm2, %v6156_v5 }
  0x86   : > { %5432 = vmatmul.msk.f32.gmra.mxu3 %vm414_vm1, %v687_v32  ;;  %522 = vst.msk [vmem:[#allocation5 + $0x69] sm:$0x1] %vm505_vm2, %v6156_v5 }
  0x87   : > { %5403 = vmatmul.msk.f32.gmra.mxu0 %vm414_vm1, %v6356_v24  ;;  %523 = vst.msk [vmem:[#allocation5 + $0x79] sm:$0x1] %vm505_vm2, %v6156_v5 }
  0x88   : > { %524 = vst.msk [vmem:[#allocation5 + $0x89] sm:$0x1] %vm505_vm2, %v6156_v5 }
  0x89   : > { %5416 = vmatmul.msk.f32.gmra.mxu1 %vm414_vm1, %v1039_v52 }
  0x8d   : > { %5422 = vmatmul.msk.f32.gmra.mxu2 %vm414_vm1, %v601_v37 }
  0x8e   : > { %5433 = vmatmul.msk.f32.gmra.mxu3 %vm414_vm1, %v688_v38 }
  0x8f   : > { %5404 = vmatmul.msk.f32.gmra.mxu0 %vm414_vm1, %v6358_v25 }
  0x93   : > { %v652_v54 = vpop.f32.mrf.mxu0 }
  0x94   : > { %v676_v34 = vadd.f32 %v6540_v31, %v652_v54 }
  0x95   : > { %5423 = vmatmul.msk.f32.gmra.mxu2 %vm414_vm1, %v602_v40 }
  0x96   : > { %5434 = vmatmul.msk.f32.gmra.mxu3 %vm414_vm1, %v6339_v18 }
  0x97   : > { %5405 = vmatmul.msk.f32.gmra.mxu0 %vm414_vm1, %v952_v53 }
  0x9d   : > { %5424 = vmatmul.msk.f32.gmra.mxu2 %vm414_vm1, %v603_v43 }
  0x9e   : > { %5435 = vmatmul.msk.f32.gmra.mxu3 %vm414_vm1, %v6356_v24 }
  0x9f   : > { %5442 = vmatmul.msk.f32.vlgmr.msra.gmra.mxu0 %vm414_vm1, %v773_v39 }
  0xa5   : > { %5425 = vmatmul.msk.f32.gmra.mxu2 %vm414_vm1, %v6346_v20 }
  0xa6   : > { %5436 = vmatmul.msk.f32.gmra.mxu3 %vm414_vm1, %v6358_v25  ;;  %v739_v9 = vpop.f32.mrf.mxu1 }
  0xa7   : > { %5443 = vmatmul.msk.f32.gmra.mxu0 %vm414_vm1, %v774_v42  ;;  %v763_v36 = vadd.f32 %v739_v9, %v676_v34 }
  0xac   : > { %v6471_v55 = vpop.f32.mrf.mxu0 }
  0xad   : > { %5426 = vmatmul.msk.f32.gmra.mxu2 %vm414_vm1, %v865_v51  ;;  %v677_v40 = vadd.f32 %v6540_v31, %v6471_v55 }
  0xae   : > { %5437 = vmatmul.msk.f32.gmra.mxu3 %vm414_vm1, %v952_v53  ;;  %v742_v15 = vpop.f32.mrf.mxu1 }
  0xaf   : > { %5444 = vmatmul.msk.f32.gmra.mxu0 %vm414_vm1, %v775_v46  ;;  %v764_v44 = vadd.f32 %v742_v15, %v677_v40 }
  0xb0   : > { %v6476_v56 = vpop.f32.mrf.mxu2 }
  0xb1   : > { %v6478_v57 = vpop.f32.mrf.mxu3 }
  0xb4   : > { %v6480_v60 = vpop.f32.mrf.mxu0 }
  0xb5   : > { %5427 = vmatmul.msk.f32.gmra.mxu2 %vm414_vm1, %v1127_v58 }
  0xb6   : > { %5438 = vmatmul.msk.f32.gmra.mxu3 %vm414_vm1, %v1214_v59  ;;  %v745_v19 = vpop.f32.mrf.mxu1 }
  0xb7   : > { %5445 = vmatmul.msk.f32.gmra.mxu0 %vm414_vm1, %v776_v48 }
  0xb8   : > { %v6485_v61 = vpop.f32.mrf.mxu2 }
  0xb9   : > { %v6487_v62 = vpop.f32.mrf.mxu3 }
  0xbc   : > { %v6489_v63 = vpop.f32.mrf.mxu0 }
  0xbe   : > { %v6521_v23 = vpop.f32.mrf.mxu1 }
  0xbf   : > { %5446 = vmatmul.msk.f32.gmra.mxu0 %vm414_vm1, %v777_v49  ;;  %v678_v49 = vadd.f32 %v6540_v31, %v6480_v60 }
  0xc0   : > { %v826_v0 = vpop.f32.mrf.mxu2 }
  0xc1   : > { %v913_v1 = vpop.f32.mrf.mxu3  ;;  %v850_v38 = vadd.f32 %v826_v0, %v763_v36  ;;  %v765_v54 = vadd.f32 %v745_v19, %v678_v49 }
  0xc3   : > { %v937_v42 = vadd.f32 %v913_v1, %v850_v38  ;;  %v679_v1 = vadd.f32 %v6540_v31, %v6489_v63 }
  0xc4   : > { %v6492_v2 = vpop.f32.mrf.mxu0 }
  0xc5   : > { %v766_v63 = vadd.f32 %v6521_v23, %v679_v1  ;;  %v680_v34 = vadd.f32 %v6540_v31, %v6492_v2 }
  0xc6   : > { %v6529_v27 = vpop.f32.mrf.mxu1 }
  0xc7   : > { %5447 = vmatmul.msk.f32.gmra.mxu0 %vm414_vm1, %v778_v50  ;;  %v767_v2 = vadd.f32 %v6529_v27, %v680_v34 }
  0xc8   : > { %v829_v3 = vpop.f32.mrf.mxu2 }
  0xc9   : > { %v6495_v4 = vpop.f32.mrf.mxu3  ;;  %v851_v46 = vadd.f32 %v829_v3, %v764_v44 }
  0xcb   : > { %v938_v51 = vadd.f32 %v6495_v4, %v851_v46 }
  0xcc   : > { %v6497_v6 = vpop.f32.mrf.mxu0 }
  0xce   : > { %v1087_v32 = vpop.f32.mrf.mxu1 }
  0xcf   : > { %5448 = vmatmul.msk.f32.gmra.mxu0 %vm414_vm1, %v1039_v52 }
  0xd0   : > { %v6500_v7 = vpop.f32.mrf.mxu2 }
  0xd1   : > { %v6502_v8 = vpop.f32.mrf.mxu3  ;;  %v852_v59 = vadd.f32 %v6500_v7, %v765_v54 }
  0xd3   : > { %v939_v7 = vadd.f32 %v6502_v8, %v852_v59 }
  0xd4   : > { %v6504_v10 = vpop.f32.mrf.mxu0 }
  0xd6   : > { %v1090_v41 = vpop.f32.mrf.mxu1 }
  0xd7   : > { %5449 = vmatmul.msk.f32.gmra.mxu0 %vm414_vm1, %v1301_v11  ;;  %vm498_vm1 = vcmask 392192  }
  0xd8   : > { %v6507_v12 = vpop.f32.mrf.mxu2  ;;  %503 = vst.msk [vmem:[#allocation5 + $0x90] sm:$0xff] %vm498_vm1, %v6156_v5 }
  0xd9   : > { %v6509_v13 = vpop.f32.mrf.mxu3  ;;  %v853_v8 = vadd.f32 %v6507_v12, %v766_v63 }
  0xdb   : > { %v940_v12 = vadd.f32 %v6509_v13, %v853_v8 }
  0xdc   : > { %v1000_v14 = vpop.f32.mrf.mxu0 }
  0xdd   : > { %v1024_v45 = vadd.f32 %v1000_v14, %v937_v42 }
  0xde   : > { %v1093_v53 = vpop.f32.mrf.mxu1 }
  0xdf   : > { %v1111_v50 = vadd.f32 %v1087_v32, %v1024_v45 }
  0xe0   : > { %v6511_v16 = vpop.f32.mrf.mxu2 }
  0xe1   : > { %v6513_v17 = vpop.f32.mrf.mxu3  ;;  %v854_v13 = vadd.f32 %v6511_v16, %v767_v2 }
  0xe3   : > { %v941_v16 = vadd.f32 %v6513_v17, %v854_v13 }
  0xe4   : > { %v1003_v18 = vpop.f32.mrf.mxu0 }
  0xe5   : > { %v1025_v55 = vadd.f32 %v1003_v18, %v938_v51 }
  0xe6   : > { %v1096_v19 = vpop.f32.mrf.mxu1 }
  0xe7   : > { %v1112_v3 = vadd.f32 %v1090_v41, %v1025_v55 }
  0xe8   : > { %v6515_v20 = vpop.f32.mrf.mxu2 }
  0xe9   : > { %v6517_v21 = vpop.f32.mrf.mxu3 }
  0xec   : > { %v6519_v22 = vpop.f32.mrf.mxu0 }
  0xed   : > { %v1026_v15 = vadd.f32 %v6519_v22, %v939_v7 }
  0xee   : > { %v1099_v27 = vpop.f32.mrf.mxu1 }
  0xf0   : > { %v6523_v24 = vpop.f32.mrf.mxu2 }
  0xf1   : > { %v6527_v26 = vpop.f32.mrf.mxu3 }
  0xf4   : > { %v6525_v25 = vpop.f32.mrf.mxu0 }
  0xf5   : > { %v1027_v41 = vadd.f32 %v6525_v25, %v940_v12  ;;  %v681_v25 = vadd.f32 %v6540_v31, %v6497_v6 }
  0xf6   : > { %v1102_v59 = vpop.f32.mrf.mxu1 }
  0xf7   : > { %v1114_v45 = vadd.f32 %v1096_v19, %v1027_v41  ;;  %v768_v6 = vadd.f32 %v6476_v56, %v681_v25 }
  0xf8   : > { %v6531_v28 = vpop.f32.mrf.mxu2 }
  0xf9   : > { %v6535_v30 = vpop.f32.mrf.mxu3  ;;  %v855_v17 = vadd.f32 %v6515_v20, %v768_v6 }
  0xfb   : > { %v942_v20 = vadd.f32 %v6517_v21, %v855_v17 }
  0xfc   : > { %v6533_v29 = vpop.f32.mrf.mxu0 }
  0xfd   : > { %v1028_v51 = vadd.f32 %v6533_v29, %v941_v16  ;;  %v682_v29 = vadd.f32 %v6540_v31, %v6504_v10 }
  0xfe   : > { %v1105_v19 = vpop.f32.mrf.mxu1 }
  0xff   : > { %v1115_v55 = vadd.f32 %v1099_v27, %v1028_v51  ;;  %v769_v10 = vadd.f32 %v6485_v61, %v682_v29 }
 0x100   : > { %v1175_v35 = vpop.f32.mrf.mxu2 }
 0x101   : > { %v1262_v37 = vpop.f32.mrf.mxu3  ;;  %v1199_v52 = vadd.f32 %v1175_v35, %v1111_v50  ;;  %v1113_v35 = vadd.f32 %v1093_v53, %v1026_v15  ;;  %v856_v21 = vadd.f32 %v6523_v24, %v769_v10  ;;  %v5471_v10 = vld [vmem:[%s9263_s3 + $0x40] sm:$0xff] }
 0x102   : > { %1725 = vmatpush.msra.mxu3 %v5471_v10 }
 0x103   : > { %v1286_v60 = vadd.f32 %v1262_v37, %v1199_v52  ;;  %v943_v24 = vadd.f32 %v6527_v26, %v856_v21  ;;  %v1591_v21 = vld [vmem:[#allocation4 + $0x1] sm:$0xff] }
 0x104   : > { %v6544_v33 = vpop.f32.mrf.mxu0 }
 0x108   : > { %v1178_v43 = vpop.f32.mrf.mxu2 }
 0x109   : > { %v1265_v47 = vpop.f32.mrf.mxu3  ;;  %v1200_v11 = vadd.f32 %v1178_v43, %v1112_v3  ;;  %v1029_v3 = vadd.f32 %v6544_v33, %v942_v20  ;;  %v683_v33 = vadd.f32 %v6540_v31, %v6478_v57 }
 0x10b   : > { %v1287_v32 = vadd.f32 %v1265_v47, %v1200_v11  ;;  %v1116_v11 = vadd.f32 %v1102_v59, %v1029_v3  ;;  %v770_v57 = vadd.f32 %v6487_v62, %v683_v33  ;;  %v5470_v3 = vld [vmem:[%s9263_s3 + $0x38] sm:$0xff]  ;;  %v5481_v33 = vld [vmem:[%s9263_s3 + $0x50] sm:$0xff] }
 0x10c   : > { %v6563_v39 = vpop.f32.mrf.mxu0  ;;  %1726 = vmatpush.msra.mxu3 %v5470_v3 }
 0x10d   : > { %v1030_v31 = vadd.f32 %v6563_v39, %v943_v24  ;;  %v857_v26 = vadd.f32 %v6531_v28, %v770_v57  ;;  %v1676_v24 = vld [vmem:[#allocation4 + $0x2] sm:$0xff] }
 0x10f   : > { %v1117_v34 = vadd.f32 %v1105_v19, %v1030_v31  ;;  %v944_v39 = vadd.f32 %v6535_v30, %v857_v26  ;;  %v5492_v31 = vld [vmem:[%s9263_s3 + $0x68] sm:$0xff] }
 0x110   : > { %v1181_v58 = vpop.f32.mrf.mxu2 }
 0x111   : > { %v1268_v9 = vpop.f32.mrf.mxu3  ;;  %v1201_v37 = vadd.f32 %v1181_v58, %v1113_v35 }
 0x113   : > { %v1288_v43 = vadd.f32 %v1268_v9, %v1201_v37 }
 0x114   : > { %v6583_v48 = vpop.f32.mrf.mxu0 }
 0x115   : > { %v1031_v37 = vadd.f32 %v6583_v48, %v944_v39 }
 0x118   : > { %v1184_v22 = vpop.f32.mrf.mxu2 }
 0x119   : > { %v1271_v40 = vpop.f32.mrf.mxu3  ;;  %v1202_v49 = vadd.f32 %v1184_v22, %v1114_v45 }
 0x11b   : > { %v1289_v54 = vadd.f32 %v1271_v40, %v1202_v49  ;;  %v1108_v40 = vpop.f32.mrf.mxu1 }
 0x11c   : > { %v1349_v0 = vpop.f32.mrf.mxu0  ;;  %v1118_v13 = vadd.f32 %v1108_v40, %v1031_v37 }
 0x11d   : > { %v1373_v4 = vadd.f32 %v1349_v0, %v1286_v60 }
 0x11f   : > { %vm1381_vm6 = vcmp.ge.f32.partialorder %v1373_v4, 0.0  ;;  %v1389_v14 = vmul.f32 0.2, %v1373_v4 }
 0x120   : > { %v1187_v47 = vpop.f32.mrf.mxu2 }
 0x121   : > { %v6620_v18 = vsel %vm1381_vm6, %v1373_v4, %v1389_v14  ;;  %v1274_v53 = vpop.f32.mrf.mxu3  ;;  %v1203_v60 = vadd.f32 %v1187_v47, %v1115_v55 }
 0x122   : > { %1422 = vrot.lane.b32.xlu0 %v6620_v18, %s6157_s16  ;;  %1406 = vst.msk [vmem:[#allocation3 + $0x11] sm:$0xff] %vm442_vm4, %v6620_v18 }
 0x123   : > { %v1290_v9 = vadd.f32 %v1274_v53, %v1203_v60  ;;  %v1515_v60 = vld [vmem:[%s9263_s3] sm:$0xff] }
 0x124   : > { %v1352_v23 = vpop.f32.mrf.mxu0 }
 0x125   : > { %v1374_v36 = vadd.f32 %v1352_v23, %v1287_v32 }
 0x127   : > { %vm1382_vm7 = vcmp.ge.f32.partialorder %v1374_v36, 0.0  ;;  %v1390_v38 = vmul.f32 0.2, %v1374_v36 }
 0x128   : > { %v1190_v1 = vpop.f32.mrf.mxu2 }
 0x129   : > { %v6646_v42 = vsel %vm1382_vm7, %v1374_v36, %v1390_v38  ;;  %v1277_v61 = vpop.f32.mrf.mxu3  ;;  %v1204_v63 = vadd.f32 %v1190_v1, %v1116_v11  ;;  %v5459_v1 = vld [vmem:[%s9263_s3 + $0x20] sm:$0xff]  ;;  %v5493_v11 = vld [vmem:[%s9263_s3 + $0x70] sm:$0xff] }
 0x12a   : > { %1424 = vrot.lane.b32.xlu0 %v6646_v42, %s6157_s16  ;;  %1407 = vst.msk [vmem:[#allocation3 + $0x21] sm:$0xff] %vm442_vm4, %v6646_v42 }
 0x12b   : > { %v1291_v22 = vadd.f32 %v1277_v61, %v1204_v63  ;;  %v1507_v61 = vld [vmem:[#allocation4] sm:$0xff] }
 0x12c   : > { %v1355_v44 = vpop.f32.mrf.mxu0 }
 0x12d   : > { %v1375_v46 = vadd.f32 %v1355_v44, %v1288_v43 }
 0x12f   : > { %vm1383_vm8 = vcmp.ge.f32.partialorder %v1375_v46, 0.0  ;;  %v1391_v50 = vmul.f32 0.2, %v1375_v46 }
 0x130   : > { %v1193_v32 = vpop.f32.mrf.mxu2 }
 0x131   : > { %v6672_v52 = vsel %vm1383_vm8, %v1375_v46, %v1391_v50  ;;  %v1280_v35 = vpop.f32.mrf.mxu3  ;;  %v1205_v36 = vadd.f32 %v1193_v32, %v1117_v34 }
 0x132   : > { %1426 = vrot.lane.b32.xlu1 %v6672_v52, %s6157_s16  ;;  %1408 = vst.msk [vmem:[#allocation3 + $0x31] sm:$0xff] %vm442_vm4, %v6672_v52 }
 0x133   : > { %v1292_v28 = vadd.f32 %v1280_v35, %v1205_v36 }
 0x134   : > { %v1358_v56 = vpop.f32.mrf.mxu0 }
 0x135   : > { %v1376_v58 = vadd.f32 %v1358_v56, %v1289_v54 }
 0x137   : > { %vm1384_vm9 = vcmp.ge.f32.partialorder %v1376_v58, 0.0  ;;  %v1392_v0 = vmul.f32 0.2, %v1376_v58 }
 0x138   : > { %v1196_v2 = vpop.f32.mrf.mxu2 }
 0x139   : > { %v6698_v4 = vsel %vm1384_vm9, %v1376_v58, %v1392_v0  ;;  %v1206_v27 = vadd.f32 %v1196_v2, %v1118_v13  ;;  %v1283_v30 = vpop.f32.mrf.mxu3  ;;  %v5460_v0 = vld [vmem:[%s9263_s3 + $0x28] sm:$0xff] }
 0x13a   : > { %1428 = vrot.lane.b32.xlu1 %v6698_v4, %s6157_s16  ;;  %1409 = vst.msk [vmem:[#allocation3 + $0x41] sm:$0xff] %vm442_vm4, %v6698_v4  ;;  %1640 = vmatpush.msrb.mxu2 %v5460_v0  ;;  %v5535_v0 = vld [vmem:[%s9263_s3 + $0xc0] sm:$0xff] }
 0x13b   : > { %v1293_v48 = vadd.f32 %v1283_v30, %v1206_v27  ;;  %v5515_v30 = vld [vmem:[%s9263_s3 + $0xa0] sm:$0xff] }
 0x13c   : > { %v1361_v7 = vpop.f32.mrf.mxu0  ;;  %1641 = vmatpush.msrb.mxu2 %v5459_v1 }
 0x13d   : > { %v1377_v14 = vadd.f32 %v1361_v7, %v1290_v9  ;;  %v5469_v9 = vld [vmem:[%s9263_s3 + $0x30] sm:$0xff]  ;;  %v5482_v7 = vld [vmem:[%s9263_s3 + $0x58] sm:$0xff] }
 0x13e   : > { %1727 = vmatpush.msra.mxu3 %v5469_v9  ;;  %1810 = vmatpush.msrb.mxu0 %v5482_v7 }
 0x13f   : > { %vm1385_vm10 = vcmp.ge.f32.partialorder %v1377_v14, 0.0  ;;  %v1393_v15 = vmul.f32 0.2, %v1377_v14  ;;  %5472 = vmatmul.msk.f32.vlgmr.msra.gmra.mxu3 %vm470_vm14, %v1676_v24 }
 0x140   : > { %1811 = vmatpush.msrb.mxu0 %v5481_v33  ;;  %2066 = vmatpush.msrb.mxu3 %v5515_v30 }
 0x141   : > { %v1401_v8 = vsel %vm1385_vm10, %v1377_v14, %v1393_v15  ;;  %v5480_v14 = vld [vmem:[%s9263_s3 + $0x48] sm:$0xff]  ;;  %vm500_vm10 = vcmask 386048  }
 0x142   : > { %1430 = vrot.lane.b32.xlu2 %v1401_v8, %s6157_s16  ;;  %1410 = vst.msk [vmem:[#allocation3 + $0x51] sm:$0xff] %vm442_vm4, %v1401_v8  ;;  %1812 = vmatpush.msrb.mxu0 %v5480_v14 }
 0x143   : > { %504 = vst.msk [vmem:[#allocation5 + $0x98] sm:$0x3] %vm500_vm10, %v6156_v5 }
 0x144   : > { %v1364_v23 = vpop.f32.mrf.mxu0  ;;  %525 = vst.msk [vmem:[#allocation5 + $0x99] sm:$0x1] %vm505_vm2, %v6156_v5 }
 0x145   : > { %v1378_v62 = vadd.f32 %v1364_v23, %v1291_v22 }
 0x147   : > { %vm1386_vm11 = vcmp.ge.f32.partialorder %v1378_v62, 0.0  ;;  %v1394_v12 = vmul.f32 0.2, %v1378_v62 }
 0x149   : > { %v1402_v38 = vsel %vm1386_vm11, %v1378_v62, %v1394_v12 }
 0x14a   : > { %1432 = vrot.lane.b32.xlu2 %v1402_v38, %s6157_s16  ;;  %1411 = vst.msk [vmem:[#allocation3 + $0x61] sm:$0xff] %vm442_vm4, %v1402_v38 }
 0x14c   : > { %v1367_v41 = vpop.f32.mrf.mxu0 }
 0x14d   : > { %v1379_v43 = vadd.f32 %v1367_v41, %v1292_v28 }
 0x14f   : > { %vm1387_vm12 = vcmp.ge.f32.partialorder %v1379_v43, 0.0  ;;  %v1395_v44 = vmul.f32 0.2, %v1379_v43 }
 0x151   : > { %v1403_v25 = vsel %vm1387_vm12, %v1379_v43, %v1395_v44  ;;  %v5504_v44 = vld [vmem:[%s9263_s3 + $0x88] sm:$0xff] }
 0x152   : > { %1434 = vrot.lane.b32.xlu1 %v1403_v25, %s6157_s16  ;;  %1412 = vst.msk [vmem:[#allocation3 + $0x71] sm:$0xff] %vm442_vm4, %v1403_v25 }
 0x154   : > { %v1370_v45 = vpop.f32.mrf.mxu0 }
 0x155   : > { %v1380_v46 = vadd.f32 %v1370_v45, %v1293_v48  ;;  %v5514_v48 = vld [vmem:[%s9263_s3 + $0x98] sm:$0xff] }
 0x156   : > { %v5502_v45 = vld [vmem:[%s9263_s3 + $0x78] sm:$0xff]  ;;  %2067 = vmatpush.msrb.mxu3 %v5514_v48 }
 0x157   : > { %vm1388_vm13 = vcmp.ge.f32.partialorder %v1380_v46, 0.0  ;;  %v1396_v47 = vmul.f32 0.2, %v1380_v46 }
 0x159   : > { %v6737_v16 = vsel %vm1388_vm13, %v1380_v46, %v1396_v47  ;;  %v5513_v46 = vld [vmem:[%s9263_s3 + $0x90] sm:$0xff] }
 0x15a   : > { %1413 = vst.msk [vmem:[#allocation3 + $0x81] sm:$0xff] %vm442_vm4, %v6737_v16  ;;  %2068 = vmatpush.msrb.mxu3 %v5513_v46 }
 0x194   : > { %v1423_v49 = vpop.permute.xlu0 %1422 }
 0x195   : > { %v6742_v50 = vmax.f32 %v6620_v18, %v1423_v49  ;;  %v1517_v18 = vld [vmem:[%s9263_s3 + $0x10] sm:$0xff] }
 0x196   : > { %1555 = vmatpush.msra.mxu1 %v1517_v18 }
 0x197   : > { %1462 = vrot.lane.b32.xlu0 %v6742_v50, %s6158_s17 }
 0x19c   : > { %v1425_v6 = vpop.permute.xlu0 %1424  ;;  %v1431_v53 = vpop.permute.xlu2 %1430 }
 0x19d   : > { %v6747_v51 = vmax.f32 %v6646_v42, %v1425_v6  ;;  %v6751_v54 = vmax.f32 %v1401_v8, %v1431_v53  ;;  %v1516_v42 = vld [vmem:[%s9263_s3 + $0x8] sm:$0xff]  ;;  %v5537_v6 = vld [vmem:[%s9263_s3 + $0xd0] sm:$0xff] }
 0x19e   : > { %1556 = vmatpush.msra.mxu1 %v1516_v42 }
 0x19f   : > { %1464 = vrot.lane.b32.xlu2 %v6747_v51, %s6158_s17 }
 0x1a0   : > { %1557 = vmatpush.msra.mxu1 %v1515_v60  ;;  %v5524_v60 = vld [vmem:[%s9263_s3 + $0xa8] sm:$0xff] }
 0x1a1   : > { %5450 = vmatmul.msk.f32.vlgmr.msra.gmra.mxu1 %vm470_vm14, %v1507_v61  ;;  %v2024_v61 = vld [vmem:[#allocation4 + $0x90] sm:$0xff] }
 0x1a2   : > { %1895 = vmatpush.msrb.mxu1 %v5493_v11 }
 0x1a4   : > { %v1427_v17 = vpop.permute.xlu1 %1426  ;;  %1896 = vmatpush.msrb.mxu1 %v5492_v31 }
 0x1a5   : > { %v6754_v56 = vmax.f32 %v6672_v52, %v1427_v17  ;;  %v1433_v52 = vpop.permute.xlu2 %1432 }
 0x1a6   : > { %v6770_v55 = vmax.f32 %v1402_v38, %v1433_v52  ;;  %v5491_v38 = vld [vmem:[%s9263_s3 + $0x60] sm:$0xff] }
 0x1a7   : > { %1466 = vrot.lane.b32.xlu0 %v6754_v56, %s6158_s17  ;;  %1470 = vrot.lane.b32.xlu2 %v6751_v54, %s6158_s17 }
 0x1a8   : > { %1897 = vmatpush.msrb.mxu1 %v5491_v38 }
 0x1aa   : > { %2236 = vmatpush.msra.mxu1 %v5537_v6  ;;  %v5559_v6 = vld [vmem:[%s9265_s5 + $0x58] sm:$0xff] }
 0x1ab   : > { %2445 = vmatpush.msra.mxu3 %v5559_v6 }
 0x1ac   : > { %v1429_v29 = vpop.permute.xlu1 %1428 }
 0x1ad   : > { %v6773_v58 = vmax.f32 %v6698_v4, %v1429_v29  ;;  %v5458_v4 = vld [vmem:[%s9263_s3 + $0x18] sm:$0xff] }
 0x1ae   : > { %1642 = vmatpush.msrb.mxu2 %v5458_v4 }
 0x1af   : > { %1472 = vrot.lane.b32.xlu0 %v6770_v55, %s6158_s17  ;;  %1436 = vrot.lane.b32.xlu2 %v6737_v16, %s6157_s16 }
 0x1b0   : > { %1468 = vrot.lane.b32.xlu1 %v6773_v58, %s6158_s17  ;;  %5461 = vmatmul.msk.f32.vlgmr.msrb.gmra.mxu2 %vm470_vm14, %v1591_v21 }
 0x1b1   : > { %1980 = vmatpush.msra.mxu2 %v5504_v44 }
 0x1c4   : > { %v1435_v59 = vpop.permute.xlu1 %1434 }
 0x1c5   : > { %v6781_v20 = vmax.f32 %v1403_v25, %v1435_v59  ;;  %v5503_v25 = vld [vmem:[%s9263_s3 + $0x80] sm:$0xff]  ;;  %v5525_v59 = vld [vmem:[%s9263_s3 + $0xb0] sm:$0xff] }
 0x1c6   : > { %1981 = vmatpush.msra.mxu2 %v5503_v25  ;;  %v5572_v25 = vld [vmem:[%s9265_s5 + $0x80] sm:$0xff] }
 0x1c7   : > { %1474 = vrot.lane.b32.xlu1 %v6781_v20, %s6158_s17 }
 0x1c8   : > { %1982 = vmatpush.msra.mxu2 %v5502_v45 }
 0x1f9   : > { %v1465_v63 = vpop.permute.xlu2 %1464 }
 0x1fa   : > { %v1487_v15 = vmax.f32 %v6747_v51, %v1465_v63  ;;  %v7073_v63 = vpop.f32.mrf.mxu3 }
 0x1fc   : > { %1496 = vst.msk [vmem:[#allocation4 + $0x21] sm:$0xff] %vm470_vm14, %v1487_v15 }
 0x201   : > { %v1471_v19 = vpop.permute.xlu2 %1470 }
 0x202   : > { %v1490_v57 = vmax.f32 %v6751_v54, %v1471_v19 }
 0x203   : > { %v6888_v36 = vld [vmem:[#allocation4 + $0x20] sm:$0xff] }
 0x204   : > { %1499 = vst.msk [vmem:[#allocation4 + $0x51] sm:$0xff] %vm470_vm14, %v1490_v57  ;;  %v6890_v12 = vld [vmem:[#allocation4 + $0x21] sm:$0xff] }
 0x205   : > { %v6897_v37 = vld [vmem:[#allocation4 + $0x22] sm:$0xff] }
 0x209   : > { %v1463_v8 = vpop.permute.xlu0 %1462  ;;  %v1437_v32 = vpop.permute.xlu2 %1436 }
 0x20a   : > { %v1486_v26 = vmax.f32 %v6742_v50, %v1463_v8  ;;  %v6872_v22 = vmax.f32 %v6737_v16, %v1437_v32  ;;  %v5526_v50 = vld [vmem:[%s9263_s3 + $0xb8] sm:$0xff] }
 0x20b   : > { %2151 = vmatpush.msra.mxu0 %v5526_v50  ;;  %v1512_v51 = vld [vmem:[#allocation4 + $0x50] sm:$0xff]  ;;  %v2322_v50 = vld [vmem:[%s9265_s5 + $0x28] sm:$0xff] }
 0x20c   : > { %1495 = vst.msk [vmem:[#allocation4 + $0x11] sm:$0xff] %vm470_vm14, %v1486_v26  ;;  %1476 = vrot.lane.b32.xlu0 %v6872_v22, %s6158_s17  ;;  %v6958_v53 = vld [vmem:[#allocation4 + $0x51] sm:$0xff]  ;;  %2357 = vmatpush.msrb.mxu2 %v2322_v50 }
 0x20d   : > { %v6963_v17 = vld [vmem:[#allocation4 + $0x52] sm:$0xff]  ;;  %2152 = vmatpush.msra.mxu0 %v5525_v59 }
 0x20e   : > { %v5555_v59 = vld [vmem:[%s9265_s5 + $0x38] sm:$0xff] }
 0x20f   : > { %2153 = vmatpush.msra.mxu0 %v5524_v60 }
 0x213   : > { %v1508_v23 = vld [vmem:[#allocation4 + $0x10] sm:$0xff] }
 0x214   : > { %v6877_v34 = vld [vmem:[#allocation4 + $0x11] sm:$0xff]  ;;  %5451 = vmatmul.msk.f32.gmra.mxu1 %vm470_vm14, %v1508_v23  ;;  %5483 = vmatmul.msk.f32.vlgmr.msrb.gmra.mxu0 %vm470_vm14, %v1508_v23 }
 0x215   : > { %v6879_v62 = vld [vmem:[#allocation4 + $0x12] sm:$0xff]  ;;  %5462 = vmatmul.msk.f32.gmra.mxu2 %vm470_vm14, %v6877_v34 }
 0x216   : > { %5473 = vmatmul.msk.f32.gmra.mxu3 %vm470_vm14, %v6879_v62  ;;  %v2109_v23 = vld [vmem:[#allocation4 + $0x91] sm:$0xff] }
 0x219   : > { %v1467_v35 = vpop.permute.xlu0 %1466 }
 0x21a   : > { %v1488_v39 = vmax.f32 %v6754_v56, %v1467_v35 }
 0x21c   : > { %1497 = vst.msk [vmem:[#allocation4 + $0x31] sm:$0xff] %vm470_vm14, %v1488_v39  ;;  %5452 = vmatmul.msk.f32.gmra.mxu1 %vm470_vm14, %v6888_v36  ;;  %5484 = vmatmul.msk.f32.gmra.mxu0 %vm470_vm14, %v6888_v36 }
 0x21d   : > { %5463 = vmatmul.msk.f32.gmra.mxu2 %vm470_vm14, %v6890_v12 }
 0x21e   : > { %5474 = vmatmul.msk.f32.gmra.mxu3 %vm470_vm14, %v6897_v37  ;;  %v7040_v3 = vpop.f32.mrf.mxu1 }
 0x221   : > { %v1473_v40 = vpop.permute.xlu0 %1472 }
 0x222   : > { %v1491_v28 = vmax.f32 %v6770_v55, %v1473_v40  ;;  %v1469_v2 = vpop.permute.xlu1 %1468 }
 0x223   : > { %v1489_v41 = vmax.f32 %v6773_v58, %v1469_v2  ;;  %v6908_v13 = vld [vmem:[#allocation4 + $0x30] sm:$0xff]  ;;  %v5573_v2 = vld [vmem:[%s9265_s5 + $0x88] sm:$0xff] }
 0x224   : > { %v6910_v43 = vld [vmem:[#allocation4 + $0x31] sm:$0xff]  ;;  %1500 = vst.msk [vmem:[#allocation4 + $0x61] sm:$0xff] %vm470_vm14, %v1491_v28  ;;  %5453 = vmatmul.msk.f32.gmra.mxu1 %vm470_vm14, %v6908_v13  ;;  %5485 = vmatmul.msk.f32.gmra.mxu0 %vm470_vm14, %v6908_v13 }
 0x225   : > { %v6912_v27 = vld [vmem:[#allocation4 + $0x32] sm:$0xff]  ;;  %5464 = vmatmul.msk.f32.gmra.mxu2 %vm470_vm14, %v6910_v43  ;;  %1498 = vst.msk [vmem:[#allocation4 + $0x41] sm:$0xff] %vm470_vm14, %v1489_v41  ;;  %2534 = vmatpush.msrb.mxu0 %v5573_v2 }
 0x226   : > { %5475 = vmatmul.msk.f32.gmra.mxu3 %vm470_vm14, %v6912_v27 }
 0x227   : > { %2535 = vmatpush.msrb.mxu0 %v5572_v25 }
 0x22b   : > { %v1513_v18 = vld [vmem:[#allocation4 + $0x60] sm:$0xff] }
 0x22c   : > { %v1511_v47 = vld [vmem:[#allocation4 + $0x40] sm:$0xff] }
 0x22d   : > { %v6942_v16 = vld [vmem:[#allocation4 + $0x41] sm:$0xff]  ;;  %5454 = vmatmul.msk.f32.gmra.mxu1 %vm470_vm14, %v1511_v47  ;;  %5486 = vmatmul.msk.f32.gmra.mxu0 %vm470_vm14, %v1511_v47 }
 0x22e   : > { %v6944_v49 = vld [vmem:[#allocation4 + $0x42] sm:$0xff]  ;;  %5465 = vmatmul.msk.f32.gmra.mxu2 %vm470_vm14, %v6942_v16 }
 0x22f   : > { %5476 = vmatmul.msk.f32.gmra.mxu3 %vm470_vm14, %v6944_v49  ;;  %v6970_v42 = vld [vmem:[#allocation4 + $0x61] sm:$0xff] }
 0x230   : > { %v6975_v52 = vld [vmem:[#allocation4 + $0x62] sm:$0xff] }
 0x233   : > { %v7071_v24 = vpop.f32.mrf.mxu2 }
 0x235   : > { %5455 = vmatmul.msk.f32.gmra.mxu1 %vm470_vm14, %v1512_v51  ;;  %5487 = vmatmul.msk.f32.gmra.mxu0 %vm470_vm14, %v1512_v51 }
 0x236   : > { %5466 = vmatmul.msk.f32.gmra.mxu2 %vm470_vm14, %v6958_v53 }
 0x237   : > { %5477 = vmatmul.msk.f32.gmra.mxu3 %vm470_vm14, %v6963_v17 }
 0x239   : > { %v1475_v54 = vpop.permute.xlu1 %1474 }
 0x23a   : > { %v1492_v56 = vmax.f32 %v6781_v20, %v1475_v54  ;;  %v5536_v20 = vld [vmem:[%s9263_s3 + $0xc8] sm:$0xff]  ;;  %v5558_v54 = vld [vmem:[%s9265_s5 + $0x50] sm:$0xff] }
 0x23b   : > { %2237 = vmatpush.msra.mxu1 %v5536_v20  ;;  %2446 = vmatpush.msra.mxu3 %v5558_v54 }
 0x23c   : > { %1501 = vst.msk [vmem:[#allocation4 + $0x71] sm:$0xff] %vm470_vm14, %v1492_v56  ;;  %v2320_v56 = vld [vmem:[%s9265_s5 + $0x18] sm:$0xff] }
 0x23d   : > { %5456 = vmatmul.msk.f32.gmra.mxu1 %vm470_vm14, %v1513_v18  ;;  %5488 = vmatmul.msk.f32.gmra.mxu0 %vm470_vm14, %v1513_v18 }
 0x23e   : > { %5467 = vmatmul.msk.f32.gmra.mxu2 %vm470_vm14, %v6970_v42  ;;  %2238 = vmatpush.msra.mxu1 %v5535_v0 }
 0x23f   : > { %5478 = vmatmul.msk.f32.gmra.mxu3 %vm470_vm14, %v6975_v52 }
 0x243   : > { %v1514_v29 = vld [vmem:[#allocation4 + $0x70] sm:$0xff] }
 0x244   : > { %v6980_v55 = vld [vmem:[#allocation4 + $0x71] sm:$0xff] }
 0x245   : > { %v6982_v58 = vld [vmem:[#allocation4 + $0x72] sm:$0xff]  ;;  %5457 = vmatmul.msk.f32.gmra.mxu1 %vm470_vm14, %v1514_v29  ;;  %5489 = vmatmul.msk.f32.gmra.mxu0 %vm470_vm14, %v1514_v29 }
 0x246   : > { %5468 = vmatmul.msk.f32.gmra.mxu2 %vm470_vm14, %v6980_v55 }
 0x247   : > { %5479 = vmatmul.msk.f32.gmra.mxu3 %vm470_vm14, %v6982_v58 }
 0x24d   : > { %5494 = vmatmul.msk.f32.vlgmr.msrb.gmra.mxu1 %vm470_vm14, %v6877_v34  ;;  %v2194_v34 = vld [vmem:[#allocation4 + $0x92] sm:$0xff] }
 0x24e   : > { %5505 = vmatmul.msk.f32.vlgmr.msra.gmra.mxu2 %vm470_vm14, %v6879_v62  ;;  %6110 = vmatpush.msrb.mxu1 %v5573_v2  ;;  %v5568_v2 = vld [vmem:[%s9265_s5 + $0x60] sm:$0xff] }
 0x24f   : > { %5516 = vmatmul.msk.f32.vlgmr.msrb.gmra.mxu3 %vm470_vm14, %v6888_v36 }
 0x250   : > { %6111 = vmatpush.msrb.mxu1 %v5572_v25 }
 0x255   : > { %5495 = vmatmul.msk.f32.gmra.mxu1 %vm470_vm14, %v6890_v12 }
 0x256   : > { %5506 = vmatmul.msk.f32.gmra.mxu2 %vm470_vm14, %v6897_v37 }
 0x257   : > { %5517 = vmatmul.msk.f32.gmra.mxu3 %vm470_vm14, %v6908_v13 }
 0x25d   : > { %5496 = vmatmul.msk.f32.gmra.mxu1 %vm470_vm14, %v6910_v43 }
 0x25e   : > { %5507 = vmatmul.msk.f32.gmra.mxu2 %vm470_vm14, %v6912_v27 }
 0x25f   : > { %5518 = vmatmul.msk.f32.gmra.mxu3 %vm470_vm14, %v1511_v47 }
 0x265   : > { %5497 = vmatmul.msk.f32.gmra.mxu1 %vm470_vm14, %v6942_v16 }
 0x266   : > { %5508 = vmatmul.msk.f32.gmra.mxu2 %vm470_vm14, %v6944_v49 }
 0x267   : > { %5519 = vmatmul.msk.f32.gmra.mxu3 %vm470_vm14, %v1512_v51  ;;  %v7162_v51 = vld [vmem:[%s9264_s4] ss:$0 sm:$0xff] }
 0x26d   : > { %5498 = vmatmul.msk.f32.gmra.mxu1 %vm470_vm14, %v6958_v53 }
 0x26e   : > { %5509 = vmatmul.msk.f32.gmra.mxu2 %vm470_vm14, %v6963_v17 }
 0x26f   : > { %5520 = vmatmul.msk.f32.gmra.mxu3 %vm470_vm14, %v1513_v18  ;;  %v5557_v18 = vld [vmem:[%s9265_s5 + $0x48] sm:$0xff] }
 0x270   : > { %2447 = vmatpush.msra.mxu3 %v5557_v18 }
 0x275   : > { %5499 = vmatmul.msk.f32.gmra.mxu1 %vm470_vm14, %v6970_v42 }
 0x276   : > { %5510 = vmatmul.msk.f32.gmra.mxu2 %vm470_vm14, %v6975_v52 }
 0x277   : > { %5521 = vmatmul.msk.f32.gmra.mxu3 %vm470_vm14, %v1514_v29  ;;  %v5556_v29 = vld [vmem:[%s9265_s5 + $0x40] sm:$0xff] }
 0x278   : > { %2448 = vmatpush.msra.mxu3 %v5556_v29 }
 0x27a   : > { %2449 = vmatpush.msra.mxu3 %v5555_v59 }
 0x27d   : > { %5500 = vmatmul.msk.f32.gmra.mxu1 %vm470_vm14, %v6980_v55 }
 0x27e   : > { %5511 = vmatmul.msk.f32.gmra.mxu2 %vm470_vm14, %v6982_v58  ;;  %v1477_v1 = vpop.permute.xlu0 %1476 }
 0x27f   : > { %v1493_v10 = vmax.f32 %v6872_v22, %v1477_v1 }
 0x281   : > { %1502 = vst.msk [vmem:[#allocation4 + $0x81] sm:$0xff] %vm470_vm14, %v1493_v10  ;;  %v2317_v10 = vld [vmem:[%s9265_s5] sm:$0xff] }
 0x288   : > { %v1768_v4 = vld [vmem:[#allocation4 + $0x80] sm:$0xff] }
 0x289   : > { %v1853_v21 = vld [vmem:[#allocation4 + $0x81] sm:$0xff]  ;;  %5490 = vmatmul.msk.f32.gmra.mxu0 %vm470_vm14, %v1768_v4  ;;  %5522 = vmatmul.msk.f32.gmra.mxu3 %vm470_vm14, %v1768_v4 }
 0x28a   : > { %v1938_v9 = vld [vmem:[#allocation4 + $0x82] sm:$0xff]  ;;  %5501 = vmatmul.msk.f32.gmra.mxu1 %vm470_vm14, %v1853_v21 }
 0x28b   : > { %5512 = vmatmul.msk.f32.gmra.mxu2 %vm470_vm14, %v1938_v9 }
 0x291   : > { %v7046_v7 = vpop.f32.mrf.mxu1  ;;  %5527 = vmatmul.msk.f32.vlgmr.msra.gmra.mxu0 %vm470_vm14, %v6890_v12  ;;  %5523 = vmatmul.msk.f32.gmra.mxu3 %vm470_vm14, %v2024_v61  ;;  %v7097_v26 = vpop.f32.mrf.mxu0  ;;  %v5569_v61 = vld [vmem:[%s9265_s5 + $0x68] sm:$0xff] }
 0x292   : > { %5538 = vmatmul.msk.f32.vlgmr.msra.gmra.mxu1 %vm470_vm14, %v6897_v37 }
 0x298   : > { %v7081_v19 = vpop.f32.mrf.mxu2 }
 0x299   : > { %v7053_v33 = vpop.f32.mrf.mxu1  ;;  %5528 = vmatmul.msk.f32.gmra.mxu0 %vm470_vm14, %v6910_v43  ;;  %v7083_v57 = vpop.f32.mrf.mxu3 }
 0x29a   : > { %5539 = vmatmul.msk.f32.gmra.mxu1 %vm470_vm14, %v6912_v27  ;;  %v7109_v36 = vpop.f32.mrf.mxu0  ;;  %v1585_v6 = vadd.f32 %v7162_v51, %v7053_v33 }
 0x2a0   : > { %v7091_v8 = vpop.f32.mrf.mxu2 }
 0x2a1   : > { %v7059_v11 = vpop.f32.mrf.mxu1  ;;  %5529 = vmatmul.msk.f32.gmra.mxu0 %vm470_vm14, %v6942_v16  ;;  %v7093_v32 = vpop.f32.mrf.mxu3 }
 0x2a2   : > { %5540 = vmatmul.msk.f32.gmra.mxu1 %vm470_vm14, %v6944_v49  ;;  %v7117_v40 = vpop.f32.mrf.mxu0  ;;  %v1586_v59 = vadd.f32 %v7162_v51, %v7059_v11 }
 0x2a8   : > { %v7101_v62 = vpop.f32.mrf.mxu2 }
 0x2a9   : > { %5530 = vmatmul.msk.f32.gmra.mxu0 %vm470_vm14, %v6958_v53  ;;  %v7107_v39 = vpop.f32.mrf.mxu3  ;;  %v5571_v53 = vld [vmem:[%s9265_s5 + $0x78] sm:$0xff] }
 0x2aa   : > { %5541 = vmatmul.msk.f32.gmra.mxu1 %vm470_vm14, %v6963_v17  ;;  %v7069_v14 = vpop.f32.mrf.mxu1  ;;  %v7128_v43 = vpop.f32.mrf.mxu0  ;;  %v2321_v17 = vld [vmem:[%s9265_s5 + $0x20] sm:$0xff]  ;;  %2536 = vmatpush.msrb.mxu0 %v5571_v53 }
 0x2ab   : > { %6112 = vmatpush.msrb.mxu1 %v5571_v53  ;;  %2358 = vmatpush.msrb.mxu2 %v2321_v17  ;;  %v1670_v53 = vadd.f32 %v7091_v8, %v1585_v6  ;;  %v1671_v8 = vadd.f32 %v7101_v62, %v1586_v59 }
 0x2ad   : > { %2359 = vmatpush.msrb.mxu2 %v2320_v56 }
 0x2b1   : > { %5531 = vmatmul.msk.f32.gmra.mxu0 %vm470_vm14, %v6970_v42  ;;  %v7113_v37 = vpop.f32.mrf.mxu2  ;;  %v1583_v42 = vadd.f32 %v7162_v51, %v7040_v3  ;;  %v5554_v3 = vld [vmem:[%s9265_s5 + $0x30] sm:$0xff] }
 0x2b2   : > { %5542 = vmatmul.msk.f32.gmra.mxu1 %vm470_vm14, %v6975_v52  ;;  %v7079_v15 = vpop.f32.mrf.mxu1  ;;  %v7115_v38 = vpop.f32.mrf.mxu3  ;;  %v2319_v52 = vld [vmem:[%s9265_s5 + $0x10] sm:$0xff]  ;;  %2450 = vmatpush.msra.mxu3 %v5554_v3 }
 0x2b3   : > { %v7139_v48 = vpop.f32.mrf.mxu0  ;;  %2360 = vmatpush.msrb.mxu2 %v2319_v52  ;;  %v1668_v20 = vadd.f32 %v7071_v24, %v1583_v42 }
 0x2b5   : > { %v1753_v4 = vadd.f32 %v7073_v63, %v1668_v20 }
 0x2b7   : > { %v1838_v24 = vadd.f32 %v7097_v26, %v1753_v4  ;;  %v1756_v4 = vadd.f32 %v7107_v39, %v1671_v8 }
 0x2b9   : > { %5532 = vmatmul.msk.f32.gmra.mxu0 %vm470_vm14, %v6980_v55  ;;  %v7124_v41 = vpop.f32.mrf.mxu2 }
 0x2ba   : > { %5543 = vmatmul.msk.f32.gmra.mxu1 %vm470_vm14, %v6982_v58  ;;  %v7089_v31 = vpop.f32.mrf.mxu1  ;;  %v7126_v13 = vpop.f32.mrf.mxu3  ;;  %v2318_v58 = vld [vmem:[%s9265_s5 + $0x8] sm:$0xff] }
 0x2bb   : > { %v7149_v16 = vpop.f32.mrf.mxu0  ;;  %2361 = vmatpush.msrb.mxu2 %v2318_v58 }
 0x2bd   : > { %2362 = vmatpush.msrb.mxu2 %v2317_v10 }
 0x2c1   : > { %5533 = vmatmul.msk.f32.gmra.mxu0 %vm470_vm14, %v1853_v21  ;;  %v7132_v44 = vpop.f32.mrf.mxu2  ;;  %v5570_v21 = vld [vmem:[%s9265_s5 + $0x70] sm:$0xff] }
 0x2c2   : > { %5544 = vmatmul.msk.f32.gmra.mxu1 %vm470_vm14, %v1938_v9  ;;  %v7099_v22 = vpop.f32.mrf.mxu1  ;;  %v7134_v30 = vpop.f32.mrf.mxu3  ;;  %v1584_v9 = vadd.f32 %v7162_v51, %v7046_v7  ;;  %2537 = vmatpush.msrb.mxu0 %v5570_v21 }
 0x2c3   : > { %v7194_v0 = vpop.f32.mrf.mxu0  ;;  %6113 = vmatpush.msrb.mxu1 %v5570_v21 }
 0x2c4   : > { %v1669_v63 = vadd.f32 %v7081_v19, %v1584_v9  ;;  %2538 = vmatpush.msrb.mxu0 %v5569_v61 }
 0x2c5   : > { %6114 = vmatpush.msrb.mxu1 %v5569_v61  ;;  %v1587_v61 = vadd.f32 %v7162_v51, %v7069_v14 }
 0x2c6   : > { %2539 = vmatpush.msrb.mxu0 %v5568_v2  ;;  %v1754_v25 = vadd.f32 %v7083_v57, %v1669_v63  ;;  %v1755_v57 = vadd.f32 %v7093_v32, %v1670_v53 }
 0x2c7   : > { %6115 = vmatpush.msrb.mxu1 %v5568_v2  ;;  %v1672_v63 = vadd.f32 %v7113_v37, %v1587_v61  ;;  %v1588_v37 = vadd.f32 %v7162_v51, %v7079_v15  ;;  %v5587_v15 = vld [vmem:[%s9265_s5 + $0xb8] sm:$0xff] }
 0x2c9   : > { %5534 = vmatmul.msk.f32.gmra.mxu0 %vm470_vm14, %v2109_v23  ;;  %v7143_v46 = vpop.f32.mrf.mxu2  ;;  %2622 = vmatpush.msra.mxu1 %v5587_v15 }
 0x2ca   : > { %5545 = vmatmul.msk.f32.gmra.mxu1 %vm470_vm14, %v2194_v34  ;;  %v7105_v35 = vpop.f32.mrf.mxu1  ;;  %v7147_v47 = vpop.f32.mrf.mxu3  ;;  %vm444_vm14 = vcmask 779264  }
 0x2cb   : > { %v1923_v26 = vadd.f32 %v7105_v35, %v1838_v24  ;;  %v1839_v35 = vadd.f32 %v7109_v36, %v1754_v25  ;;  %v1840_v36 = vadd.f32 %v7117_v40, %v1755_v57  ;;  %v1841_v24 = vadd.f32 %v7128_v43, %v1756_v4  ;;  %527 = vst.msk [vmem:[#allocation6 + $0x8] sm:$0x3] %vm444_vm14, %v6156_v5 }
 0x2cc   : > { %445 = vst.msk [vmem:[#allocation3 + $0x8] sm:$0x3] %vm444_vm14, %v6156_v5 }
 0x2cd   : > { %448 = vst.msk [vmem:[#allocation3 + $0x98] sm:$0x3] %vm444_vm14, %v6156_v5 }
 0x2ce   : > { %530 = vst.msk [vmem:[#allocation6 + $0x98] sm:$0x3] %vm444_vm14, %v6156_v5 }
 0x2cf   : > { %541 = vst.msk [vmem:[#allocation6 + $0x9] sm:$0x1] %vm449_vm5, %v6156_v5 }
 0x2d0   : > { %552 = vst.msk [vmem:[#allocation7 + $0x8] sm:$0x3] %vm444_vm14, %v6156_v5 }
 0x2d1   : > { %v1984_v55 = vpop.f32.mrf.mxu2  ;;  %555 = vst.msk [vmem:[#allocation7 + $0x98] sm:$0x3] %vm444_vm14, %v6156_v5 }
 0x2d2   : > { %v7111_v12 = vpop.f32.mrf.mxu1  ;;  %v2070_v60 = vpop.f32.mrf.mxu3  ;;  %v2008_v50 = vadd.f32 %v1984_v55, %v1923_v26  ;;  %460 = vst.msk [vmem:[#allocation3 + $0x9] sm:$0x1] %vm449_vm5, %v6156_v5 }
 0x2d3   : > { %v1924_v18 = vadd.f32 %v7111_v12, %v1839_v35  ;;  %469 = vst.msk [vmem:[#allocation3 + $0x99] sm:$0x1] %vm449_vm5, %v6156_v5 }
 0x2d4   : > { %v2094_v17 = vadd.f32 %v2070_v60, %v2008_v50  ;;  %v1757_v50 = vadd.f32 %v7115_v38, %v1672_v63  ;;  %550 = vst.msk [vmem:[#allocation6 + $0x99] sm:$0x1] %vm449_vm5, %v6156_v5 }
 0x2d5   : > { %566 = vst.msk [vmem:[#allocation7 + $0x9] sm:$0x1] %vm449_vm5, %v6156_v5 }
 0x2d6   : > { %575 = vst.msk [vmem:[#allocation7 + $0x99] sm:$0x1] %vm449_vm5, %v6156_v5  ;;  %v5695_v5 = vld [vmem:[%s9267_s7 + $0x238] sm:$0xff] }
 0x2d9   : > { %v1987_v23 = vpop.f32.mrf.mxu2 }
 0x2da   : > { %v7119_v28 = vpop.f32.mrf.mxu1  ;;  %v2073_v19 = vpop.f32.mrf.mxu3  ;;  %v2009_v29 = vadd.f32 %v1987_v23, %v1924_v18 }
 0x2db   : > { %v1925_v32 = vadd.f32 %v7119_v28, %v1840_v36  ;;  %v1589_v36 = vadd.f32 %v7162_v51, %v7089_v31  ;;  %v5585_v31 = vld [vmem:[%s9265_s5 + $0xa8] sm:$0xff] }
 0x2dc   : > { %v2095_v20 = vadd.f32 %v2073_v19, %v2009_v29 }
 0x2e1   : > { %v1990_v42 = vpop.f32.mrf.mxu2 }
 0x2e2   : > { %v7130_v27 = vpop.f32.mrf.mxu1  ;;  %v2076_v55 = vpop.f32.mrf.mxu3  ;;  %v2010_v21 = vadd.f32 %v1990_v42, %v1925_v32 }
 0x2e3   : > { %v1926_v14 = vadd.f32 %v7130_v27, %v1841_v24 }
 0x2e4   : > { %v2096_v23 = vadd.f32 %v2076_v55, %v2010_v21  ;;  %v5584_v21 = vld [vmem:[%s9265_s5 + $0xa0] sm:$0xff] }
 0x2e9   : > { %v1993_v9 = vpop.f32.mrf.mxu2 }
 0x2ea   : > { %v7141_v45 = vpop.f32.mrf.mxu1  ;;  %v2079_v40 = vpop.f32.mrf.mxu3  ;;  %v2011_v43 = vadd.f32 %v1993_v9, %v1926_v14 }
 0x2f1   : > { %v1996_v35 = vpop.f32.mrf.mxu2 }
 0x2f2   : > { %v7151_v49 = vpop.f32.mrf.mxu1  ;;  %v2082_v18 = vpop.f32.mrf.mxu3 }
 0x2fa   : > { %v7196_v1 = vpop.f32.mrf.mxu1  ;;  %v2085_v9 = vpop.f32.mrf.mxu3 }
 0x306   : > { %v7223_v7 = vpop.f32.mrf.mxu0 }
 0x307   : > { %v7225_v34 = vpop.f32.mrf.mxu1 }
 0x30e   : > { %v2155_v54 = vpop.f32.mrf.mxu0 }
 0x30f   : > { %v2240_v56 = vpop.f32.mrf.mxu1  ;;  %v2179_v52 = vadd.f32 %v2155_v54, %v2094_v17  ;;  %v1842_v17 = vadd.f32 %v7139_v48, %v1757_v50  ;;  %v1673_v54 = vadd.f32 %v7124_v41, %v1588_v37  ;;  %v5586_v41 = vld [vmem:[%s9265_s5 + $0xb0] sm:$0xff] }
 0x310   : > { %2623 = vmatpush.msra.mxu1 %v5586_v41 }
 0x311   : > { %v2264_v58 = vadd.f32 %v2240_v56, %v2179_v52  ;;  %v2097_v56 = vadd.f32 %v2079_v40, %v2011_v43  ;;  %v1927_v48 = vadd.f32 %v7141_v45, %v1842_v17  ;;  %v1758_v55 = vadd.f32 %v7126_v13, %v1673_v54  ;;  %v5582_v54 = vld [vmem:[%s9265_s5 + $0x90] sm:$0xff] }
 0x312   : > { %2624 = vmatpush.msra.mxu1 %v5585_v31  ;;  %v5613_v31 = vld [vmem:[%s9267_s7 + $0xa8] sm:$0xff] }
 0x313   : > { %vm2272_vm3 = vcmp.ge.f32.partialorder %v2264_v58, 0.0  ;;  %v2280_v33 = vmul.f32 0.2, %v2264_v58  ;;  %v1843_v8 = vadd.f32 %v7149_v16, %v1758_v55  ;;  %v1674_v16 = vadd.f32 %v7132_v44, %v1589_v36 }
 0x314   : > { %2625 = vmatpush.msra.mxu1 %v5584_v21  ;;  %v1590_v44 = vadd.f32 %v7162_v51, %v7099_v22  ;;  %v5583_v22 = vld [vmem:[%s9265_s5 + $0x98] sm:$0xff] }
 0x315   : > { %v2288_v60 = vsel %vm2272_vm3, %v2264_v58, %v2280_v33  ;;  %v2012_v58 = vadd.f32 %v1996_v35, %v1927_v48  ;;  %v1759_v40 = vadd.f32 %v7134_v30, %v1674_v16  ;;  %v2580_v16 = vld [vmem:[#allocation5 + $0x92] sm:$0xff] }
 0x316   : > { %2297 = vst.msk [vmem:[#allocation5 + $0x11] sm:$0xff] %vm498_vm1, %v2288_v60  ;;  %v2158_v12 = vpop.f32.mrf.mxu0  ;;  %v1999_v60 = vpop.f32.mrf.mxu2  ;;  %2626 = vmatpush.msra.mxu1 %v5583_v22  ;;  %v2713_v21 = vld [vmem:[%s9267_s7 + $0x38] sm:$0xff] }
 0x317   : > { %v2243_v10 = vpop.f32.mrf.mxu1  ;;  %v2180_v3 = vadd.f32 %v2158_v12, %v2095_v20  ;;  %v2098_v20 = vadd.f32 %v2082_v18, %v2012_v58  ;;  %v1844_v30 = vadd.f32 %v7194_v0, %v1759_v40  ;;  %v2711_v40 = vld [vmem:[%s9267_s7 + $0x28] sm:$0xff] }
 0x318   : > { %2627 = vmatpush.msra.mxu1 %v5582_v54  ;;  %v5650_v54 = vld [vmem:[%s9267_s7 + $0x150] sm:$0xff] }
 0x319   : > { %v2265_v11 = vadd.f32 %v2243_v10, %v2180_v3  ;;  %v1928_v3 = vadd.f32 %v7151_v49, %v1843_v8  ;;  %v1929_v14 = vadd.f32 %v7196_v1, %v1844_v30  ;;  %v5632_v30 = vld [vmem:[%s9267_s7 + $0x100] sm:$0xff] }
 0x31b   : > { %vm2273_vm6 = vcmp.ge.f32.partialorder %v2265_v11, 0.0  ;;  %v2281_v62 = vmul.f32 0.2, %v2265_v11 }
 0x31d   : > { %v2289_v2 = vsel %vm2273_vm6, %v2265_v11, %v2281_v62  ;;  %v2309_v26 = vld [vmem:[#allocation5 + $0x11] sm:$0xff]  ;;  %v2013_v11 = vadd.f32 %v1999_v60, %v1928_v3  ;;  %v2714_v3 = vld [vmem:[%s9267_s7 + $0x40] sm:$0xff] }
 0x31e   : > { %v2396_v28 = vld [vmem:[#allocation5 + $0x12] sm:$0xff]  ;;  %2298 = vst.msk [vmem:[#allocation5 + $0x21] sm:$0xff] %vm498_vm1, %v2289_v2  ;;  %v2161_v39 = vpop.f32.mrf.mxu0  ;;  %5546 = vmatmul.msk.f32.vlgmr.msrb.gmra.mxu2 %vm498_vm1, %v2309_v26  ;;  %v2002_v51 = vpop.f32.mrf.mxu2 }
 0x31f   : > { %v2246_v19 = vpop.f32.mrf.mxu1  ;;  %5560 = vmatmul.msk.f32.vlgmr.msra.gmra.mxu3 %vm498_vm1, %v2396_v28  ;;  %v2181_v25 = vadd.f32 %v2161_v39, %v2096_v23  ;;  %v2099_v49 = vadd.f32 %v2085_v9, %v2013_v11  ;;  %v1675_v28 = vadd.f32 %v7143_v46, %v1590_v44  ;;  %v2014_v50 = vadd.f32 %v2002_v51, %v1929_v14  ;;  %v5611_v9 = vld [vmem:[%s9267_s7 + $0x98] sm:$0xff]  ;;  %v2712_v11 = vld [vmem:[%s9267_s7 + $0x30] sm:$0xff]  ;;  %v2710_v44 = vld [vmem:[%s9267_s7 + $0x20] sm:$0xff] }
 0x320   : > { %v2708_v51 = vld [vmem:[%s9267_s7 + $0x10] sm:$0xff] }
 0x321   : > { %v2266_v6 = vadd.f32 %v2246_v19, %v2181_v25  ;;  %v2088_v19 = vpop.f32.mrf.mxu3  ;;  %v1760_v0 = vadd.f32 %v7147_v47, %v1675_v28  ;;  %v5631_v28 = vld [vmem:[%s9267_s7 + $0xf8] sm:$0xff]  ;;  %v5654_v14 = vld [vmem:[%s9267_s7 + $0x170] sm:$0xff] }
 0x323   : > { %vm2274_vm7 = vcmp.ge.f32.partialorder %v2266_v6, 0.0  ;;  %v2282_v53 = vmul.f32 0.2, %v2266_v6  ;;  %v1845_v43 = vadd.f32 %v7223_v7, %v1760_v0  ;;  %v5629_v0 = vld [vmem:[%s9267_s7 + $0xe8] sm:$0xff] }
 0x325   : > { %v2290_v42 = vsel %vm2274_vm7, %v2266_v6, %v2282_v53  ;;  %v2310_v52 = vld [vmem:[#allocation5 + $0x21] sm:$0xff]  ;;  %v2100_v6 = vadd.f32 %v2088_v19, %v2014_v50  ;;  %v5630_v19 = vld [vmem:[%s9267_s7 + $0xf0] sm:$0xff] }
 0x326   : > { %v7266_v27 = vld [vmem:[#allocation5 + $0x22] sm:$0xff]  ;;  %2299 = vst.msk [vmem:[#allocation5 + $0x31] sm:$0xff] %vm498_vm1, %v2290_v42  ;;  %v2164_v38 = vpop.f32.mrf.mxu0  ;;  %5547 = vmatmul.msk.f32.gmra.mxu2 %vm498_vm1, %v2310_v52  ;;  %5574 = vmatmul.msk.f32.vlgmr.msrb.gmra.mxu0 %vm498_vm1, %v2310_v52  ;;  %v2005_v7 = vpop.f32.mrf.mxu2 }
 0x327   : > { %v2249_v57 = vpop.f32.mrf.mxu1  ;;  %5561 = vmatmul.msk.f32.gmra.mxu3 %vm498_vm1, %v7266_v27  ;;  %v2182_v29 = vadd.f32 %v2164_v38, %v2097_v56  ;;  %v1930_v56 = vadd.f32 %v7225_v34, %v1845_v43  ;;  %v5653_v50 = vld [vmem:[%s9267_s7 + $0x168] sm:$0xff]  ;;  %v5628_v43 = vld [vmem:[%s9267_s7 + $0xe0] sm:$0xff] }
 0x329   : > { %v2267_v59 = vadd.f32 %v2249_v57, %v2182_v29  ;;  %v2091_v42 = vpop.f32.mrf.mxu3  ;;  %v2015_v52 = vadd.f32 %v2005_v7, %v1930_v56  ;;  %v2698_v7 = vld [vmem:[#allocation6] sm:$0xff] }
 0x32a   : > { %v5604_v56 = vld [vmem:[%s9267_s7 + $0x60] sm:$0xff] }
 0x32b   : > { %vm2275_vm8 = vcmp.ge.f32.partialorder %v2267_v59, 0.0  ;;  %v2283_v33 = vmul.f32 0.2, %v2267_v59  ;;  %v2101_v57 = vadd.f32 %v2091_v42, %v2015_v52  ;;  %v5649_v42 = vld [vmem:[%s9267_s7 + $0x148] sm:$0xff] }
 0x32c   : > { %v2791_v52 = vld [vmem:[#allocation6 + $0x1] sm:$0xff] }
 0x32d   : > { %v2291_v12 = vsel %vm2275_vm8, %v2267_v59, %v2283_v33  ;;  %v2311_v45 = vld [vmem:[#allocation5 + $0x31] sm:$0xff] }
 0x32e   : > { %v7284_v10 = vld [vmem:[#allocation5 + $0x32] sm:$0xff]  ;;  %2300 = vst.msk [vmem:[#allocation5 + $0x41] sm:$0xff] %vm498_vm1, %v2291_v12  ;;  %v2167_v32 = vpop.f32.mrf.mxu0  ;;  %5548 = vmatmul.msk.f32.gmra.mxu2 %vm498_vm1, %v2311_v45  ;;  %5575 = vmatmul.msk.f32.gmra.mxu0 %vm498_vm1, %v2311_v45 }
 0x32f   : > { %v2252_v13 = vpop.f32.mrf.mxu1  ;;  %5562 = vmatmul.msk.f32.gmra.mxu3 %vm498_vm1, %v7284_v10  ;;  %v2183_v4 = vadd.f32 %v2167_v32, %v2098_v20  ;;  %v2492_v12 = vld [vmem:[#allocation5 + $0x91] sm:$0xff] }
 0x330   : > { %v2717_v45 = vld [vmem:[%s9267_s7 + $0x58] sm:$0xff] }
 0x331   : > { %v2268_v61 = vadd.f32 %v2252_v13, %v2183_v4  ;;  %2746 = vmatpush.msra.mxu2 %v2717_v45  ;;  %v5615_v32 = vld [vmem:[%s9267_s7 + $0xb8] sm:$0xff]  ;;  %v2715_v13 = vld [vmem:[%s9267_s7 + $0x48] sm:$0xff]  ;;  %v5612_v4 = vld [vmem:[%s9267_s7 + $0xa0] sm:$0xff] }
 0x332   : > { %2840 = vmatpush.msrb.mxu3 %v5615_v32  ;;  %v5673_v32 = vld [vmem:[%s9267_s7 + $0x1c8] sm:$0xff] }
 0x333   : > { %vm2276_vm9 = vcmp.ge.f32.partialorder %v2268_v61, 0.0  ;;  %v2284_v62 = vmul.f32 0.2, %v2268_v61 }
 0x335   : > { %v2292_v24 = vsel %vm2276_vm9, %v2268_v61, %v2284_v62  ;;  %v2312_v63 = vld [vmem:[#allocation5 + $0x41] sm:$0xff]  ;;  %v5610_v61 = vld [vmem:[%s9267_s7 + $0x90] sm:$0xff] }
 0x336   : > { %v7302_v23 = vld [vmem:[#allocation5 + $0x42] sm:$0xff]  ;;  %2301 = vst.msk [vmem:[#allocation5 + $0x51] sm:$0xff] %vm498_vm1, %v2292_v24  ;;  %v2170_v2 = vpop.f32.mrf.mxu0  ;;  %5549 = vmatmul.msk.f32.gmra.mxu2 %vm498_vm1, %v2312_v63  ;;  %5576 = vmatmul.msk.f32.gmra.mxu0 %vm498_vm1, %v2312_v63  ;;  %v5634_v63 = vld [vmem:[%s9267_s7 + $0x110] sm:$0xff] }
 0x337   : > { %v2255_v26 = vpop.f32.mrf.mxu1  ;;  %5563 = vmatmul.msk.f32.gmra.mxu3 %vm498_vm1, %v7302_v23  ;;  %v2184_v39 = vadd.f32 %v2170_v2, %v2099_v49  ;;  %v5609_v62 = vld [vmem:[%s9267_s7 + $0x88] sm:$0xff]  ;;  %v5635_v49 = vld [vmem:[%s9267_s7 + $0x118] sm:$0xff]  ;;  %v5608_v24 = vld [vmem:[%s9267_s7 + $0x80] sm:$0xff] }
 0x338   : > { %2934 = vmatpush.msra.mxu0 %v5635_v49  ;;  %v5607_v2 = vld [vmem:[%s9267_s7 + $0x78] sm:$0xff] }
 0x339   : > { %v2269_v25 = vadd.f32 %v2255_v26, %v2184_v39  ;;  %v5633_v26 = vld [vmem:[%s9267_s7 + $0x108] sm:$0xff]  ;;  %v5655_v39 = vld [vmem:[%s9267_s7 + $0x178] sm:$0xff] }
 0x33a   : > { %2935 = vmatpush.msra.mxu0 %v5634_v63 }
 0x33b   : > { %vm2277_vm11 = vcmp.ge.f32.partialorder %v2269_v25, 0.0  ;;  %v2285_v46 = vmul.f32 0.2, %v2269_v25 }
 0x33c   : > { %2936 = vmatpush.msra.mxu0 %v5633_v26 }
 0x33d   : > { %v2293_v37 = vsel %vm2277_vm11, %v2269_v25, %v2285_v46  ;;  %v2313_v35 = vld [vmem:[#allocation5 + $0x51] sm:$0xff]  ;;  %v2707_v46 = vld [vmem:[%s9267_s7 + $0x8] sm:$0xff] }
 0x33e   : > { %v2400_v53 = vld [vmem:[#allocation5 + $0x52] sm:$0xff]  ;;  %2302 = vst.msk [vmem:[#allocation5 + $0x61] sm:$0xff] %vm498_vm1, %v2293_v37  ;;  %v2173_v1 = vpop.f32.mrf.mxu0  ;;  %5550 = vmatmul.msk.f32.gmra.mxu2 %vm498_vm1, %v2313_v35  ;;  %5577 = vmatmul.msk.f32.vlgmr.msrb.gmra.mxu1 %vm498_vm1, %v2313_v35  ;;  %v5605_v37 = vld [vmem:[%s9267_s7 + $0x68] sm:$0xff] }
 0x33f   : > { %v2258_v17 = vpop.f32.mrf.mxu1  ;;  %5564 = vmatmul.msk.f32.gmra.mxu3 %vm498_vm1, %v2400_v53  ;;  %v2185_v47 = vadd.f32 %v2173_v1, %v2100_v6  ;;  %2937 = vmatpush.msra.mxu0 %v5632_v30  ;;  %v5606_v25 = vld [vmem:[%s9267_s7 + $0x70] sm:$0xff]  ;;  %v5652_v6 = vld [vmem:[%s9267_s7 + $0x160] sm:$0xff]  ;;  %v5627_v35 = vld [vmem:[%s9267_s7 + $0xd8] sm:$0xff] }
 0x340   : > { %3028 = vmatpush.msrb.mxu1 %v5655_v39  ;;  %v5670_v30 = vld [vmem:[%s9267_s7 + $0x1b0] sm:$0xff] }
 0x341   : > { %v2270_v18 = vadd.f32 %v2258_v17, %v2185_v47  ;;  %2938 = vmatpush.msra.mxu0 %v5631_v28  ;;  %v2706_v17 = vld [vmem:[%s9267_s7] sm:$0xff]  ;;  %v5626_v47 = vld [vmem:[%s9267_s7 + $0xd0] sm:$0xff] }
 0x342   : > { %3029 = vmatpush.msrb.mxu1 %v5654_v14  ;;  %v5690_v28 = vld [vmem:[%s9267_s7 + $0x210] sm:$0xff] }
 0x343   : > { %vm2278_vm12 = vcmp.ge.f32.partialorder %v2270_v18, 0.0  ;;  %v2286_v38 = vmul.f32 0.2, %v2270_v18  ;;  %2939 = vmatpush.msra.mxu0 %v5630_v19  ;;  %v5669_v19 = vld [vmem:[%s9267_s7 + $0x1a8] sm:$0xff] }
 0x344   : > { %3030 = vmatpush.msrb.mxu1 %v5653_v50 }
 0x345   : > { %v2294_v15 = vsel %vm2278_vm12, %v2270_v18, %v2286_v38  ;;  %v2314_v41 = vld [vmem:[#allocation5 + $0x61] sm:$0xff]  ;;  %2940 = vmatpush.msra.mxu0 %v5629_v0 }
 0x346   : > { %v2401_v48 = vld [vmem:[#allocation5 + $0x62] sm:$0xff]  ;;  %2303 = vst.msk [vmem:[#allocation5 + $0x71] sm:$0xff] %vm498_vm1, %v2294_v15  ;;  %v2176_v29 = vpop.f32.mrf.mxu0  ;;  %5551 = vmatmul.msk.f32.gmra.mxu2 %vm498_vm1, %v2314_v41  ;;  %5578 = vmatmul.msk.f32.gmra.mxu1 %vm498_vm1, %v2314_v41  ;;  %v5675_v41 = vld [vmem:[%s9267_s7 + $0x1d8] sm:$0xff] }
 0x347   : > { %5565 = vmatmul.msk.f32.gmra.mxu3 %vm498_vm1, %v2401_v48  ;;  %v2261_v55 = vpop.f32.mrf.mxu1  ;;  %v2186_v58 = vadd.f32 %v2176_v29, %v2101_v57  ;;  %2941 = vmatpush.msra.mxu0 %v5628_v43  ;;  %v5625_v18 = vld [vmem:[%s9267_s7 + $0xc8] sm:$0xff]  ;;  %v5624_v38 = vld [vmem:[%s9267_s7 + $0xc0] sm:$0xff] }
 0x348   : > { %3031 = vmatpush.msrb.mxu1 %v5652_v6  ;;  %v5648_v57 = vld [vmem:[%s9267_s7 + $0x140] sm:$0xff] }
 0x349   : > { %v2271_v34 = vadd.f32 %v2261_v55, %v2186_v58  ;;  %2942 = vmatpush.msra.mxu0 %v5627_v35  ;;  %v2885_v55 = vld [vmem:[#allocation6 + $0x2] sm:$0xff]  ;;  %v5646_v58 = vld [vmem:[%s9267_s7 + $0x130] sm:$0xff] }
 0x34b   : > { %vm2279_vm13 = vcmp.ge.f32.partialorder %v2271_v34, 0.0  ;;  %v2287_v59 = vmul.f32 0.2, %v2271_v34  ;;  %2943 = vmatpush.msra.mxu0 %v5626_v47  ;;  %v5689_v47 = vld [vmem:[%s9267_s7 + $0x208] sm:$0xff] }
 0x34d   : > { %v2295_v33 = vsel %vm2279_vm13, %v2271_v34, %v2287_v59  ;;  %v2315_v36 = vld [vmem:[#allocation5 + $0x71] sm:$0xff]  ;;  %2944 = vmatpush.msra.mxu0 %v5625_v18  ;;  %v5645_v34 = vld [vmem:[%s9267_s7 + $0x128] sm:$0xff]  ;;  %v5688_v18 = vld [vmem:[%s9267_s7 + $0x200] sm:$0xff] }
 0x34e   : > { %v2402_v8 = vld [vmem:[#allocation5 + $0x72] sm:$0xff]  ;;  %2304 = vst.msk [vmem:[#allocation5 + $0x81] sm:$0xff] %vm498_vm1, %v2295_v33  ;;  %5552 = vmatmul.msk.f32.gmra.mxu2 %vm498_vm1, %v2315_v36  ;;  %5579 = vmatmul.msk.f32.gmra.mxu1 %vm498_vm1, %v2315_v36  ;;  %v5644_v33 = vld [vmem:[%s9267_s7 + $0x120] sm:$0xff] }
 0x34f   : > { %5566 = vmatmul.msk.f32.gmra.mxu3 %vm498_vm1, %v2402_v8  ;;  %2945 = vmatpush.msra.mxu0 %v5624_v38  ;;  %v5674_v36 = vld [vmem:[%s9267_s7 + $0x1d0] sm:$0xff] }
 0x350   : > { %5636 = vmatmul.msk.f32.vlgmr.msra.gmra.mxu0 %vm442_vm4, %v2885_v55 }
 0x355   : > { %v2316_v20 = vld [vmem:[#allocation5 + $0x81] sm:$0xff] }
 0x356   : > { %v2403_v60 = vld [vmem:[#allocation5 + $0x82] sm:$0xff]  ;;  %5553 = vmatmul.msk.f32.gmra.mxu2 %vm498_vm1, %v2316_v20  ;;  %5580 = vmatmul.msk.f32.gmra.mxu1 %vm498_vm1, %v2316_v20 }
 0x357   : > { %5567 = vmatmul.msk.f32.gmra.mxu3 %vm498_vm1, %v2403_v60 }
 0x35e   : > { %5581 = vmatmul.msk.f32.gmra.mxu1 %vm498_vm1, %v2492_v12  ;;  %v7545_v12 = vld [vmem:[%s9266_s6] ss:$0 sm:$0xff] }
 0x366   : > { %5588 = vmatmul.msk.f32.vlgmr.msra.gmra.mxu1 %vm498_vm1, %v7266_v27  ;;  %v2716_v27 = vld [vmem:[%s9267_s7 + $0x50] sm:$0xff] }
 0x367   : > { %2747 = vmatpush.msra.mxu2 %v2716_v27  ;;  %v5693_v27 = vld [vmem:[%s9267_s7 + $0x228] sm:$0xff] }
 0x369   : > { %2748 = vmatpush.msra.mxu2 %v2715_v13  ;;  %v5672_v13 = vld [vmem:[%s9267_s7 + $0x1c0] sm:$0xff] }
 0x36b   : > { %2749 = vmatpush.msra.mxu2 %v2714_v3 }
 0x36d   : > { %2750 = vmatpush.msra.mxu2 %v2713_v21  ;;  %v5692_v21 = vld [vmem:[%s9267_s7 + $0x220] sm:$0xff] }
 0x36e   : > { %5589 = vmatmul.msk.f32.gmra.mxu1 %vm498_vm1, %v7284_v10  ;;  %v5614_v10 = vld [vmem:[%s9267_s7 + $0xb0] sm:$0xff] }
 0x36f   : > { %2841 = vmatpush.msrb.mxu3 %v5614_v10  ;;  %2751 = vmatpush.msra.mxu2 %v2712_v11 }
 0x371   : > { %2842 = vmatpush.msrb.mxu3 %v5613_v31  ;;  %2752 = vmatpush.msra.mxu2 %v2711_v40  ;;  %v5691_v40 = vld [vmem:[%s9267_s7 + $0x218] sm:$0xff] }
 0x373   : > { %2843 = vmatpush.msrb.mxu3 %v5612_v4  ;;  %2753 = vmatpush.msra.mxu2 %v2710_v44 }
 0x375   : > { %2844 = vmatpush.msrb.mxu3 %v5611_v9  ;;  %v5671_v9 = vld [vmem:[%s9267_s7 + $0x1b8] sm:$0xff] }
 0x376   : > { %5590 = vmatmul.msk.f32.gmra.mxu1 %vm498_vm1, %v7302_v23  ;;  %v2709_v23 = vld [vmem:[%s9267_s7 + $0x18] sm:$0xff] }
 0x377   : > { %2845 = vmatpush.msrb.mxu3 %v5610_v61  ;;  %2754 = vmatpush.msra.mxu2 %v2709_v23 }
 0x379   : > { %2846 = vmatpush.msrb.mxu3 %v5609_v62  ;;  %2755 = vmatpush.msra.mxu2 %v2708_v51 }
 0x37b   : > { %2847 = vmatpush.msrb.mxu3 %v5608_v24  ;;  %2756 = vmatpush.msra.mxu2 %v2707_v46 }
 0x37d   : > { %2848 = vmatpush.msrb.mxu3 %v5607_v2  ;;  %2757 = vmatpush.msra.mxu2 %v2706_v17 }
 0x37e   : > { %5591 = vmatmul.msk.f32.gmra.mxu1 %vm498_vm1, %v2400_v53  ;;  %v5651_v53 = vld [vmem:[%s9267_s7 + $0x158] sm:$0xff]  ;;  %5596 = vmatmul.msk.f32.vlgmr.msra.gmra.mxu2 %vm442_vm4, %v2698_v7 }
 0x37f   : > { %2849 = vmatpush.msrb.mxu3 %v5606_v25  ;;  %3032 = vmatpush.msrb.mxu1 %v5651_v53 }
 0x380   : > { %3122 = vmatpush.msrb.mxu2 %v5675_v41 }
 0x381   : > { %2850 = vmatpush.msrb.mxu3 %v5605_v37  ;;  %3033 = vmatpush.msrb.mxu1 %v5650_v54  ;;  %v5668_v54 = vld [vmem:[%s9267_s7 + $0x1a0] sm:$0xff] }
 0x382   : > { %3123 = vmatpush.msrb.mxu2 %v5674_v36  ;;  %v5687_v36 = vld [vmem:[%s9267_s7 + $0x1f8] sm:$0xff] }
 0x383   : > { %2851 = vmatpush.msrb.mxu3 %v5604_v56  ;;  %3034 = vmatpush.msrb.mxu1 %v5649_v42  ;;  %v5715_v42 = vld [vmem:[%s9267_s7 + $0x298] sm:$0xff] }
 0x384   : > { %5616 = vmatmul.msk.f32.vlgmr.msrb.gmra.mxu3 %vm442_vm4, %v2791_v52  ;;  %3124 = vmatpush.msrb.mxu2 %v5673_v32  ;;  %v5666_v32 = vld [vmem:[%s9267_s7 + $0x190] sm:$0xff] }
 0x385   : > { %3035 = vmatpush.msrb.mxu1 %v5648_v57  ;;  %3216 = vmatpush.msra.mxu3 %v5695_v5  ;;  %v5714_v57 = vld [vmem:[%s9267_s7 + $0x290] sm:$0xff]  ;;  %v5667_v5 = vld [vmem:[%s9267_s7 + $0x198] sm:$0xff] }
 0x386   : > { %5592 = vmatmul.msk.f32.gmra.mxu1 %vm498_vm1, %v2401_v48  ;;  %v5647_v48 = vld [vmem:[%s9267_s7 + $0x138] sm:$0xff]  ;;  %3125 = vmatpush.msrb.mxu2 %v5672_v13 }
 0x387   : > { %3036 = vmatpush.msrb.mxu1 %v5647_v48  ;;  %3311 = vmatpush.msrb.mxu0 %v5715_v42  ;;  %v5713_v48 = vld [vmem:[%s9267_s7 + $0x288] sm:$0xff] }
 0x388   : > { %3126 = vmatpush.msrb.mxu2 %v5671_v9 }
 0x389   : > { %3037 = vmatpush.msrb.mxu1 %v5646_v58  ;;  %3312 = vmatpush.msrb.mxu0 %v5714_v57  ;;  %v5755_v57 = vld [vmem:[%s9267_s7 + $0x358] sm:$0xff] }
 0x38a   : > { %3127 = vmatpush.msrb.mxu2 %v5670_v30  ;;  %v5708_v30 = vld [vmem:[%s9267_s7 + $0x260] sm:$0xff] }
 0x38b   : > { %3038 = vmatpush.msrb.mxu1 %v5645_v34  ;;  %3313 = vmatpush.msrb.mxu0 %v5713_v48  ;;  %v5754_v48 = vld [vmem:[%s9267_s7 + $0x350] sm:$0xff] }
 0x38c   : > { %3128 = vmatpush.msrb.mxu2 %v5669_v19  ;;  %v5664_v19 = vld [vmem:[%s9267_s7 + $0x180] sm:$0xff] }
 0x38d   : > { %3039 = vmatpush.msrb.mxu1 %v5644_v33 }
 0x38e   : > { %5593 = vmatmul.msk.f32.gmra.mxu1 %vm498_vm1, %v2402_v8  ;;  %v5694_v8 = vld [vmem:[%s9267_s7 + $0x230] sm:$0xff]  ;;  %3129 = vmatpush.msrb.mxu2 %v5668_v54 }
 0x38f   : > { %3217 = vmatpush.msra.mxu3 %v5694_v8  ;;  %v5712_v8 = vld [vmem:[%s9267_s7 + $0x280] sm:$0xff] }
 0x390   : > { %3130 = vmatpush.msrb.mxu2 %v5667_v5  ;;  %3314 = vmatpush.msrb.mxu0 %v5712_v8  ;;  %v5727_v5 = vld [vmem:[%s9267_s7 + $0x2b8] sm:$0xff] }
 0x391   : > { %3218 = vmatpush.msra.mxu3 %v5693_v27  ;;  %v5735_v27 = vld [vmem:[%s9267_s7 + $0x2f8] sm:$0xff] }
 0x392   : > { %3405 = vmatpush.msra.mxu1 %v5735_v27  ;;  %3131 = vmatpush.msrb.mxu2 %v5666_v32 }
 0x393   : > { %3219 = vmatpush.msra.mxu3 %v5692_v21 }
 0x395   : > { %3220 = vmatpush.msra.mxu3 %v5691_v40 }
 0x396   : > { %5594 = vmatmul.msk.f32.gmra.mxu1 %vm498_vm1, %v2403_v60 }
 0x397   : > { %3221 = vmatpush.msra.mxu3 %v5690_v28  ;;  %v5732_v28 = vld [vmem:[%s9267_s7 + $0x2e0] sm:$0xff] }
 0x399   : > { %3222 = vmatpush.msra.mxu3 %v5689_v47 }
 0x39b   : > { %3223 = vmatpush.msra.mxu3 %v5688_v18  ;;  %v5705_v18 = vld [vmem:[%s9267_s7 + $0x248] sm:$0xff] }
 0x39d   : > { %3224 = vmatpush.msra.mxu3 %v5687_v36 }
 0x39e   : > { %5595 = vmatmul.msk.f32.gmra.mxu1 %vm498_vm1, %v2580_v16 }
 0x3a1   : > { %v2364_v15 = vpop.f32.mrf.mxu2 }
 0x3a2   : > { %v2452_v59 = vpop.f32.mrf.mxu3  ;;  %v2388_v10 = vadd.f32 %v7545_v12, %v2364_v15 }
 0x3a3   : > { %v2541_v16 = vpop.f32.mrf.mxu0 }
 0x3a4   : > { %v2476_v4 = vadd.f32 %v2452_v59, %v2388_v10 }
 0x3a6   : > { %v2565_v11 = vadd.f32 %v2541_v16, %v2476_v4  ;;  %v5710_v4 = vld [vmem:[%s9267_s7 + $0x270] sm:$0xff] }
 0x3a9   : > { %v2367_v20 = vpop.f32.mrf.mxu2 }
 0x3aa   : > { %v2455_v45 = vpop.f32.mrf.mxu3  ;;  %v2389_v61 = vadd.f32 %v7545_v12, %v2367_v20 }
 0x3ab   : > { %v2544_v23 = vpop.f32.mrf.mxu0 }
 0x3ac   : > { %v2477_v24 = vadd.f32 %v2455_v45, %v2389_v61  ;;  %v5709_v61 = vld [vmem:[%s9267_s7 + $0x268] sm:$0xff] }
 0x3ae   : > { %v2566_v39 = vadd.f32 %v2544_v23, %v2477_v24  ;;  %v5665_v23 = vld [vmem:[%s9267_s7 + $0x188] sm:$0xff] }
 0x3af   : > { %3132 = vmatpush.msrb.mxu2 %v5665_v23 }
 0x3b1   : > { %v2370_v3 = vpop.f32.mrf.mxu2  ;;  %3133 = vmatpush.msrb.mxu2 %v5664_v19 }
 0x3b2   : > { %v2458_v62 = vpop.f32.mrf.mxu3  ;;  %v2390_v51 = vadd.f32 %v7545_v12, %v2370_v3  ;;  %v5734_v3 = vld [vmem:[%s9267_s7 + $0x2f0] sm:$0xff] }
 0x3b3   : > { %v2547_v53 = vpop.f32.mrf.mxu0  ;;  %3406 = vmatpush.msra.mxu1 %v5734_v3  ;;  %3499 = vmatpush.msra.mxu2 %v5755_v57  ;;  %v5779_v57 = vld [vmem:[%s9268_s8 + $0x98] sm:$0xff] }
 0x3b4   : > { %v2478_v50 = vadd.f32 %v2458_v62, %v2390_v51  ;;  %v5731_v51 = vld [vmem:[%s9267_s7 + $0x2d8] sm:$0xff] }
 0x3b5   : > { %3500 = vmatpush.msra.mxu2 %v5754_v48  ;;  %v5801_v48 = vld [vmem:[%s9268_s8 + $0x108] sm:$0xff] }
 0x3b6   : > { %v2567_v7 = vadd.f32 %v2547_v53, %v2478_v50  ;;  %v5706_v53 = vld [vmem:[%s9267_s7 + $0x250] sm:$0xff] }
 0x3b9   : > { %v2373_v2 = vpop.f32.mrf.mxu2 }
 0x3ba   : > { %v2461_v0 = vpop.f32.mrf.mxu3  ;;  %v2391_v56 = vadd.f32 %v7545_v12, %v2373_v2 }
 0x3bb   : > { %v7423_v22 = vpop.f32.mrf.mxu1 }
 0x3bc   : > { %v2479_v15 = vadd.f32 %v2461_v0, %v2391_v56  ;;  %v5684_v0 = vld [vmem:[%s9267_s7 + $0x1e0] sm:$0xff] }
 0x3be   : > { %v2568_v20 = vadd.f32 %v7423_v22, %v2479_v15  ;;  %v5711_v22 = vld [vmem:[%s9267_s7 + $0x278] sm:$0xff] }
 0x3bf   : > { %3315 = vmatpush.msrb.mxu0 %v5711_v22  ;;  %v5725_v22 = vld [vmem:[%s9267_s7 + $0x2a8] sm:$0xff] }
 0x3c1   : > { %v2376_v17 = vpop.f32.mrf.mxu2  ;;  %3316 = vmatpush.msrb.mxu0 %v5710_v4  ;;  %v3562_v4 = vld [vmem:[%s9268_s8 + $0x50] sm:$0xff] }
 0x3c2   : > { %v2464_v55 = vpop.f32.mrf.mxu3  ;;  %v2392_v45 = vadd.f32 %v7545_v12, %v2376_v17  ;;  %v5729_v17 = vld [vmem:[%s9267_s7 + $0x2c8] sm:$0xff] }
 0x3c3   : > { %v7467_v1 = vpop.f32.mrf.mxu1  ;;  %3317 = vmatpush.msrb.mxu0 %v5709_v61 }
 0x3c4   : > { %v2480_v21 = vadd.f32 %v2464_v55, %v2392_v45  ;;  %v5726_v45 = vld [vmem:[%s9267_s7 + $0x2b0] sm:$0xff] }
 0x3c5   : > { %3318 = vmatpush.msrb.mxu0 %v5708_v30 }
 0x3c6   : > { %v2569_v2 = vadd.f32 %v7467_v1, %v2480_v21  ;;  %v5685_v1 = vld [vmem:[%s9267_s7 + $0x1e8] sm:$0xff] }
 0x3c7   : > { %v5753_v21 = vld [vmem:[%s9267_s7 + $0x348] sm:$0xff] }
 0x3c8   : > { %3501 = vmatpush.msra.mxu2 %v5753_v21  ;;  %v5843_v21 = vld [vmem:[%s9268_s8 + $0x1d8] sm:$0xff] }
 0x3c9   : > { %v2379_v10 = vpop.f32.mrf.mxu2 }
 0x3ca   : > { %v2467_v24 = vpop.f32.mrf.mxu3 }
 0x3cb   : > { %v7517_v29 = vpop.f32.mrf.mxu1 }
 0x3d1   : > { %v2382_v50 = vpop.f32.mrf.mxu2 }
 0x3d2   : > { %v2470_v15 = vpop.f32.mrf.mxu3 }
 0x3d3   : > { %v7540_v60 = vpop.f32.mrf.mxu1 }
 0x3da   : > { %v2473_v61 = vpop.f32.mrf.mxu3 }
 0x3db   : > { %v7557_v31 = vpop.f32.mrf.mxu1 }
 0x3e3   : > { %v2629_v44 = vpop.f32.mrf.mxu1 }
 0x3e4   : > { %v2653_v49 = vadd.f32 %v2629_v44, %v2565_v11  ;;  %v5733_v11 = vld [vmem:[%s9267_s7 + $0x2e8] sm:$0xff] }
 0x3e5   : > { %3407 = vmatpush.msra.mxu1 %v5733_v11  ;;  %v5724_v11 = vld [vmem:[%s9267_s7 + $0x2a0] sm:$0xff] }
 0x3e6   : > { %vm2661_vm5 = vcmp.ge.f32.partialorder %v2653_v49, 0.0  ;;  %v2669_v63 = vmul.f32 0.2, %v2653_v49 }
 0x3e7   : > { %3408 = vmatpush.msra.mxu1 %v5732_v28  ;;  %v5752_v28 = vld [vmem:[%s9267_s7 + $0x340] sm:$0xff] }
 0x3e8   : > { %v2677_v26 = vsel %vm2661_vm5, %v2653_v49, %v2669_v63  ;;  %v5686_v63 = vld [vmem:[%s9267_s7 + $0x1f0] sm:$0xff]  ;;  %3502 = vmatpush.msra.mxu2 %v5752_v28 }
 0x3e9   : > { %2686 = vst.msk [vmem:[#allocation6 + $0x11] sm:$0xff] %vm442_vm4, %v2677_v26  ;;  %v2393_v26 = vadd.f32 %v7545_v12, %v2379_v10  ;;  %3225 = vmatpush.msra.mxu3 %v5686_v63  ;;  %3409 = vmatpush.msra.mxu1 %v5731_v51 }
 0x3eb   : > { %v2632_v14 = vpop.f32.mrf.mxu1  ;;  %3226 = vmatpush.msra.mxu3 %v5685_v1  ;;  %v3560_v1 = vld [vmem:[%s9268_s8 + $0x40] sm:$0xff] }
 0x3ec   : > { %v2654_v25 = vadd.f32 %v2632_v14, %v2566_v39 }
 0x3ed   : > { %3227 = vmatpush.msra.mxu3 %v5684_v0 }
 0x3ee   : > { %vm2662_vm15 = vcmp.ge.f32.partialorder %v2654_v25, 0.0  ;;  %v2670_v46 = vmul.f32 0.2, %v2654_v25 }
 0x3f0   : > { %v2678_v43 = vsel %vm2662_vm15, %v2654_v25, %v2670_v46  ;;  %v2699_v6 = vld [vmem:[#allocation6 + $0x10] sm:$0xff]  ;;  %v5707_v25 = vld [vmem:[%s9267_s7 + $0x258] sm:$0xff] }
 0x3f1   : > { %v7580_v37 = vld [vmem:[#allocation6 + $0x11] sm:$0xff]  ;;  %2687 = vst.msk [vmem:[#allocation6 + $0x21] sm:$0xff] %vm442_vm4, %v2678_v43  ;;  %5597 = vmatmul.msk.f32.gmra.mxu2 %vm442_vm4, %v2699_v6  ;;  %5656 = vmatmul.msk.f32.vlgmr.msrb.gmra.mxu1 %vm442_vm4, %v2699_v6  ;;  %v2481_v43 = vadd.f32 %v2467_v24, %v2393_v26 }
 0x3f2   : > { %v7582_v35 = vld [vmem:[#allocation6 + $0x12] sm:$0xff]  ;;  %5617 = vmatmul.msk.f32.gmra.mxu3 %vm442_vm4, %v7580_v37  ;;  %3319 = vmatpush.msrb.mxu0 %v5707_v25 }
 0x3f3   : > { %5637 = vmatmul.msk.f32.gmra.mxu0 %vm442_vm4, %v7582_v35  ;;  %v2635_v52 = vpop.f32.mrf.mxu1  ;;  %v5730_v46 = vld [vmem:[%s9267_s7 + $0x2d0] sm:$0xff]  ;;  %v2570_v42 = vadd.f32 %v7517_v29, %v2481_v43  ;;  %v3563_v29 = vld [vmem:[%s9268_s8 + $0x58] sm:$0xff] }
 0x3f4   : > { %v2655_v38 = vadd.f32 %v2635_v52, %v2567_v7  ;;  %3410 = vmatpush.msra.mxu1 %v5730_v46  ;;  %v2394_v52 = vadd.f32 %v7545_v12, %v2382_v50  ;;  %3320 = vmatpush.msrb.mxu0 %v5706_v53  ;;  %v3559_v46 = vld [vmem:[%s9268_s8 + $0x38] sm:$0xff]  ;;  %v5750_v43 = vld [vmem:[%s9267_s7 + $0x330] sm:$0xff] }
 0x3f5   : > { %3592 = vmatpush.msrb.mxu3 %v3563_v29  ;;  %v5803_v29 = vld [vmem:[%s9268_s8 + $0x118] sm:$0xff] }
 0x3f6   : > { %vm2663_vm0 = vcmp.ge.f32.partialorder %v2655_v38, 0.0  ;;  %v2671_v41 = vmul.f32 0.2, %v2655_v38  ;;  %3411 = vmatpush.msra.mxu1 %v5729_v17  ;;  %3321 = vmatpush.msrb.mxu0 %v5705_v18  ;;  %v2482_v36 = vadd.f32 %v2470_v15, %v2394_v52  ;;  %v5749_v17 = vld [vmem:[%s9267_s7 + $0x328] sm:$0xff]  ;;  %v5747_v18 = vld [vmem:[%s9267_s7 + $0x318] sm:$0xff]  ;;  %v5780_v52 = vld [vmem:[%s9268_s8 + $0xa0] sm:$0xff] }
 0x3f7   : > { %3593 = vmatpush.msrb.mxu3 %v3562_v4  ;;  %v5778_v15 = vld [vmem:[%s9268_s8 + $0x90] sm:$0xff]  ;;  %v5823_v4 = vld [vmem:[%s9268_s8 + $0x178] sm:$0xff] }
 0x3f8   : > { %v2679_v58 = vsel %vm2663_vm0, %v2655_v38, %v2671_v41  ;;  %v7610_v34 = vld [vmem:[#allocation6 + $0x20] sm:$0xff] }
 0x3f9   : > { %v7612_v59 = vld [vmem:[#allocation6 + $0x21] sm:$0xff]  ;;  %2688 = vst.msk [vmem:[#allocation6 + $0x31] sm:$0xff] %vm442_vm4, %v2679_v58  ;;  %5598 = vmatmul.msk.f32.gmra.mxu2 %vm442_vm4, %v7610_v34  ;;  %5657 = vmatmul.msk.f32.gmra.mxu1 %vm442_vm4, %v7610_v34 }
 0x3fa   : > { %v7614_v33 = vld [vmem:[#allocation6 + $0x22] sm:$0xff]  ;;  %5618 = vmatmul.msk.f32.gmra.mxu3 %vm442_vm4, %v7612_v59 }
 0x3fb   : > { %5638 = vmatmul.msk.f32.gmra.mxu0 %vm442_vm4, %v7614_v33  ;;  %v2638_v13 = vpop.f32.mrf.mxu1  ;;  %v5728_v38 = vld [vmem:[%s9267_s7 + $0x2c0] sm:$0xff] }
 0x3fc   : > { %v2656_v16 = vadd.f32 %v2638_v13, %v2568_v20  ;;  %v5704_v58 = vld [vmem:[%s9267_s7 + $0x240] sm:$0xff]  ;;  %3412 = vmatpush.msra.mxu1 %v5728_v38  ;;  %v2385_v20 = vpop.f32.mrf.mxu2  ;;  %v5746_v38 = vld [vmem:[%s9267_s7 + $0x310] sm:$0xff] }
 0x3fd   : > { %3322 = vmatpush.msrb.mxu0 %v5704_v58  ;;  %v2395_v3 = vadd.f32 %v7545_v12, %v2385_v20  ;;  %v5800_v58 = vld [vmem:[%s9268_s8 + $0x100] sm:$0xff] }
 0x3fe   : > { %vm2664_vm1 = vcmp.ge.f32.partialorder %v2656_v16, 0.0  ;;  %v2672_v9 = vmul.f32 0.2, %v2656_v16  ;;  %3413 = vmatpush.msra.mxu1 %v5727_v5  ;;  %v5776_v5 = vld [vmem:[%s9268_s8 + $0x80] sm:$0xff] }
 0x3ff   : > { %v5744_v20 = vld [vmem:[%s9267_s7 + $0x300] sm:$0xff] }
 0x400   : > { %v2680_v40 = vsel %vm2664_vm1, %v2656_v16, %v2672_v9  ;;  %v7657_v62 = vld [vmem:[#allocation6 + $0x30] sm:$0xff]  ;;  %v2571_v16 = vadd.f32 %v7540_v60, %v2482_v36  ;;  %v3561_v60 = vld [vmem:[%s9268_s8 + $0x48] sm:$0xff]  ;;  %3414 = vmatpush.msra.mxu1 %v5726_v45 }
 0x401   : > { %v7659_v44 = vld [vmem:[#allocation6 + $0x31] sm:$0xff]  ;;  %2689 = vst.msk [vmem:[#allocation6 + $0x41] sm:$0xff] %vm442_vm4, %v2680_v40  ;;  %5599 = vmatmul.msk.f32.gmra.mxu2 %vm442_vm4, %v7657_v62  ;;  %5658 = vmatmul.msk.f32.gmra.mxu1 %vm442_vm4, %v7657_v62  ;;  %v2483_v40 = vadd.f32 %v2473_v61, %v2395_v3  ;;  %v3553_v36 = vld [vmem:[%s9268_s8 + $0x8] sm:$0xff]  ;;  %v5796_v3 = vld [vmem:[%s9268_s8 + $0xe0] sm:$0xff] }
 0x402   : > { %v7661_v49 = vld [vmem:[#allocation6 + $0x32] sm:$0xff]  ;;  %5619 = vmatmul.msk.f32.gmra.mxu3 %vm442_vm4, %v7659_v44  ;;  %3415 = vmatpush.msra.mxu1 %v5725_v22  ;;  %v5797_v22 = vld [vmem:[%s9268_s8 + $0xe8] sm:$0xff] }
 0x403   : > { %5639 = vmatmul.msk.f32.gmra.mxu0 %vm442_vm4, %v7661_v49  ;;  %v2641_v39 = vpop.f32.mrf.mxu1  ;;  %3594 = vmatpush.msrb.mxu3 %v3561_v60  ;;  %v2572_v30 = vadd.f32 %v7557_v31, %v2483_v40  ;;  %v5798_v45 = vld [vmem:[%s9268_s8 + $0xf0] sm:$0xff]  ;;  %v5772_v60 = vld [vmem:[%s9268_s8 + $0x60] sm:$0xff] }
 0x404   : > { %v2657_v14 = vadd.f32 %v2641_v39, %v2569_v2  ;;  %3416 = vmatpush.msra.mxu1 %v5724_v11  ;;  %v5751_v39 = vld [vmem:[%s9267_s7 + $0x338] sm:$0xff]  ;;  %v5793_v11 = vld [vmem:[%s9268_s8 + $0xc8] sm:$0xff]  ;;  %v5842_v61 = vld [vmem:[%s9268_s8 + $0x1d0] sm:$0xff] }
 0x405   : > { %3595 = vmatpush.msrb.mxu3 %v3560_v1  ;;  %3503 = vmatpush.msra.mxu2 %v5751_v39  ;;  %v5792_v40 = vld [vmem:[%s9268_s8 + $0xc0] sm:$0xff]  ;;  %v5819_v39 = vld [vmem:[%s9268_s8 + $0x158] sm:$0xff] }
 0x406   : > { %vm2665_vm2 = vcmp.ge.f32.partialorder %v2657_v14, 0.0  ;;  %v2673_v6 = vmul.f32 0.2, %v2657_v14  ;;  %3780 = vmatpush.msrb.mxu1 %v5803_v29  ;;  %v5861_v29 = vld [vmem:[%s9268_s8 + $0x228] sm:$0xff] }
 0x407   : > { %3596 = vmatpush.msrb.mxu3 %v3559_v46  ;;  %3504 = vmatpush.msra.mxu2 %v5750_v43  ;;  %v5838_v46 = vld [vmem:[%s9268_s8 + $0x1b0] sm:$0xff]  ;;  %v5817_v43 = vld [vmem:[%s9268_s8 + $0x148] sm:$0xff] }
 0x408   : > { %v2681_v47 = vsel %vm2665_vm2, %v2657_v14, %v2673_v6  ;;  %v7710_v54 = vld [vmem:[#allocation6 + $0x40] sm:$0xff]  ;;  %v3558_v6 = vld [vmem:[%s9268_s8 + $0x30] sm:$0xff] }
 0x409   : > { %v7712_v7 = vld [vmem:[#allocation6 + $0x41] sm:$0xff]  ;;  %2690 = vst.msk [vmem:[#allocation6 + $0x51] sm:$0xff] %vm442_vm4, %v2681_v47  ;;  %5600 = vmatmul.msk.f32.gmra.mxu2 %vm442_vm4, %v7710_v54  ;;  %5659 = vmatmul.msk.f32.gmra.mxu1 %vm442_vm4, %v7710_v54 }
 0x40a   : > { %v7714_v56 = vld [vmem:[#allocation6 + $0x42] sm:$0xff]  ;;  %5620 = vmatmul.msk.f32.gmra.mxu3 %vm442_vm4, %v7712_v7  ;;  %3505 = vmatpush.msra.mxu2 %v5749_v17 }
 0x40b   : > { %5640 = vmatmul.msk.f32.gmra.mxu0 %vm442_vm4, %v7714_v56  ;;  %v2644_v41 = vpop.f32.mrf.mxu1  ;;  %3597 = vmatpush.msrb.mxu3 %v3558_v6  ;;  %v3557_v47 = vld [vmem:[%s9268_s8 + $0x28] sm:$0xff] }
 0x40c   : > { %v2658_v55 = vadd.f32 %v2644_v41, %v2570_v42  ;;  %v5781_v42 = vld [vmem:[%s9268_s8 + $0xa8] sm:$0xff] }
 0x40d   : > { %3598 = vmatpush.msrb.mxu3 %v3557_v47  ;;  %v5745_v41 = vld [vmem:[%s9267_s7 + $0x308] sm:$0xff] }
 0x40e   : > { %vm2666_vm3 = vcmp.ge.f32.partialorder %v2658_v55, 0.0  ;;  %v2674_v8 = vmul.f32 0.2, %v2658_v55  ;;  %v5837_v6 = vld [vmem:[%s9268_s8 + $0x1a8] sm:$0xff] }
 0x410   : > { %v2682_v32 = vsel %vm2666_vm3, %v2658_v55, %v2674_v8  ;;  %v7751_v27 = vld [vmem:[#allocation6 + $0x50] sm:$0xff]  ;;  %v5777_v55 = vld [vmem:[%s9268_s8 + $0x88] sm:$0xff]  ;;  %v5799_v8 = vld [vmem:[%s9268_s8 + $0xf8] sm:$0xff] }
 0x411   : > { %v7753_v10 = vld [vmem:[#allocation6 + $0x51] sm:$0xff]  ;;  %2691 = vst.msk [vmem:[#allocation6 + $0x61] sm:$0xff] %vm442_vm4, %v2682_v32  ;;  %5601 = vmatmul.msk.f32.gmra.mxu2 %vm442_vm4, %v7751_v27  ;;  %5660 = vmatmul.msk.f32.gmra.mxu1 %vm442_vm4, %v7751_v27  ;;  %v3552_v32 = vld [vmem:[%s9268_s8] sm:$0xff] }
 0x412   : > { %v7755_v13 = vld [vmem:[#allocation6 + $0x52] sm:$0xff]  ;;  %5621 = vmatmul.msk.f32.gmra.mxu3 %vm442_vm4, %v7753_v10 }
 0x413   : > { %5641 = vmatmul.msk.f32.gmra.mxu0 %vm442_vm4, %v7755_v13  ;;  %v2647_v9 = vpop.f32.mrf.mxu1 }
 0x414   : > { %v2659_v12 = vadd.f32 %v2647_v9, %v2571_v16  ;;  %v5773_v16 = vld [vmem:[%s9268_s8 + $0x68] sm:$0xff]  ;;  %v5794_v9 = vld [vmem:[%s9268_s8 + $0xd0] sm:$0xff] }
 0x416   : > { %vm2667_vm6 = vcmp.ge.f32.partialorder %v2659_v12, 0.0  ;;  %v2675_v24 = vmul.f32 0.2, %v2659_v12 }
 0x418   : > { %v2683_v63 = vsel %vm2667_vm6, %v2659_v12, %v2675_v24  ;;  %v7783_v23 = vld [vmem:[#allocation6 + $0x60] sm:$0xff]  ;;  %v5822_v12 = vld [vmem:[%s9268_s8 + $0x170] sm:$0xff]  ;;  %v5821_v24 = vld [vmem:[%s9268_s8 + $0x168] sm:$0xff] }
 0x419   : > { %v7785_v2 = vld [vmem:[#allocation6 + $0x61] sm:$0xff]  ;;  %2692 = vst.msk [vmem:[#allocation6 + $0x71] sm:$0xff] %vm442_vm4, %v2683_v63  ;;  %5602 = vmatmul.msk.f32.gmra.mxu2 %vm442_vm4, %v7783_v23  ;;  %5661 = vmatmul.msk.f32.gmra.mxu1 %vm442_vm4, %v7783_v23 }
 0x41a   : > { %v7787_v26 = vld [vmem:[#allocation6 + $0x62] sm:$0xff]  ;;  %5622 = vmatmul.msk.f32.gmra.mxu3 %vm442_vm4, %v7785_v2 }
 0x41b   : > { %5642 = vmatmul.msk.f32.gmra.mxu0 %vm442_vm4, %v7787_v26  ;;  %v2650_v51 = vpop.f32.mrf.mxu1  ;;  %v5841_v63 = vld [vmem:[%s9268_s8 + $0x1c8] sm:$0xff] }
 0x41c   : > { %v2660_v31 = vadd.f32 %v2650_v51, %v2572_v30  ;;  %v3269_v30 = vld [vmem:[#allocation6 + $0x90] sm:$0xff]  ;;  %v5839_v51 = vld [vmem:[%s9268_s8 + $0x1b8] sm:$0xff] }
 0x41e   : > { %vm2668_vm7 = vcmp.ge.f32.partialorder %v2660_v31, 0.0  ;;  %v2676_v19 = vmul.f32 0.2, %v2660_v31 }
 0x420   : > { %v2684_v14 = vsel %vm2668_vm7, %v2660_v31, %v2676_v19  ;;  %v7808_v25 = vld [vmem:[#allocation6 + $0x70] sm:$0xff]  ;;  %v8035_v31 = vpop.f32.mrf.mxu0  ;;  %v3544_v19 = vld [vmem:[#allocation3] sm:$0xff] }
 0x421   : > { %v7810_v0 = vld [vmem:[#allocation6 + $0x71] sm:$0xff]  ;;  %2693 = vst.msk [vmem:[#allocation6 + $0x81] sm:$0xff] %vm442_vm4, %v2684_v14  ;;  %5603 = vmatmul.msk.f32.gmra.mxu2 %vm442_vm4, %v7808_v25  ;;  %5662 = vmatmul.msk.f32.gmra.mxu1 %vm442_vm4, %v7808_v25 }
 0x422   : > { %v7812_v50 = vld [vmem:[#allocation6 + $0x72] sm:$0xff]  ;;  %5623 = vmatmul.msk.f32.gmra.mxu3 %vm442_vm4, %v7810_v0 }
 0x423   : > { %5643 = vmatmul.msk.f32.gmra.mxu0 %vm442_vm4, %v7812_v50  ;;  %v3363_v14 = vld [vmem:[#allocation6 + $0x91] sm:$0xff] }
 0x428   : > { %v7832_v53 = vld [vmem:[#allocation6 + $0x80] sm:$0xff] }
 0x429   : > { %5676 = vmatmul.msk.f32.vlgmr.msrb.gmra.mxu2 %vm442_vm4, %v7580_v37  ;;  %5663 = vmatmul.msk.f32.gmra.mxu1 %vm442_vm4, %v7832_v53  ;;  %v5748_v37 = vld [vmem:[%s9267_s7 + $0x320] sm:$0xff] }
 0x42a   : > { %5696 = vmatmul.msk.f32.vlgmr.msra.gmra.mxu3 %vm442_vm4, %v7582_v35  ;;  %3506 = vmatpush.msra.mxu2 %v5748_v37  ;;  %v3556_v35 = vld [vmem:[%s9268_s8 + $0x20] sm:$0xff] }
 0x42b   : > { %5716 = vmatmul.msk.f32.vlgmr.msrb.gmra.mxu0 %vm442_vm4, %v7610_v34  ;;  %v5783_v34 = vld [vmem:[%s9268_s8 + $0xb8] sm:$0xff]  ;;  %3599 = vmatpush.msrb.mxu3 %v3556_v35  ;;  %v3080_v28 = vld [vmem:[#allocation6 + $0x81] sm:$0xff]  ;;  %v8060_v35 = vld [vmem:[#allocation3 + $0x10] sm:$0xff] }
 0x42c   : > { %3686 = vmatpush.msra.mxu0 %v5783_v34  ;;  %3507 = vmatpush.msra.mxu2 %v5747_v18  ;;  %v8022_v1 = vld [vmem:[#allocation6 + $0x82] sm:$0xff]  ;;  %v8066_v34 = vld [vmem:[#allocation3 + $0x11] sm:$0xff] }
 0x42d   : > { %v3731_v37 = vld [vmem:[#allocation3 + $0x2] sm:$0xff]  ;;  %v5863_v18 = vld [vmem:[%s9268_s8 + $0x238] sm:$0xff] }
 0x42e   : > { %3508 = vmatpush.msra.mxu2 %v5746_v38  ;;  %v5862_v38 = vld [vmem:[%s9268_s8 + $0x230] sm:$0xff] }
 0x430   : > { %3509 = vmatpush.msra.mxu2 %v5745_v41  ;;  %v5815_v41 = vld [vmem:[%s9268_s8 + $0x138] sm:$0xff] }
 0x431   : > { %5677 = vmatmul.msk.f32.gmra.mxu2 %vm442_vm4, %v7612_v59  ;;  %5736 = vmatmul.msk.f32.vlgmr.msra.gmra.mxu1 %vm442_vm4, %v7612_v59  ;;  %v3555_v59 = vld [vmem:[%s9268_s8 + $0x18] sm:$0xff] }
 0x432   : > { %5697 = vmatmul.msk.f32.gmra.mxu3 %vm442_vm4, %v7614_v33  ;;  %3510 = vmatpush.msra.mxu2 %v5744_v20 }
 0x433   : > { %5717 = vmatmul.msk.f32.gmra.mxu0 %vm442_vm4, %v7657_v62  ;;  %v5782_v62 = vld [vmem:[%s9268_s8 + $0xb0] sm:$0xff]  ;;  %3600 = vmatpush.msrb.mxu3 %v3555_v59  ;;  %v5836_v59 = vld [vmem:[%s9268_s8 + $0x1a0] sm:$0xff] }
 0x434   : > { %3687 = vmatpush.msra.mxu0 %v5782_v62  ;;  %3874 = vmatpush.msrb.mxu2 %v5823_v4  ;;  %v8077_v62 = vld [vmem:[%s9269_s9] ss:$0 sm:$0xff] }
 0x436   : > { %3688 = vmatpush.msra.mxu0 %v5781_v42  ;;  %3875 = vmatpush.msrb.mxu2 %v5822_v12  ;;  %v8139_v12 = vld [vmem:[#allocation3 + $0x30] sm:$0xff] }
 0x438   : > { %3689 = vmatpush.msra.mxu0 %v5780_v52  ;;  %3876 = vmatpush.msrb.mxu2 %v5821_v24  ;;  %v8151_v24 = vld [vmem:[#allocation3 + $0x31] sm:$0xff] }
 0x439   : > { %5678 = vmatmul.msk.f32.gmra.mxu2 %vm442_vm4, %v7659_v44  ;;  %5737 = vmatmul.msk.f32.gmra.mxu1 %vm442_vm4, %v7659_v44  ;;  %v5802_v44 = vld [vmem:[%s9268_s8 + $0x110] sm:$0xff] }
 0x43a   : > { %5698 = vmatmul.msk.f32.gmra.mxu3 %vm442_vm4, %v7661_v49  ;;  %3690 = vmatpush.msra.mxu0 %v5779_v57 }
 0x43b   : > { %5718 = vmatmul.msk.f32.gmra.mxu0 %vm442_vm4, %v7710_v54  ;;  %v3554_v54 = vld [vmem:[%s9268_s8 + $0x10] sm:$0xff]  ;;  %3781 = vmatpush.msrb.mxu1 %v5802_v44 }
 0x43c   : > { %3601 = vmatpush.msrb.mxu3 %v3554_v54  ;;  %3691 = vmatpush.msra.mxu0 %v5778_v15 }
 0x43d   : > { %3782 = vmatpush.msrb.mxu1 %v5801_v48  ;;  %v8095_v48 = vld [vmem:[#allocation3 + $0x20] sm:$0xff] }
 0x43e   : > { %3692 = vmatpush.msra.mxu0 %v5777_v55  ;;  %3602 = vmatpush.msrb.mxu3 %v3553_v36  ;;  %v5860_v55 = vld [vmem:[%s9268_s8 + $0x220] sm:$0xff]  ;;  %v8106_v36 = vld [vmem:[#allocation3 + $0x12] sm:$0xff] }
 0x43f   : > { %3783 = vmatpush.msrb.mxu1 %v5800_v58 }
 0x440   : > { %3693 = vmatpush.msra.mxu0 %v5776_v5  ;;  %3603 = vmatpush.msrb.mxu3 %v3552_v32  ;;  %v8104_v5 = vld [vmem:[#allocation3 + $0x21] sm:$0xff]  ;;  %v5834_v32 = vld [vmem:[%s9268_s8 + $0x190] sm:$0xff] }
 0x441   : > { %5679 = vmatmul.msk.f32.gmra.mxu2 %vm442_vm4, %v7712_v7  ;;  %5738 = vmatmul.msk.f32.gmra.mxu1 %vm442_vm4, %v7712_v7  ;;  %v5775_v7 = vld [vmem:[%s9268_s8 + $0x78] sm:$0xff] }
 0x442   : > { %5699 = vmatmul.msk.f32.gmra.mxu3 %vm442_vm4, %v7714_v56  ;;  %3784 = vmatpush.msrb.mxu1 %v5799_v8  ;;  %v5859_v8 = vld [vmem:[%s9268_s8 + $0x218] sm:$0xff] }
 0x443   : > { %5719 = vmatmul.msk.f32.gmra.mxu0 %vm442_vm4, %v7751_v27  ;;  %v5774_v27 = vld [vmem:[%s9268_s8 + $0x70] sm:$0xff]  ;;  %3968 = vmatpush.msra.mxu3 %v5843_v21  ;;  %v5881_v21 = vld [vmem:[%s9268_s8 + $0x288] sm:$0xff] }
 0x444   : > { %3694 = vmatpush.msra.mxu0 %v5775_v7  ;;  %3785 = vmatpush.msrb.mxu1 %v5798_v45  ;;  %v5835_v7 = vld [vmem:[%s9268_s8 + $0x198] sm:$0xff]  ;;  %v5814_v45 = vld [vmem:[%s9268_s8 + $0x130] sm:$0xff] }
 0x445   : > { %3969 = vmatpush.msra.mxu3 %v5842_v61  ;;  %v5880_v61 = vld [vmem:[%s9268_s8 + $0x280] sm:$0xff] }
 0x446   : > { %3695 = vmatpush.msra.mxu0 %v5774_v27  ;;  %3786 = vmatpush.msrb.mxu1 %v5797_v22 }
 0x447   : > { %3970 = vmatpush.msra.mxu3 %v5841_v63  ;;  %v8153_v63 = vld [vmem:[#allocation3 + $0x22] sm:$0xff] }
 0x448   : > { %3696 = vmatpush.msra.mxu0 %v5773_v16  ;;  %3787 = vmatpush.msrb.mxu1 %v5796_v3  ;;  %v5858_v16 = vld [vmem:[%s9268_s8 + $0x210] sm:$0xff] }
 0x449   : > { %5680 = vmatmul.msk.f32.gmra.mxu2 %vm442_vm4, %v7753_v10  ;;  %5739 = vmatmul.msk.f32.gmra.mxu1 %vm442_vm4, %v7753_v10  ;;  %v5795_v10 = vld [vmem:[%s9268_s8 + $0xd8] sm:$0xff]  ;;  %v5882_v3 = vld [vmem:[%s9268_s8 + $0x290] sm:$0xff] }
 0x44a   : > { %5700 = vmatmul.msk.f32.gmra.mxu3 %vm442_vm4, %v7755_v13  ;;  %3697 = vmatpush.msra.mxu0 %v5772_v60 }
 0x44b   : > { %5720 = vmatmul.msk.f32.gmra.mxu0 %vm442_vm4, %v7783_v23  ;;  %3788 = vmatpush.msrb.mxu1 %v5795_v10  ;;  %v5820_v23 = vld [vmem:[%s9268_s8 + $0x160] sm:$0xff] }
 0x44c   : > { %3877 = vmatpush.msrb.mxu2 %v5820_v23  ;;  %4062 = vmatpush.msrb.mxu0 %v5863_v18  ;;  %v5856_v23 = vld [vmem:[%s9268_s8 + $0x200] sm:$0xff] }
 0x44d   : > { %3789 = vmatpush.msrb.mxu1 %v5794_v9 }
 0x44e   : > { %3878 = vmatpush.msrb.mxu2 %v5819_v39  ;;  %4063 = vmatpush.msrb.mxu0 %v5862_v38 }
 0x44f   : > { %3790 = vmatpush.msrb.mxu1 %v5793_v11  ;;  %v5857_v11 = vld [vmem:[%s9268_s8 + $0x208] sm:$0xff] }
 0x450   : > { %4064 = vmatpush.msrb.mxu0 %v5861_v29  ;;  %v5903_v29 = vld [vmem:[%s9268_s8 + $0x2f8] sm:$0xff] }
 0x451   : > { %5681 = vmatmul.msk.f32.gmra.mxu2 %vm442_vm4, %v7785_v2  ;;  %5740 = vmatmul.msk.f32.gmra.mxu1 %vm442_vm4, %v7785_v2  ;;  %v5840_v2 = vld [vmem:[%s9268_s8 + $0x1c0] sm:$0xff] }
 0x452   : > { %5701 = vmatmul.msk.f32.gmra.mxu3 %vm442_vm4, %v7787_v26  ;;  %3791 = vmatpush.msrb.mxu1 %v5792_v40 }
 0x453   : > { %5721 = vmatmul.msk.f32.gmra.mxu0 %vm442_vm4, %v7808_v25  ;;  %3971 = vmatpush.msra.mxu3 %v5840_v2  ;;  %v3637_v25 = vld [vmem:[#allocation3 + $0x1] sm:$0xff] }
 0x454   : > { %4065 = vmatpush.msrb.mxu0 %v5860_v55 }
 0x455   : > { %3972 = vmatpush.msra.mxu3 %v5839_v51 }
 0x456   : > { %4066 = vmatpush.msrb.mxu0 %v5859_v8 }
 0x457   : > { %3973 = vmatpush.msra.mxu3 %v5838_v46 }
 0x458   : > { %4067 = vmatpush.msrb.mxu0 %v5858_v16  ;;  %v5873_v16 = vld [vmem:[%s9268_s8 + $0x248] sm:$0xff] }
 0x459   : > { %5682 = vmatmul.msk.f32.gmra.mxu2 %vm442_vm4, %v7810_v0  ;;  %5741 = vmatmul.msk.f32.gmra.mxu1 %vm442_vm4, %v7810_v0  ;;  %v5818_v0 = vld [vmem:[%s9268_s8 + $0x150] sm:$0xff] }
 0x45a   : > { %5702 = vmatmul.msk.f32.gmra.mxu3 %vm442_vm4, %v7812_v50  ;;  %3879 = vmatpush.msrb.mxu2 %v5818_v0 }
 0x45b   : > { %5722 = vmatmul.msk.f32.gmra.mxu0 %vm442_vm4, %v7832_v53  ;;  %v8054_v53 = vpop.f32.mrf.mxu2  ;;  %3974 = vmatpush.msra.mxu3 %v5837_v6  ;;  %v8183_v6 = vld [vmem:[#allocation3 + $0x40] sm:$0xff] }
 0x45c   : > { %3880 = vmatpush.msrb.mxu2 %v5817_v43  ;;  %4068 = vmatpush.msrb.mxu0 %v5857_v11  ;;  %v5812_v43 = vld [vmem:[%s9268_s8 + $0x120] sm:$0xff] }
 0x45d   : > { %3975 = vmatpush.msra.mxu3 %v5836_v59  ;;  %v8195_v59 = vld [vmem:[#allocation3 + $0x41] sm:$0xff] }
 0x45e   : > { %4069 = vmatpush.msrb.mxu0 %v5856_v23  ;;  %v5901_v23 = vld [vmem:[%s9268_s8 + $0x2e8] sm:$0xff] }
 0x45f   : > { %3976 = vmatpush.msra.mxu3 %v5835_v7  ;;  %v8227_v7 = vld [vmem:[#allocation3 + $0x50] sm:$0xff] }
 0x461   : > { %5683 = vmatmul.msk.f32.gmra.mxu2 %vm442_vm4, %v3080_v28  ;;  %5742 = vmatmul.msk.f32.gmra.mxu1 %vm442_vm4, %v3080_v28  ;;  %v5833_v28 = vld [vmem:[%s9268_s8 + $0x188] sm:$0xff] }
 0x462   : > { %5703 = vmatmul.msk.f32.gmra.mxu3 %vm442_vm4, %v8022_v1 }
 0x463   : > { %5723 = vmatmul.msk.f32.gmra.mxu0 %vm442_vm4, %v3269_v30  ;;  %3977 = vmatpush.msra.mxu3 %v5834_v32  ;;  %v5813_v30 = vld [vmem:[%s9268_s8 + $0x128] sm:$0xff] }
 0x465   : > { %3978 = vmatpush.msra.mxu3 %v5833_v28  ;;  %v8268_v28 = vld [vmem:[#allocation3 + $0x61] sm:$0xff] }
 0x469   : > { %5756 = vmatmul.msk.f32.vlgmr.msra.gmra.mxu2 %vm442_vm4, %v7614_v33  ;;  %5743 = vmatmul.msk.f32.gmra.mxu1 %vm442_vm4, %v3363_v14  ;;  %v8056_v33 = vpop.f32.mrf.mxu3  ;;  %v5878_v14 = vld [vmem:[%s9268_s8 + $0x270] sm:$0xff] }
 0x46a   : > { %5764 = vmatmul.msk.f32.vlgmr.msrb.gmra.mxu3 %vm442_vm4, %v3544_v19  ;;  %v5855_v19 = vld [vmem:[%s9268_s8 + $0x1f8] sm:$0xff] }
 0x46b   : > { %5784 = vmatmul.msk.f32.vlgmr.msra.gmra.mxu0 %vm442_vm4, %v3637_v25 }
 0x46c   : > { %4070 = vmatpush.msrb.mxu0 %v5855_v19  ;;  %v5921_v19 = vld [vmem:[%s9268_s8 + $0x348] sm:$0xff] }
 0x46e   : > { %v8058_v47 = vpop.f32.mrf.mxu1 }
 0x470   : > { %v2950_v17 = vpop.f32.mrf.mxu0 }
 0x471   : > { %5757 = vmatmul.msk.f32.gmra.mxu2 %vm442_vm4, %v7661_v49  ;;  %5804 = vmatmul.msk.f32.vlgmr.msrb.gmra.mxu1 %vm442_vm4, %v3731_v37  ;;  %v5816_v49 = vld [vmem:[%s9268_s8 + $0x140] sm:$0xff] }
 0x472   : > { %5765 = vmatmul.msk.f32.gmra.mxu3 %vm442_vm4, %v8060_v35  ;;  %3881 = vmatpush.msrb.mxu2 %v5816_v49  ;;  %v5832_v37 = vld [vmem:[%s9268_s8 + $0x180] sm:$0xff] }
 0x473   : > { %5785 = vmatmul.msk.f32.gmra.mxu0 %vm442_vm4, %v8066_v34  ;;  %3979 = vmatpush.msra.mxu3 %v5832_v37  ;;  %v2783_v37 = vadd.f32 %v8077_v62, %v8054_v53 }
 0x474   : > { %v2762_v42 = vpop.f32.mrf.mxu2  ;;  %3882 = vmatpush.msrb.mxu2 %v5815_v41  ;;  %v5852_v41 = vld [vmem:[%s9268_s8 + $0x1e0] sm:$0xff] }
 0x475   : > { %v2856_v52 = vpop.f32.mrf.mxu3  ;;  %v2784_v57 = vadd.f32 %v8077_v62, %v2762_v42  ;;  %v8197_v42 = vld [vmem:[#allocation3 + $0x32] sm:$0xff]  ;;  %v2877_v53 = vadd.f32 %v8056_v33, %v2783_v37 }
 0x476   : > { %v3044_v15 = vpop.f32.mrf.mxu1  ;;  %3883 = vmatpush.msrb.mxu2 %v5814_v45  ;;  %v5874_v45 = vld [vmem:[%s9268_s8 + $0x250] sm:$0xff] }
 0x477   : > { %v2878_v54 = vadd.f32 %v2856_v52, %v2784_v57  ;;  %v5877_v52 = vld [vmem:[%s9268_s8 + $0x268] sm:$0xff]  ;;  %v5876_v57 = vld [vmem:[%s9268_s8 + $0x260] sm:$0xff]  ;;  %v5898_v33 = vld [vmem:[%s9268_s8 + $0x2d0] sm:$0xff] }
 0x478   : > { %v2953_v44 = vpop.f32.mrf.mxu0  ;;  %3884 = vmatpush.msrb.mxu2 %v5813_v30 }
 0x479   : > { %v2972_v58 = vadd.f32 %v2950_v17, %v2878_v54  ;;  %5758 = vmatmul.msk.f32.gmra.mxu2 %vm442_vm4, %v7714_v56  ;;  %5805 = vmatmul.msk.f32.gmra.mxu1 %vm442_vm4, %v8106_v36  ;;  %v5883_v56 = vld [vmem:[%s9268_s8 + $0x298] sm:$0xff]  ;;  %v5854_v17 = vld [vmem:[%s9268_s8 + $0x1f0] sm:$0xff] }
 0x47a   : > { %5766 = vmatmul.msk.f32.gmra.mxu3 %vm442_vm4, %v8095_v48  ;;  %4157 = vmatpush.msra.mxu1 %v5883_v56  ;;  %v5923_v54 = vld [vmem:[%s9268_s8 + $0x358] sm:$0xff] }
 0x47b   : > { %5786 = vmatmul.msk.f32.gmra.mxu0 %vm442_vm4, %v8104_v5  ;;  %v8118_v20 = vadd.f32 %v3044_v15, %v2972_v58  ;;  %3885 = vmatpush.msrb.mxu2 %v5812_v43  ;;  %v5875_v58 = vld [vmem:[%s9268_s8 + $0x258] sm:$0xff] }
 0x47c   : > { %v2765_v27 = vpop.f32.mrf.mxu2  ;;  %4158 = vmatpush.msra.mxu1 %v5882_v3  ;;  %4071 = vmatpush.msrb.mxu0 %v5854_v17  ;;  %v3457_v17 = vld [vmem:[#allocation6 + $0x92] sm:$0xff] }
 0x47d   : > { %v2859_v22 = vpop.f32.mrf.mxu3  ;;  %v2785_v4 = vadd.f32 %v8077_v62, %v2765_v27  ;;  %4251 = vmatpush.msra.mxu2 %v5903_v29  ;;  %4345 = vmatpush.msrb.mxu3 %v5923_v54  ;;  %v8236_v27 = vld [vmem:[#allocation3 + $0x51] sm:$0xff]  ;;  %v8297_v29 = vld [vmem:[#allocation3 + $0x62] sm:$0xff] }
 0x47e   : > { %v3047_v9 = vpop.f32.mrf.mxu1  ;;  %4159 = vmatpush.msra.mxu1 %v5881_v21  ;;  %v5922_v21 = vld [vmem:[%s9268_s8 + $0x350] sm:$0xff] }
 0x47f   : > { %v2879_v60 = vadd.f32 %v2859_v22, %v2785_v4  ;;  %v8238_v22 = vld [vmem:[#allocation3 + $0x42] sm:$0xff]  ;;  %4346 = vmatpush.msrb.mxu3 %v5922_v21 }
 0x480   : > { %v2956_v10 = vpop.f32.mrf.mxu0  ;;  %4160 = vmatpush.msra.mxu1 %v5880_v61 }
 0x481   : > { %v2973_v40 = vadd.f32 %v2953_v44, %v2879_v60  ;;  %5759 = vmatmul.msk.f32.gmra.mxu2 %vm442_vm4, %v7755_v13  ;;  %5806 = vmatmul.msk.f32.gmra.mxu1 %vm442_vm4, %v8153_v63  ;;  %v5879_v13 = vld [vmem:[%s9268_s8 + $0x278] sm:$0xff] }
 0x482   : > { %5767 = vmatmul.msk.f32.gmra.mxu3 %vm442_vm4, %v8139_v12  ;;  %4161 = vmatpush.msra.mxu1 %v5879_v13  ;;  %v8262_v13 = vld [vmem:[#allocation3 + $0x60] sm:$0xff] }
 0x483   : > { %5787 = vmatmul.msk.f32.gmra.mxu0 %vm442_vm4, %v8151_v24  ;;  %v8165_v2 = vadd.f32 %v3047_v9, %v2973_v40  ;;  %v5872_v9 = vld [vmem:[%s9268_s8 + $0x240] sm:$0xff]  ;;  %4347 = vmatpush.msrb.mxu3 %v5921_v19  ;;  %v5915_v19 = vld [vmem:[%s9268_s8 + $0x318] sm:$0xff] }
 0x484   : > { %v2768_v39 = vpop.f32.mrf.mxu2  ;;  %4162 = vmatpush.msra.mxu1 %v5878_v14  ;;  %v5920_v14 = vld [vmem:[%s9268_s8 + $0x340] sm:$0xff] }
 0x485   : > { %v2862_v51 = vpop.f32.mrf.mxu3  ;;  %v2786_v25 = vadd.f32 %v8077_v62, %v2768_v39  ;;  %v8270_v39 = vld [vmem:[#allocation3 + $0x52] sm:$0xff]  ;;  %4348 = vmatpush.msrb.mxu3 %v5920_v14 }
 0x486   : > { %v3050_v46 = vpop.f32.mrf.mxu1  ;;  %4163 = vmatpush.msra.mxu1 %v5877_v52  ;;  %v8290_v52 = vld [vmem:[#allocation3 + $0x70] sm:$0xff] }
 0x487   : > { %v2880_v0 = vadd.f32 %v2862_v51, %v2786_v25  ;;  %v5914_v14 = vld [vmem:[%s9268_s8 + $0x310] sm:$0xff] }
 0x488   : > { %v2959_v18 = vpop.f32.mrf.mxu0  ;;  %4164 = vmatpush.msra.mxu1 %v5876_v57  ;;  %v8295_v57 = vld [vmem:[#allocation3 + $0x71] sm:$0xff] }
 0x489   : > { %v2974_v49 = vadd.f32 %v2956_v10, %v2880_v0  ;;  %5760 = vmatmul.msk.f32.gmra.mxu2 %vm442_vm4, %v7787_v26  ;;  %5807 = vmatmul.msk.f32.gmra.mxu1 %vm442_vm4, %v8197_v42  ;;  %v5853_v26 = vld [vmem:[%s9268_s8 + $0x1e8] sm:$0xff] }
 0x48a   : > { %5768 = vmatmul.msk.f32.gmra.mxu3 %vm442_vm4, %v8183_v6  ;;  %4072 = vmatpush.msrb.mxu0 %v5853_v26 }
 0x48b   : > { %5788 = vmatmul.msk.f32.gmra.mxu0 %vm442_vm4, %v8195_v59  ;;  %v8209_v38 = vadd.f32 %v3050_v46, %v2974_v49  ;;  %4165 = vmatpush.msra.mxu1 %v5875_v58 }
 0x48c   : > { %v2771_v44 = vpop.f32.mrf.mxu2  ;;  %4073 = vmatpush.msrb.mxu0 %v5852_v41 }
 0x48d   : > { %v2865_v15 = vpop.f32.mrf.mxu3  ;;  %v2787_v55 = vadd.f32 %v8077_v62, %v2771_v44  ;;  %4166 = vmatpush.msra.mxu1 %v5874_v45  ;;  %v5899_v44 = vld [vmem:[%s9268_s8 + $0x2d8] sm:$0xff] }
 0x48e   : > { %v3053_v56 = vpop.f32.mrf.mxu1 }
 0x48f   : > { %v2881_v8 = vadd.f32 %v2865_v15, %v2787_v55  ;;  %4167 = vmatpush.msra.mxu1 %v5873_v16  ;;  %v5919_v15 = vld [vmem:[%s9268_s8 + $0x338] sm:$0xff] }
 0x490   : > { %v2962_v3 = vpop.f32.mrf.mxu0  ;;  %4349 = vmatpush.msrb.mxu3 %v5919_v15  ;;  %v8317_v16 = vld [vmem:[#allocation3 + $0x72] sm:$0xff] }
 0x491   : > { %v2975_v32 = vadd.f32 %v2959_v18, %v2881_v8  ;;  %5761 = vmatmul.msk.f32.gmra.mxu2 %vm442_vm4, %v7812_v50  ;;  %5808 = vmatmul.msk.f32.gmra.mxu1 %vm442_vm4, %v8238_v22  ;;  %v5902_v50 = vld [vmem:[%s9268_s8 + $0x2f0] sm:$0xff]  ;;  %v2971_v8 = vadd.f32 %v8035_v31, %v2877_v53 }
 0x492   : > { %5769 = vmatmul.msk.f32.gmra.mxu3 %vm442_vm4, %v8227_v7  ;;  %4252 = vmatpush.msra.mxu2 %v5902_v50  ;;  %v5918_v50 = vld [vmem:[%s9268_s8 + $0x330] sm:$0xff] }
 0x493   : > { %5789 = vmatmul.msk.f32.gmra.mxu0 %vm442_vm4, %v8236_v27  ;;  %v8247_v4 = vadd.f32 %v3053_v56, %v2975_v32  ;;  %4168 = vmatpush.msra.mxu1 %v5872_v9  ;;  %v3065_v31 = vadd.f32 %v8058_v47, %v2971_v8  ;;  %v5916_v9 = vld [vmem:[%s9268_s8 + $0x320] sm:$0xff] }
 0x494   : > { %v2774_v60 = vpop.f32.mrf.mxu2  ;;  %4253 = vmatpush.msra.mxu2 %v5901_v23  ;;  %4350 = vmatpush.msrb.mxu3 %v5918_v50 }
 0x495   : > { %v2868_v10 = vpop.f32.mrf.mxu3  ;;  %v2788_v11 = vadd.f32 %v8077_v62, %v2774_v60 }
 0x496   : > { %v3056_v40 = vpop.f32.mrf.mxu1 }
 0x497   : > { %v2882_v61 = vadd.f32 %v2868_v10, %v2788_v11  ;;  %v5896_v10 = vld [vmem:[%s9268_s8 + $0x2c0] sm:$0xff] }
 0x498   : > { %v2965_v43 = vpop.f32.mrf.mxu0 }
 0x499   : > { %v2976_v30 = vadd.f32 %v2962_v3, %v2882_v61  ;;  %5762 = vmatmul.msk.f32.gmra.mxu2 %vm442_vm4, %v8022_v1  ;;  %5809 = vmatmul.msk.f32.gmra.mxu1 %vm442_vm4, %v8270_v39  ;;  %v5900_v1 = vld [vmem:[%s9268_s8 + $0x2e0] sm:$0xff] }
 0x49a   : > { %5770 = vmatmul.msk.f32.gmra.mxu3 %vm442_vm4, %v8262_v13  ;;  %4254 = vmatpush.msra.mxu2 %v5900_v1  ;;  %v5894_v1 = vld [vmem:[%s9268_s8 + $0x2b0] sm:$0xff] }
 0x49b   : > { %5790 = vmatmul.msk.f32.gmra.mxu0 %vm442_vm4, %v8268_v28  ;;  %v8276_v51 = vadd.f32 %v3056_v40, %v2976_v30 }
 0x49c   : > { %v2777_v25 = vpop.f32.mrf.mxu2  ;;  %4255 = vmatpush.msra.mxu2 %v5899_v44  ;;  %v5912_v44 = vld [vmem:[%s9268_s8 + $0x300] sm:$0xff] }
 0x49d   : > { %v2871_v0 = vpop.f32.mrf.mxu3  ;;  %v2789_v46 = vadd.f32 %v8077_v62, %v2777_v25 }
 0x49e   : > { %v3059_v49 = vpop.f32.mrf.mxu1  ;;  %4256 = vmatpush.msra.mxu2 %v5898_v33 }
 0x49f   : > { %v2883_v18 = vadd.f32 %v2871_v0, %v2789_v46 }
 0x4a0   : > { %v2968_v45 = vpop.f32.mrf.mxu0 }
 0x4a1   : > { %v2977_v26 = vadd.f32 %v2965_v43, %v2883_v18  ;;  %5763 = vmatmul.msk.f32.gmra.mxu2 %vm442_vm4, %v3457_v17  ;;  %5810 = vmatmul.msk.f32.gmra.mxu1 %vm442_vm4, %v8297_v29  ;;  %v5913_v17 = vld [vmem:[%s9268_s8 + $0x308] sm:$0xff] }
 0x4a2   : > { %5771 = vmatmul.msk.f32.gmra.mxu3 %vm442_vm4, %v8290_v52 }
 0x4a3   : > { %5791 = vmatmul.msk.f32.gmra.mxu0 %vm442_vm4, %v8295_v57  ;;  %v8304_v54 = vadd.f32 %v3059_v49, %v2977_v26 }
 0x4a4   : > { %v2780_v41 = vpop.f32.mrf.mxu2 }
 0x4a5   : > { %v2874_v55 = vpop.f32.mrf.mxu3  ;;  %v2790_v58 = vadd.f32 %v8077_v62, %v2780_v41 }
 0x4a6   : > { %v3062_v3 = vpop.f32.mrf.mxu1 }
 0x4a7   : > { %v2884_v56 = vadd.f32 %v2874_v55, %v2790_v58 }
 0x4a8   : > { %v8356_v23 = vpop.f32.mrf.mxu0 }
 0x4a9   : > { %v2978_v32 = vadd.f32 %v2968_v45, %v2884_v56  ;;  %5824 = vmatmul.msk.f32.vlgmr.msrb.gmra.mxu2 %vm442_vm4, %v8060_v35  ;;  %5811 = vmatmul.msk.f32.gmra.mxu1 %vm442_vm4, %v8317_v16  ;;  %v5897_v35 = vld [vmem:[%s9268_s8 + $0x2c8] sm:$0xff] }
 0x4aa   : > { %5844 = vmatmul.msk.f32.vlgmr.msra.gmra.mxu3 %vm442_vm4, %v8066_v34  ;;  %v5917_v34 = vld [vmem:[%s9268_s8 + $0x328] sm:$0xff]  ;;  %4257 = vmatpush.msra.mxu2 %v5897_v35  ;;  %v3832_v35 = vld [vmem:[#allocation3 + $0x80] sm:$0xff] }
 0x4ab   : > { %5864 = vmatmul.msk.f32.vlgmr.msrb.gmra.mxu0 %vm442_vm4, %v8106_v36  ;;  %v8328_v62 = vadd.f32 %v3062_v3, %v2978_v32  ;;  %4351 = vmatpush.msrb.mxu3 %v5917_v34  ;;  %v3926_v34 = vld [vmem:[#allocation3 + $0x81] sm:$0xff] }
 0x4ac   : > { %v3135_v21 = vpop.f32.mrf.mxu2  ;;  %4258 = vmatpush.msra.mxu2 %v5896_v10 }
 0x4ad   : > { %v3229_v60 = vpop.f32.mrf.mxu3  ;;  %v3159_v36 = vadd.f32 %v3135_v21, %v3065_v31  ;;  %4352 = vmatpush.msrb.mxu3 %v5916_v9  ;;  %v4020_v21 = vld [vmem:[#allocation3 + $0x82] sm:$0xff]  ;;  %v4115_v9 = vld [vmem:[#allocation3 + $0x90] sm:$0xff] }
 0x4af   : > { %v8339_v47 = vadd.f32 %v3229_v60, %v3159_v36  ;;  %4353 = vmatpush.msrb.mxu3 %v5915_v19 }
 0x4b0   : > { %v8385_v43 = vpop.f32.mrf.mxu0 }
 0x4b1   : > { %5825 = vmatmul.msk.f32.gmra.mxu2 %vm442_vm4, %v8095_v48  ;;  %5884 = vmatmul.msk.f32.vlgmr.msra.gmra.mxu1 %vm442_vm4, %v8095_v48  ;;  %v5895_v48 = vld [vmem:[%s9268_s8 + $0x2b8] sm:$0xff] }
 0x4b2   : > { %5845 = vmatmul.msk.f32.gmra.mxu3 %vm442_vm4, %v8104_v5  ;;  %4259 = vmatpush.msra.mxu2 %v5895_v48 }
 0x4b3   : > { %5865 = vmatmul.msk.f32.gmra.mxu0 %vm442_vm4, %v8153_v63  ;;  %4354 = vmatpush.msrb.mxu3 %v5914_v14 }
 0x4b4   : > { %v3138_v11 = vpop.f32.mrf.mxu2  ;;  %4260 = vmatpush.msra.mxu2 %v5894_v1 }
 0x4b5   : > { %v3232_v61 = vpop.f32.mrf.mxu3  ;;  %v3160_v40 = vadd.f32 %v3138_v11, %v8118_v20  ;;  %v8371_v20 = vpop.f32.mrf.mxu1  ;;  %4355 = vmatpush.msrb.mxu3 %v5913_v17 }
 0x4b7   : > { %v8358_v30 = vadd.f32 %v3232_v61, %v3160_v40  ;;  %4356 = vmatpush.msrb.mxu3 %v5912_v44 }
 0x4b9   : > { %5826 = vmatmul.msk.f32.gmra.mxu2 %vm442_vm4, %v8139_v12  ;;  %5885 = vmatmul.msk.f32.gmra.mxu1 %vm442_vm4, %v8139_v12 }
 0x4ba   : > { %5846 = vmatmul.msk.f32.gmra.mxu3 %vm442_vm4, %v8151_v24 }
 0x4bb   : > { %5866 = vmatmul.msk.f32.gmra.mxu0 %vm442_vm4, %v8197_v42 }
 0x4bc   : > { %v3141_v25 = vpop.f32.mrf.mxu2 }
 0x4bd   : > { %v3235_v0 = vpop.f32.mrf.mxu3  ;;  %v3161_v12 = vadd.f32 %v3141_v25, %v8165_v2  ;;  %v5893_v2 = vld [vmem:[%s9268_s8 + $0x2a8] sm:$0xff]  ;;  %v8401_v49 = vpop.f32.mrf.mxu1 }
 0x4be   : > { %4261 = vmatpush.msra.mxu2 %v5893_v2 }
 0x4bf   : > { %v8383_v46 = vadd.f32 %v3235_v0, %v3161_v12 }
 0x4c1   : > { %5827 = vmatmul.msk.f32.gmra.mxu2 %vm442_vm4, %v8183_v6  ;;  %5886 = vmatmul.msk.f32.gmra.mxu1 %vm442_vm4, %v8183_v6  ;;  %v5892_v6 = vld [vmem:[%s9268_s8 + $0x2a0] sm:$0xff] }
 0x4c2   : > { %5847 = vmatmul.msk.f32.gmra.mxu3 %vm442_vm4, %v8195_v59  ;;  %4262 = vmatpush.msra.mxu2 %v5892_v6  ;;  %v4303_v6 = vld [vmem:[#allocation3 + $0x92] sm:$0xff] }
 0x4c3   : > { %5867 = vmatmul.msk.f32.gmra.mxu0 %vm442_vm4, %v8238_v22 }
 0x4c4   : > { %v3144_v37 = vpop.f32.mrf.mxu2 }
 0x4c5   : > { %v3238_v18 = vpop.f32.mrf.mxu3  ;;  %v3162_v26 = vadd.f32 %v3144_v37, %v8209_v38  ;;  %v8420_v38 = vpop.f32.mrf.mxu0 }
 0x4c6   : > { %v8423_v58 = vpop.f32.mrf.mxu1 }
 0x4c7   : > { %v8404_v53 = vadd.f32 %v3238_v18, %v3162_v26  ;;  %v4209_v26 = vld [vmem:[#allocation3 + $0x91] sm:$0xff] }
 0x4c9   : > { %5828 = vmatmul.msk.f32.gmra.mxu2 %vm442_vm4, %v8227_v7  ;;  %5887 = vmatmul.msk.f32.gmra.mxu1 %vm442_vm4, %v8227_v7 }
 0x4ca   : > { %5848 = vmatmul.msk.f32.gmra.mxu3 %vm442_vm4, %v8236_v27 }
 0x4cb   : > { %5868 = vmatmul.msk.f32.gmra.mxu0 %vm442_vm4, %v8270_v39 }
 0x4cc   : > { %v3147_v15 = vpop.f32.mrf.mxu2 }
 0x4cd   : > { %v3241_v41 = vpop.f32.mrf.mxu3  ;;  %v3163_v55 = vadd.f32 %v3147_v15, %v8247_v4  ;;  %v8435_v33 = vpop.f32.mrf.mxu0  ;;  %v4444_v15 = vld [vmem:[%s9270_s10 + $0x48] sm:$0xff] }
 0x4ce   : > { %v8440_v32 = vpop.f32.mrf.mxu1 }
 0x4cf   : > { %v8425_v8 = vadd.f32 %v3241_v41, %v3163_v55 }
 0x4d1   : > { %5829 = vmatmul.msk.f32.gmra.mxu2 %vm442_vm4, %v8262_v13  ;;  %5888 = vmatmul.msk.f32.gmra.mxu1 %vm442_vm4, %v8262_v13 }
 0x4d2   : > { %5849 = vmatmul.msk.f32.gmra.mxu3 %vm442_vm4, %v8268_v28 }
 0x4d3   : > { %5869 = vmatmul.msk.f32.gmra.mxu0 %vm442_vm4, %v8297_v29 }
 0x4d4   : > { %v3150_v7 = vpop.f32.mrf.mxu2 }
 0x4d5   : > { %v3244_v56 = vpop.f32.mrf.mxu3  ;;  %v3164_v4 = vadd.f32 %v3150_v7, %v8276_v51  ;;  %v8451_v31 = vpop.f32.mrf.mxu0 }
 0x4d7   : > { %v8438_v45 = vadd.f32 %v3244_v56, %v3164_v4  ;;  %v4443_v56 = vld [vmem:[%s9270_s10 + $0x40] sm:$0xff] }
 0x4d9   : > { %5830 = vmatmul.msk.f32.gmra.mxu2 %vm442_vm4, %v8290_v52  ;;  %5889 = vmatmul.msk.f32.gmra.mxu1 %vm442_vm4, %v8290_v52  ;;  %v8459_v52 = vpop.f32.mrf.mxu1 }
 0x4da   : > { %5850 = vmatmul.msk.f32.gmra.mxu3 %vm442_vm4, %v8295_v57 }
 0x4db   : > { %5870 = vmatmul.msk.f32.gmra.mxu0 %vm442_vm4, %v8317_v16 }
 0x4dc   : > { %v3153_v13 = vpop.f32.mrf.mxu2 }
 0x4dd   : > { %v3247_v3 = vpop.f32.mrf.mxu3  ;;  %v3165_v51 = vadd.f32 %v3153_v13, %v8304_v54  ;;  %v8464_v11 = vpop.f32.mrf.mxu0  ;;  %v4442_v13 = vld [vmem:[%s9270_s10 + $0x38] sm:$0xff] }
 0x4df   : > { %v8453_v50 = vadd.f32 %v3247_v3, %v3165_v51 }
 0x4e1   : > { %5831 = vmatmul.msk.f32.gmra.mxu2 %vm442_vm4, %v3832_v35  ;;  %5890 = vmatmul.msk.f32.gmra.mxu1 %vm442_vm4, %v3832_v35  ;;  %v8475_v48 = vpop.f32.mrf.mxu1 }
 0x4e2   : > { %5851 = vmatmul.msk.f32.gmra.mxu3 %vm442_vm4, %v3926_v34 }
 0x4e3   : > { %5871 = vmatmul.msk.f32.gmra.mxu0 %vm442_vm4, %v4020_v21 }
 0x4e4   : > { %v3156_v60 = vpop.f32.mrf.mxu2 }
 0x4e5   : > { %v3250_v36 = vpop.f32.mrf.mxu3  ;;  %v3166_v54 = vadd.f32 %v3156_v60, %v8328_v62  ;;  %v8481_v62 = vpop.f32.mrf.mxu0 }
 0x4e7   : > { %v8462_v10 = vadd.f32 %v3250_v36, %v3166_v54  ;;  %v4440_v54 = vld [vmem:[%s9270_s10 + $0x28] sm:$0xff] }
 0x4e9   : > { %5904 = vmatmul.msk.f32.vlgmr.msra.gmra.mxu2 %vm442_vm4, %v8104_v5  ;;  %5891 = vmatmul.msk.f32.gmra.mxu1 %vm442_vm4, %v4115_v9 }
 0x4ea   : > { %5924 = vmatmul.msk.f32.vlgmr.msrb.gmra.mxu3 %vm442_vm4, %v8153_v63  ;;  %v8487_v63 = vpop.f32.mrf.mxu1 }
 0x4ec   : > { %v8471_v61 = vpop.f32.mrf.mxu2 }
 0x4ed   : > { %v8473_v40 = vpop.f32.mrf.mxu3  ;;  %v8497_v14 = vpop.f32.mrf.mxu0 }
 0x4f1   : > { %5905 = vmatmul.msk.f32.gmra.mxu2 %vm442_vm4, %v8151_v24 }
 0x4f2   : > { %5925 = vmatmul.msk.f32.gmra.mxu3 %vm442_vm4, %v8197_v42  ;;  %v8499_v42 = vpop.f32.mrf.mxu1 }
 0x4f3   : > { %9273 = vst [vmem:[#allocation8_spill] sm:$0xff] %v8499_v42 }
 0x4f4   : > { %v8483_v5 = vpop.f32.mrf.mxu2 }
 0x4f5   : > { %v8485_v19 = vpop.f32.mrf.mxu3  ;;  %v8509_v0 = vpop.f32.mrf.mxu0 }
 0x4f9   : > { %5906 = vmatmul.msk.f32.gmra.mxu2 %vm442_vm4, %v8195_v59 }
 0x4fa   : > { %5926 = vmatmul.msk.f32.gmra.mxu3 %vm442_vm4, %v8238_v22  ;;  %v8515_v22 = vpop.f32.mrf.mxu1 }
 0x4fc   : > { %v8493_v1 = vpop.f32.mrf.mxu2 }
 0x4fd   : > { %v8495_v24 = vpop.f32.mrf.mxu3  ;;  %v8521_v2 = vpop.f32.mrf.mxu0 }
 0x501   : > { %5907 = vmatmul.msk.f32.gmra.mxu2 %vm442_vm4, %v8236_v27 }
 0x502   : > { %5927 = vmatmul.msk.f32.gmra.mxu3 %vm442_vm4, %v8270_v39  ;;  %v8531_v17 = vpop.f32.mrf.mxu1 }
 0x504   : > { %v8505_v25 = vpop.f32.mrf.mxu2 }
 0x505   : > { %v8507_v59 = vpop.f32.mrf.mxu3  ;;  %v8538_v37 = vpop.f32.mrf.mxu0 }
 0x509   : > { %5908 = vmatmul.msk.f32.gmra.mxu2 %vm442_vm4, %v8268_v28 }
 0x50a   : > { %5928 = vmatmul.msk.f32.gmra.mxu3 %vm442_vm4, %v8297_v29  ;;  %v4446_v29 = vld [vmem:[%s9270_s10 + $0x58] sm:$0xff]  ;;  %v8547_v44 = vpop.f32.mrf.mxu1 }
 0x50b   : > { %4475 = vmatpush.msra.mxu0 %v4446_v29  ;;  %v4439_v29 = vld [vmem:[%s9270_s10 + $0x20] sm:$0xff] }
 0x50c   : > { %v8517_v12 = vpop.f32.mrf.mxu2 }
 0x50d   : > { %v8519_v27 = vpop.f32.mrf.mxu3  ;;  %v8558_v7 = vpop.f32.mrf.mxu0 }
 0x511   : > { %5909 = vmatmul.msk.f32.gmra.mxu2 %vm442_vm4, %v8295_v57  ;;  %v4445_v57 = vld [vmem:[%s9270_s10 + $0x50] sm:$0xff] }
 0x512   : > { %5929 = vmatmul.msk.f32.gmra.mxu3 %vm442_vm4, %v8317_v16  ;;  %4476 = vmatpush.msra.mxu0 %v4445_v57  ;;  %v8563_v4 = vpop.f32.mrf.mxu1  ;;  %v5971_v57 = vld [vmem:[%s9270_s10 + $0x118] sm:$0xff] }
 0x513   : > { %4663 = vmatpush.msrb.mxu2 %v5971_v57  ;;  %v5968_v57 = vld [vmem:[%s9270_s10 + $0x100] sm:$0xff] }
 0x514   : > { %v8527_v39 = vpop.f32.mrf.mxu2  ;;  %4477 = vmatpush.msra.mxu0 %v4444_v15 }
 0x515   : > { %v8529_v28 = vpop.f32.mrf.mxu3  ;;  %v8572_v35 = vpop.f32.mrf.mxu0 }
 0x516   : > { %4478 = vmatpush.msra.mxu0 %v4443_v56  ;;  %v5951_v56 = vld [vmem:[%s9270_s10 + $0xb8] sm:$0xff] }
 0x517   : > { %4569 = vmatpush.msrb.mxu1 %v5951_v56 }
 0x518   : > { %4479 = vmatpush.msra.mxu0 %v4442_v13  ;;  %v5970_v13 = vld [vmem:[%s9270_s10 + $0x110] sm:$0xff] }
 0x519   : > { %5910 = vmatmul.msk.f32.gmra.mxu2 %vm442_vm4, %v3926_v34 }
 0x51a   : > { %5930 = vmatmul.msk.f32.gmra.mxu3 %vm442_vm4, %v4020_v21  ;;  %v8574_v34 = vpop.f32.mrf.mxu1  ;;  %v4441_v21 = vld [vmem:[%s9270_s10 + $0x30] sm:$0xff]  ;;  %4664 = vmatpush.msrb.mxu2 %v5970_v13  ;;  %v4438_v13 = vld [vmem:[%s9270_s10 + $0x18] sm:$0xff] }
 0x51b   : > { %4480 = vmatpush.msra.mxu0 %v4441_v21  ;;  %v5950_v21 = vld [vmem:[%s9270_s10 + $0xb0] sm:$0xff] }
 0x51c   : > { %v8543_v16 = vpop.f32.mrf.mxu2  ;;  %4570 = vmatpush.msrb.mxu1 %v5950_v21  ;;  %v5948_v21 = vld [vmem:[%s9270_s10 + $0xa0] sm:$0xff] }
 0x51d   : > { %v8545_v18 = vpop.f32.mrf.mxu3  ;;  %4481 = vmatpush.msra.mxu0 %v4440_v54  ;;  %v8586_v9 = vpop.f32.mrf.mxu0  ;;  %v5969_v54 = vld [vmem:[%s9270_s10 + $0x108] sm:$0xff] }
 0x51e   : > { %9274 = vst [vmem:[#allocation9_spill] sm:$0xff] %v8545_v18  ;;  %4665 = vmatpush.msrb.mxu2 %v5969_v54  ;;  %v5967_v54 = vld [vmem:[%s9270_s10 + $0xf8] sm:$0xff]  ;;  %v5944_v18 = vld [vmem:[%s9270_s10 + $0x80] sm:$0xff] }
 0x51f   : > { %4482 = vmatpush.msra.mxu0 %v4439_v29  ;;  %v5949_v29 = vld [vmem:[%s9270_s10 + $0xa8] sm:$0xff] }
 0x520   : > { %4571 = vmatpush.msrb.mxu1 %v5949_v29  ;;  %4666 = vmatpush.msrb.mxu2 %v5968_v57  ;;  %v5947_v29 = vld [vmem:[%s9270_s10 + $0x98] sm:$0xff]  ;;  %v5966_v57 = vld [vmem:[%s9270_s10 + $0xf0] sm:$0xff] }
 0x521   : > { %5911 = vmatmul.msk.f32.gmra.mxu2 %vm442_vm4, %v4209_v26  ;;  %4483 = vmatpush.msra.mxu0 %v4438_v13  ;;  %v4437_v13 = vld [vmem:[%s9270_s10 + $0x10] sm:$0xff] }
 0x522   : > { %5931 = vmatmul.msk.f32.gmra.mxu3 %vm442_vm4, %v4303_v6  ;;  %v8598_v15 = vpop.f32.mrf.mxu1  ;;  %4572 = vmatpush.msrb.mxu1 %v5948_v21  ;;  %v5946_v21 = vld [vmem:[%s9270_s10 + $0x90] sm:$0xff] }
 0x523   : > { %9277 = vst [vmem:[#allocation12_spill] sm:$0xff] %v8598_v15  ;;  %4667 = vmatpush.msrb.mxu2 %v5967_v54  ;;  %v5965_v54 = vld [vmem:[%s9270_s10 + $0xe8] sm:$0xff]  ;;  %4484 = vmatpush.msra.mxu0 %v4437_v13  ;;  %v3348_v13 = vadd.f32 %v8356_v23, %v8339_v47  ;;  %v5988_v47 = vld [vmem:[%s9270_s10 + $0x160] sm:$0xff] }
 0x524   : > { %v8554_v41 = vpop.f32.mrf.mxu2  ;;  %4573 = vmatpush.msrb.mxu1 %v5947_v29  ;;  %v5945_v29 = vld [vmem:[%s9270_s10 + $0x88] sm:$0xff] }
 0x525   : > { %9275 = vst [vmem:[#allocation10_spill] sm:$0xff] %v8554_v41  ;;  %v8556_v55 = vpop.f32.mrf.mxu3  ;;  %v8618_v56 = vpop.f32.mrf.mxu0  ;;  %4668 = vmatpush.msrb.mxu2 %v5966_v57  ;;  %v5964_v57 = vld [vmem:[%s9270_s10 + $0xe0] sm:$0xff] }
 0x526   : > { %9276 = vst [vmem:[#allocation11_spill] sm:$0xff] %v8556_v55  ;;  %4574 = vmatpush.msrb.mxu1 %v5946_v21  ;;  %v4436_v21 = vld [vmem:[%s9270_s10 + $0x8] sm:$0xff] }
 0x527   : > { %9278 = vst [vmem:[#allocation13_spill] sm:$0xff] %v8618_v56  ;;  %v5991_v56 = vld [vmem:[%s9270_s10 + $0x178] sm:$0xff]  ;;  %4669 = vmatpush.msrb.mxu2 %v5965_v54  ;;  %4485 = vmatpush.msra.mxu0 %v4436_v21  ;;  %v3442_v21 = vadd.f32 %v8371_v20, %v3348_v13  ;;  %v5941_v20 = vld [vmem:[%s9270_s10 + $0x68] sm:$0xff]  ;;  %v5960_v13 = vld [vmem:[%s9270_s10 + $0xc0] sm:$0xff] }
 0x528   : > { %4757 = vmatpush.msra.mxu3 %v5991_v56  ;;  %v5990_v56 = vld [vmem:[%s9270_s10 + $0x170] sm:$0xff]  ;;  %4575 = vmatpush.msrb.mxu1 %v5945_v29  ;;  %v5963_v54 = vld [vmem:[%s9270_s10 + $0xd8] sm:$0xff] }
 0x529   : > { %4670 = vmatpush.msrb.mxu2 %v5964_v57  ;;  %v5962_v57 = vld [vmem:[%s9270_s10 + $0xd0] sm:$0xff]  ;;  %v3536_v15 = vadd.f32 %v8471_v61, %v3442_v21  ;;  %v3349_v61 = vadd.f32 %v8385_v43, %v8358_v30  ;;  %v5940_v21 = vld [vmem:[%s9270_s10 + $0x60] sm:$0xff] }
 0x52a   : > { %v8642_v42 = vpop.f32.mrf.mxu1  ;;  %4758 = vmatpush.msra.mxu3 %v5990_v56  ;;  %4576 = vmatpush.msrb.mxu1 %v5944_v18  ;;  %v5987_v18 = vld [vmem:[%s9270_s10 + $0x158] sm:$0xff]  ;;  %v4427_v30 = vld [vmem:[#allocation7] sm:$0xff] }
 0x52b   : > { %9279 = vst [vmem:[#allocation14_spill] sm:$0xff] %v8642_v42  ;;  %v5989_v42 = vld [vmem:[%s9270_s10 + $0x168] sm:$0xff]  ;;  %4671 = vmatpush.msrb.mxu2 %v5963_v54  ;;  %v5942_v54 = vld [vmem:[%s9270_s10 + $0x70] sm:$0xff] }
 0x52c   : > { %v8568_v3 = vpop.f32.mrf.mxu2  ;;  %4759 = vmatpush.msra.mxu3 %v5989_v42  ;;  %v5943_v42 = vld [vmem:[%s9270_s10 + $0x78] sm:$0xff]  ;;  %v4520_v43 = vld [vmem:[#allocation7 + $0x1] sm:$0xff] }
 0x52d   : > { %v8570_v51 = vpop.f32.mrf.mxu3  ;;  %v8683_v23 = vpop.f32.mrf.mxu0  ;;  %4577 = vmatpush.msrb.mxu1 %v5943_v42  ;;  %4672 = vmatpush.msrb.mxu2 %v5962_v57  ;;  %v5985_v57 = vld [vmem:[%s9270_s10 + $0x148] sm:$0xff] }
 0x52e   : > { %9280 = vst [vmem:[#allocation15_spill] sm:$0xff] %v8683_v23  ;;  %4760 = vmatpush.msra.mxu3 %v5988_v47  ;;  %v5961_v47 = vld [vmem:[%s9270_s10 + $0xc8] sm:$0xff]  ;;  %v5986_v23 = vld [vmem:[%s9270_s10 + $0x150] sm:$0xff] }
 0x52f   : > { %4578 = vmatpush.msrb.mxu1 %v5942_v54  ;;  %4673 = vmatpush.msrb.mxu2 %v5961_v47  ;;  %v5984_v54 = vld [vmem:[%s9270_s10 + $0x140] sm:$0xff] }
 0x530   : > { %4761 = vmatpush.msra.mxu3 %v5987_v18  ;;  %v4614_v18 = vld [vmem:[#allocation7 + $0x2] sm:$0xff] }
 0x531   : > { %4579 = vmatpush.msrb.mxu1 %v5941_v20  ;;  %4674 = vmatpush.msrb.mxu2 %v5960_v13  ;;  %v3629_v13 = vadd.f32 %v8473_v40, %v3536_v15 }
 0x532   : > { %v8705_v42 = vpop.f32.mrf.mxu1  ;;  %4762 = vmatpush.msra.mxu3 %v5986_v23  ;;  %v4435_v23 = vld [vmem:[%s9270_s10] sm:$0xff]  ;;  %5972 = vmatmul.msk.f32.vlgmr.msrb.gmra.mxu2 %vm442_vm4, %v4614_v18  ;;  %v5982_v18 = vld [vmem:[%s9270_s10 + $0x130] sm:$0xff] }
 0x533   : > { %9281 = vst [vmem:[#allocation16_spill] sm:$0xff] %v8705_v42  ;;  %4486 = vmatpush.msra.mxu0 %v4435_v23  ;;  %4580 = vmatpush.msrb.mxu1 %v5940_v21  ;;  %v3443_v42 = vadd.f32 %v8401_v49, %v3349_v61  ;;  %v3723_v40 = vadd.f32 %v8509_v0, %v3629_v13  ;;  %v5981_v23 = vld [vmem:[%s9270_s10 + $0x128] sm:$0xff]  ;;  %v5980_v49 = vld [vmem:[%s9270_s10 + $0x120] sm:$0xff]  ;;  %v6010_v0 = vld [vmem:[%s9270_s10 + $0x1d0] sm:$0xff] }
 0x534   : > { %v8579_v60 = vpop.f32.mrf.mxu2  ;;  %4763 = vmatpush.msra.mxu3 %v5985_v57  ;;  %v5983_v57 = vld [vmem:[%s9270_s10 + $0x138] sm:$0xff]  ;;  %5932 = vmatmul.msk.f32.vlgmr.msra.gmra.mxu0 %vm442_vm4, %v4427_v30  ;;  %v3350_v21 = vadd.f32 %v8420_v38, %v8383_v46 }
 0x535   : > { %v8581_v36 = vpop.f32.mrf.mxu3  ;;  %5952 = vmatmul.msk.f32.vlgmr.msrb.gmra.mxu1 %vm442_vm4, %v4520_v43  ;;  %v3537_v15 = vadd.f32 %v8483_v5, %v3443_v42  ;;  %v6011_v5 = vld [vmem:[%s9270_s10 + $0x1d8] sm:$0xff]  ;;  %v3817_v46 = vadd.f32 %v8515_v22, %v3723_v40 }
 0x536   : > { %4764 = vmatpush.msra.mxu3 %v5984_v54  ;;  %4851 = vmatpush.msrb.mxu0 %v6011_v5  ;;  %v3444_v42 = vadd.f32 %v8423_v58, %v3350_v21  ;;  %v6009_v58 = vld [vmem:[%s9270_s10 + $0x1c8] sm:$0xff]  ;;  %v3352_v21 = vadd.f32 %v8451_v31, %v8425_v8 }
 0x537   : > { %v3630_v38 = vadd.f32 %v8485_v19, %v3537_v15  ;;  %v3911_v43 = vadd.f32 %v8568_v3, %v3817_v46 }
 0x538   : > { %4765 = vmatpush.msra.mxu3 %v5983_v57  ;;  %4852 = vmatpush.msrb.mxu0 %v6010_v0  ;;  %v3538_v57 = vadd.f32 %v8493_v1, %v3444_v42  ;;  %v3446_v8 = vadd.f32 %v8459_v52, %v3352_v21  ;;  %v6004_v21 = vld [vmem:[%s9270_s10 + $0x1a0] sm:$0xff] }
 0x539   : > { %v3724_v13 = vadd.f32 %v8521_v2, %v3630_v38 }
 0x53a   : > { %4766 = vmatpush.msra.mxu3 %v5982_v18  ;;  %v4170_v54 = vpop.f32.mrf.mxu1  ;;  %v3631_v2 = vadd.f32 %v8495_v24, %v3538_v57  ;;  %4853 = vmatpush.msrb.mxu0 %v6009_v58  ;;  %v3540_v38 = vadd.f32 %v8517_v12, %v3446_v8  ;;  %v6006_v57 = vld [vmem:[%s9270_s10 + $0x1b0] sm:$0xff]  ;;  %v3355_v8 = vadd.f32 %v8497_v14, %v8462_v10  ;;  %v6003_v10 = vld [vmem:[%s9270_s10 + $0x198] sm:$0xff]  ;;  %v6028_v14 = vld [vmem:[%s9270_s10 + $0x220] sm:$0xff] }
 0x53b   : > { %v3818_v3 = vadd.f32 %v8531_v17, %v3724_v13 }
 0x53c   : > { %v8594_v26 = vpop.f32.mrf.mxu2  ;;  %4767 = vmatpush.msra.mxu3 %v5981_v23  ;;  %v3351_v23 = vadd.f32 %v8435_v33, %v8404_v53  ;;  %v3725_v33 = vadd.f32 %v8538_v37, %v3631_v2  ;;  %v3633_v12 = vadd.f32 %v8519_v27, %v3540_v38 }
 0x53d   : > { %v8596_v6 = vpop.f32.mrf.mxu3  ;;  %v3912_v53 = vadd.f32 %v8579_v60, %v3818_v3  ;;  %v6007_v60 = vld [vmem:[%s9270_s10 + $0x1b8] sm:$0xff] }
 0x53e   : > { %4768 = vmatpush.msra.mxu3 %v5980_v49  ;;  %v3445_v1 = vadd.f32 %v8440_v32, %v3351_v23  ;;  %v6008_v32 = vld [vmem:[%s9270_s10 + $0x1c0] sm:$0xff]  ;;  %v3819_v37 = vadd.f32 %v8547_v44, %v3725_v33  ;;  %v3353_v44 = vadd.f32 %v8464_v11, %v8438_v45  ;;  %v3727_v3 = vadd.f32 %v8572_v35, %v3633_v12 }
 0x53f   : > { %v4006_v5 = vadd.f32 %v8581_v36, %v3912_v53  ;;  %4854 = vmatpush.msrb.mxu0 %v6008_v32  ;;  %v6030_v32 = vld [vmem:[%s9270_s10 + $0x230] sm:$0xff] }
 0x540   : > { %v3913_v36 = vadd.f32 %v8594_v26, %v3819_v37  ;;  %v3447_v45 = vadd.f32 %v8475_v48, %v3353_v44  ;;  %v9284_v44 = vld [vmem:[#allocation12_spill] sm:$0xff] }
 0x541   : > { %4855 = vmatpush.msrb.mxu0 %v6007_v60  ;;  %v6050_v60 = vld [vmem:[%s9270_s10 + $0x290] sm:$0xff] }
 0x542   : > { %v4173_v40 = vpop.f32.mrf.mxu1  ;;  %v3541_v2 = vadd.f32 %v8527_v39, %v3447_v45 }
 0x543   : > { %4856 = vmatpush.msrb.mxu0 %v6006_v57  ;;  %v6027_v57 = vld [vmem:[%s9270_s10 + $0x218] sm:$0xff] }
 0x544   : > { %v8629_v55 = vpop.f32.mrf.mxu2  ;;  %v3634_v39 = vadd.f32 %v8529_v28, %v3541_v2  ;;  %v6046_v2 = vld [vmem:[%s9270_s10 + $0x270] sm:$0xff] }
 0x545   : > { %v8631_v41 = vpop.f32.mrf.mxu3 }
 0x546   : > { %v3728_v37 = vadd.f32 %v8586_v9, %v3634_v39 }
 0x54c   : > { %v8676_v56 = vpop.f32.mrf.mxu2 }
 0x54d   : > { %v8678_v29 = vpop.f32.mrf.mxu3 }
 0x554   : > { %v8727_v47 = vpop.f32.mrf.mxu2 }
 0x555   : > { %v8729_v20 = vpop.f32.mrf.mxu3 }
 0x556   : > { %9282 = vst [vmem:[#allocation17_spill] sm:$0xff] %v8729_v20  ;;  %v4075_v20 = vpop.f32.mrf.mxu0 }
 0x55c   : > { %v8752_v61 = vpop.f32.mrf.mxu2 }
 0x55d   : > { %v8754_v30 = vpop.f32.mrf.mxu3 }
 0x55e   : > { %9283 = vst [vmem:[#allocation18_spill] sm:$0xff] %v8754_v30  ;;  %v4078_v18 = vpop.f32.mrf.mxu0  ;;  %v4005_v30 = vadd.f32 %v8570_v51, %v3911_v43  ;;  %v3539_v51 = vadd.f32 %v8505_v25, %v3445_v1  ;;  %v4007_v43 = vadd.f32 %v8596_v6, %v3913_v36 }
 0x55f   : > { %v4100_v31 = vadd.f32 %v4078_v18, %v4006_v5 }
 0x560   : > { %v4099_v15 = vadd.f32 %v4075_v20, %v4005_v30  ;;  %v3632_v25 = vadd.f32 %v8507_v59, %v3539_v51 }
 0x561   : > { %v4195_v59 = vadd.f32 %v4173_v40, %v4100_v31 }
 0x562   : > { %v4194_v49 = vadd.f32 %v4170_v54, %v4099_v15  ;;  %v4176_v54 = vpop.f32.mrf.mxu1  ;;  %v3726_v46 = vadd.f32 %v8558_v7, %v3632_v25 }
 0x564   : > { %v8771_v22 = vpop.f32.mrf.mxu2  ;;  %v3820_v7 = vadd.f32 %v8563_v4, %v3726_v46  ;;  %v3354_v4 = vadd.f32 %v8481_v62, %v8453_v50  ;;  %v6005_v50 = vld [vmem:[%s9270_s10 + $0x1a8] sm:$0xff]  ;;  %v3821_v62 = vadd.f32 %v8574_v34, %v3727_v3  ;;  %v6051_v34 = vld [vmem:[%s9270_s10 + $0x298] sm:$0xff]  ;;  %v6070_v3 = vld [vmem:[%s9270_s10 + $0x2f0] sm:$0xff] }
 0x565   : > { %v8773_v19 = vpop.f32.mrf.mxu3  ;;  %4857 = vmatpush.msrb.mxu0 %v6005_v50  ;;  %5040 = vmatpush.msra.mxu2 %v6051_v34  ;;  %v9289_v50 = vld [vmem:[#allocation17_spill] sm:$0xff] }
 0x566   : > { %v4081_v17 = vpop.f32.mrf.mxu0  ;;  %v3914_v6 = vadd.f32 %v8629_v55, %v3820_v7  ;;  %v3448_v28 = vadd.f32 %v8487_v63, %v3354_v4  ;;  %v9286_v7 = vld [vmem:[#allocation8_spill] sm:$0xff] }
 0x567   : > { %v4101_v11 = vadd.f32 %v4081_v17, %v4007_v43  ;;  %4858 = vmatpush.msrb.mxu0 %v6004_v21  ;;  %5041 = vmatpush.msra.mxu2 %v6050_v60  ;;  %v9285_v43 = vld [vmem:[#allocation9_spill] sm:$0xff]  ;;  %v3449_v12 = vadd.f32 %v9286_v7, %v3355_v8  ;;  %v6000_v8 = vld [vmem:[%s9270_s10 + $0x180] sm:$0xff] }
 0x568   : > { %v4008_v15 = vadd.f32 %v8631_v41, %v3914_v6  ;;  %v3542_v63 = vadd.f32 %v8543_v16, %v3448_v28 }
 0x569   : > { %v4196_v27 = vadd.f32 %v4176_v54, %v4101_v11  ;;  %4859 = vmatpush.msrb.mxu0 %v6003_v10  ;;  %v9292_v10 = vld [vmem:[#allocation15_spill] sm:$0xff] }
 0x56a   : > { %v4179_v40 = vpop.f32.mrf.mxu1 }
 0x56c   : > { %v4264_v0 = vpop.f32.mrf.mxu2 }
 0x56d   : > { %v4358_v24 = vpop.f32.mrf.mxu3  ;;  %v4288_v20 = vadd.f32 %v4264_v0, %v4194_v49  ;;  %v6031_v49 = vld [vmem:[%s9270_s10 + $0x238] sm:$0xff]  ;;  %v3915_v0 = vadd.f32 %v8676_v56, %v3821_v62  ;;  %v6029_v56 = vld [vmem:[%s9270_s10 + $0x228] sm:$0xff] }
 0x56e   : > { %v4084_v18 = vpop.f32.mrf.mxu0  ;;  %4945 = vmatpush.msra.mxu1 %v6031_v49 }
 0x56f   : > { %v4382_v30 = vadd.f32 %v4358_v24, %v4288_v20  ;;  %v4102_v17 = vadd.f32 %v4084_v18, %v4008_v15  ;;  %v6049_v20 = vld [vmem:[%s9270_s10 + $0x288] sm:$0xff]  ;;  %v4009_v9 = vadd.f32 %v8678_v29, %v3915_v0  ;;  %v6048_v29 = vld [vmem:[%s9270_s10 + $0x280] sm:$0xff]  ;;  %v6047_v18 = vld [vmem:[%s9270_s10 + $0x278] sm:$0xff] }
 0x570   : > { %4946 = vmatpush.msra.mxu1 %v6030_v32  ;;  %5042 = vmatpush.msra.mxu2 %v6049_v20  ;;  %v6067_v20 = vld [vmem:[%s9270_s10 + $0x2d8] sm:$0xff] }
 0x571   : > { %vm4390_vm8 = vcmp.ge.f32.partialorder %v4382_v30, 0.0  ;;  %v4398_v42 = vmul.f32 0.2, %v4382_v30  ;;  %v4197_v31 = vadd.f32 %v4179_v40, %v4102_v17  ;;  %v9287_v40 = vld [vmem:[#allocation13_spill] sm:$0xff]  ;;  %v9290_v17 = vld [vmem:[#allocation14_spill] sm:$0xff] }
 0x572   : > { %4947 = vmatpush.msra.mxu1 %v6029_v56  ;;  %v4182_v36 = vpop.f32.mrf.mxu1  ;;  %5043 = vmatpush.msra.mxu2 %v6048_v29  ;;  %v6022_v29 = vld [vmem:[%s9270_s10 + $0x1f0] sm:$0xff] }
 0x573   : > { %v4406_v13 = vsel %vm4390_vm8, %v4382_v30, %v4398_v42 }
 0x574   : > { %4415 = vst.msk [vmem:[#allocation7 + $0x11] sm:$0xff] %vm442_vm4, %v4406_v13  ;;  %v4267_v52 = vpop.f32.mrf.mxu2  ;;  %v3635_v13 = vadd.f32 %v9285_v43, %v3542_v63  ;;  %4948 = vmatpush.msra.mxu1 %v6028_v14  ;;  %5044 = vmatpush.msra.mxu2 %v6047_v18  ;;  %v6044_v63 = vld [vmem:[%s9270_s10 + $0x260] sm:$0xff] }
 0x575   : > { %v4361_v26 = vpop.f32.mrf.mxu3  ;;  %v4289_v23 = vadd.f32 %v4267_v52, %v4195_v59  ;;  %v3822_v59 = vadd.f32 %v9284_v44, %v3728_v37  ;;  %v6024_v37 = vld [vmem:[%s9270_s10 + $0x200] sm:$0xff]  ;;  %v6042_v44 = vld [vmem:[%s9270_s10 + $0x250] sm:$0xff] }
 0x576   : > { %v4087_v5 = vpop.f32.mrf.mxu0  ;;  %4949 = vmatpush.msra.mxu1 %v6027_v57  ;;  %5045 = vmatpush.msra.mxu2 %v6046_v2  ;;  %v6041_v2 = vld [vmem:[%s9270_s10 + $0x248] sm:$0xff] }
 0x577   : > { %v4383_v58 = vadd.f32 %v4361_v26, %v4289_v23  ;;  %v6002_v26 = vld [vmem:[%s9270_s10 + $0x190] sm:$0xff]  ;;  %v6071_v23 = vld [vmem:[%s9270_s10 + $0x2f8] sm:$0xff]  ;;  %v4103_v45 = vadd.f32 %v4087_v5, %v4009_v9  ;;  %v3916_v11 = vadd.f32 %v8727_v47, %v3822_v59  ;;  %v6001_v5 = vld [vmem:[%s9270_s10 + $0x188] sm:$0xff] }
 0x578   : > { %5134 = vmatpush.msrb.mxu3 %v6071_v23  ;;  %4860 = vmatpush.msrb.mxu0 %v6002_v26  ;;  %v9288_v47 = vld [vmem:[#allocation10_spill] sm:$0xff] }
 0x579   : > { %vm4391_vm9 = vcmp.ge.f32.partialorder %v4383_v58, 0.0  ;;  %v4399_v1 = vmul.f32 0.2, %v4383_v58  ;;  %v3543_v4 = vadd.f32 %v9288_v47, %v3449_v12  ;;  %v4010_v62 = vadd.f32 %v9289_v50, %v3916_v11  ;;  %v9294_v11 = vld [vmem:[#allocation16_spill] sm:$0xff]  ;;  %v6090_v47 = vld [vmem:[%s9270_s10 + $0x350] sm:$0xff] }
 0x57a   : > { %5135 = vmatpush.msrb.mxu3 %v6070_v3  ;;  %v4185_v56 = vpop.f32.mrf.mxu1  ;;  %4861 = vmatpush.msrb.mxu0 %v6001_v5  ;;  %v6021_v3 = vld [vmem:[%s9270_s10 + $0x1e8] sm:$0xff]  ;;  %v6062_v50 = vld [vmem:[%s9270_s10 + $0x2b0] sm:$0xff] }
 0x57b   : > { %v4407_v53 = vsel %vm4391_vm9, %v4383_v58, %v4399_v1  ;;  %v4428_v33 = vld [vmem:[#allocation7 + $0x10] sm:$0xff]  ;;  %v3729_v1 = vadd.f32 %v9287_v40, %v3635_v13  ;;  %v6091_v40 = vld [vmem:[%s9270_s10 + $0x358] sm:$0xff] }
 0x57c   : > { %v8815_v48 = vld [vmem:[#allocation7 + $0x11] sm:$0xff]  ;;  %4416 = vst.msk [vmem:[#allocation7 + $0x21] sm:$0xff] %vm442_vm4, %v4407_v53  ;;  %v4270_v55 = vpop.f32.mrf.mxu2  ;;  %5933 = vmatmul.msk.f32.gmra.mxu0 %vm442_vm4, %v4428_v33  ;;  %5992 = vmatmul.msk.f32.vlgmr.msra.gmra.mxu3 %vm442_vm4, %v4428_v33  ;;  %v6069_v53 = vld [vmem:[%s9270_s10 + $0x2e8] sm:$0xff] }
 0x57d   : > { %v8817_v51 = vld [vmem:[#allocation7 + $0x12] sm:$0xff]  ;;  %v4364_v35 = vpop.f32.mrf.mxu3  ;;  %5953 = vmatmul.msk.f32.gmra.mxu1 %vm442_vm4, %v8815_v48  ;;  %v4290_v41 = vadd.f32 %v4270_v55, %v4196_v27  ;;  %v6025_v33 = vld [vmem:[%s9270_s10 + $0x208] sm:$0xff]  ;;  %5136 = vmatpush.msrb.mxu3 %v6069_v53  ;;  %v3823_v0 = vadd.f32 %v9290_v17, %v3729_v1  ;;  %v6064_v1 = vld [vmem:[%s9270_s10 + $0x2c0] sm:$0xff] }
 0x57e   : > { %5973 = vmatmul.msk.f32.gmra.mxu2 %vm442_vm4, %v8817_v51  ;;  %v6026_v58 = vld [vmem:[%s9270_s10 + $0x210] sm:$0xff]  ;;  %v4090_v27 = vpop.f32.mrf.mxu0  ;;  %v6045_v55 = vld [vmem:[%s9270_s10 + $0x268] sm:$0xff]  ;;  %4862 = vmatpush.msrb.mxu0 %v6000_v8  ;;  %v6020_v53 = vld [vmem:[%s9270_s10 + $0x1e0] sm:$0xff] }
 0x57f   : > { %v4384_v24 = vadd.f32 %v4364_v35, %v4290_v41  ;;  %4950 = vmatpush.msra.mxu1 %v6026_v58  ;;  %v4198_v35 = vadd.f32 %v4182_v36, %v4103_v45  ;;  %5046 = vmatpush.msra.mxu2 %v6045_v55  ;;  %v3917_v9 = vadd.f32 %v8752_v61, %v3823_v0  ;;  %v9293_v13 = vld [vmem:[#allocation18_spill] sm:$0xff]  ;;  %v6065_v45 = vld [vmem:[%s9270_s10 + $0x2c8] sm:$0xff] }
 0x580   : > { %5228 = vmatpush.msra.mxu0 %v6091_v40 }
 0x581   : > { %vm4392_vm10 = vcmp.ge.f32.partialorder %v4384_v24, 0.0  ;;  %v4400_v25 = vmul.f32 0.2, %v4384_v24  ;;  %4951 = vmatpush.msra.mxu1 %v6025_v33  ;;  %5047 = vmatpush.msra.mxu2 %v6044_v63  ;;  %v6040_v33 = vld [vmem:[%s9270_s10 + $0x240] sm:$0xff] }
 0x582   : > { %v4188_v55 = vpop.f32.mrf.mxu1  ;;  %5229 = vmatpush.msra.mxu0 %v6090_v47 }
 0x583   : > { %v4408_v16 = vsel %vm4392_vm10, %v4384_v24, %v4400_v25  ;;  %v8859_v54 = vld [vmem:[#allocation7 + $0x20] sm:$0xff]  ;;  %v9291_v24 = vld [vmem:[#allocation11_spill] sm:$0xff]  ;;  %4952 = vmatpush.msra.mxu1 %v6024_v37 }
 0x584   : > { %v8861_v30 = vld [vmem:[#allocation7 + $0x21] sm:$0xff]  ;;  %4417 = vst.msk [vmem:[#allocation7 + $0x31] sm:$0xff] %vm442_vm4, %v4408_v16  ;;  %v4273_v38 = vpop.f32.mrf.mxu2  ;;  %5934 = vmatmul.msk.f32.gmra.mxu0 %vm442_vm4, %v8859_v54  ;;  %5993 = vmatmul.msk.f32.gmra.mxu3 %vm442_vm4, %v8859_v54  ;;  %v3636_v32 = vadd.f32 %v9291_v24, %v3543_v4  ;;  %v6023_v16 = vld [vmem:[%s9270_s10 + $0x1f8] sm:$0xff] }
 0x585   : > { %v8863_v46 = vld [vmem:[#allocation7 + $0x22] sm:$0xff]  ;;  %v4367_v42 = vpop.f32.mrf.mxu3  ;;  %5954 = vmatmul.msk.f32.gmra.mxu1 %vm442_vm4, %v8861_v30  ;;  %v4291_v52 = vadd.f32 %v4273_v38, %v4197_v31  ;;  %v4104_v31 = vadd.f32 %v4090_v27, %v4010_v62  ;;  %v6043_v38 = vld [vmem:[%s9270_s10 + $0x258] sm:$0xff] }
 0x586   : > { %5974 = vmatmul.msk.f32.gmra.mxu2 %vm442_vm4, %v8863_v46  ;;  %v6068_v25 = vld [vmem:[%s9270_s10 + $0x2e0] sm:$0xff]  ;;  %v3730_v14 = vadd.f32 %v9292_v10, %v3636_v32  ;;  %4953 = vmatpush.msra.mxu1 %v6023_v16  ;;  %v4093_v59 = vpop.f32.mrf.mxu0 }
 0x587   : > { %v4385_v6 = vadd.f32 %v4367_v42, %v4291_v52  ;;  %5137 = vmatpush.msrb.mxu3 %v6068_v25  ;;  %v6066_v42 = vld [vmem:[%s9270_s10 + $0x2d0] sm:$0xff]  ;;  %5048 = vmatpush.msra.mxu2 %v6043_v38  ;;  %v4199_v43 = vadd.f32 %v4185_v56, %v4104_v31  ;;  %v4011_v52 = vadd.f32 %v9293_v13, %v3917_v9  ;;  %v6060_v56 = vld [vmem:[%s9270_s10 + $0x2a0] sm:$0xff] }
 0x588   : > { %4954 = vmatpush.msra.mxu1 %v6022_v29  ;;  %v6087_v29 = vld [vmem:[%s9270_s10 + $0x338] sm:$0xff] }
 0x589   : > { %vm4393_vm11 = vcmp.ge.f32.partialorder %v4385_v6, 0.0  ;;  %v4401_v15 = vmul.f32 0.2, %v4385_v6  ;;  %5138 = vmatpush.msrb.mxu3 %v6067_v20  ;;  %5049 = vmatpush.msra.mxu2 %v6042_v44  ;;  %v4105_v4 = vadd.f32 %v4093_v59, %v4011_v52 }
 0x58a   : > { %4955 = vmatpush.msra.mxu1 %v6021_v3  ;;  %v4191_v20 = vpop.f32.mrf.mxu1 }
 0x58b   : > { %v4409_v39 = vsel %vm4393_vm11, %v4385_v6, %v4401_v15  ;;  %v8920_v41 = vld [vmem:[#allocation7 + $0x30] sm:$0xff]  ;;  %5139 = vmatpush.msrb.mxu3 %v6066_v42  ;;  %v3824_v6 = vadd.f32 %v9294_v11, %v3730_v14  ;;  %5050 = vmatpush.msra.mxu2 %v6041_v2  ;;  %v4200_v62 = vadd.f32 %v4188_v55, %v4105_v4  ;;  %v6084_v11 = vld [vmem:[%s9270_s10 + $0x320] sm:$0xff] }
 0x58c   : > { %v8922_v21 = vld [vmem:[#allocation7 + $0x31] sm:$0xff]  ;;  %4418 = vst.msk [vmem:[#allocation7 + $0x41] sm:$0xff] %vm442_vm4, %v4409_v39  ;;  %v4276_v34 = vpop.f32.mrf.mxu2  ;;  %5935 = vmatmul.msk.f32.gmra.mxu0 %vm442_vm4, %v8920_v41  ;;  %5994 = vmatmul.msk.f32.gmra.mxu3 %vm442_vm4, %v8920_v41 }
 0x58d   : > { %v8924_v49 = vld [vmem:[#allocation7 + $0x32] sm:$0xff]  ;;  %v4370_v28 = vpop.f32.mrf.mxu3  ;;  %5955 = vmatmul.msk.f32.gmra.mxu1 %vm442_vm4, %v8922_v21  ;;  %v4292_v60 = vadd.f32 %v4276_v34, %v4198_v35  ;;  %v3918_v27 = vadd.f32 %v8771_v22, %v3824_v6  ;;  %5140 = vmatpush.msrb.mxu3 %v6065_v45  ;;  %v6085_v45 = vld [vmem:[%s9270_s10 + $0x328] sm:$0xff] }
 0x58e   : > { %5975 = vmatmul.msk.f32.gmra.mxu2 %vm442_vm4, %v8924_v49  ;;  %v6063_v35 = vld [vmem:[%s9270_s10 + $0x2b8] sm:$0xff]  ;;  %4956 = vmatpush.msra.mxu1 %v6020_v53  ;;  %v4096_v37 = vpop.f32.mrf.mxu0 }
 0x58f   : > { %v4386_v36 = vadd.f32 %v4370_v28, %v4292_v60  ;;  %5141 = vmatpush.msrb.mxu3 %v6064_v1  ;;  %5051 = vmatpush.msra.mxu2 %v6040_v33  ;;  %v4012_v39 = vadd.f32 %v8773_v19, %v3918_v27  ;;  %v6061_v19 = vld [vmem:[%s9270_s10 + $0x2a8] sm:$0xff]  ;;  %v5092_v6 = vld [vmem:[#allocation7 + $0x91] sm:$0xff] }
 0x590   : > { %v6089_v60 = vld [vmem:[%s9270_s10 + $0x348] sm:$0xff] }
 0x591   : > { %vm4394_vm12 = vcmp.ge.f32.partialorder %v4386_v36, 0.0  ;;  %v4402_v61 = vmul.f32 0.2, %v4386_v36  ;;  %5142 = vmatpush.msrb.mxu3 %v6063_v35  ;;  %5230 = vmatpush.msra.mxu0 %v6089_v60  ;;  %v4106_v63 = vadd.f32 %v4096_v37, %v4012_v39 }
 0x593   : > { %v4410_v26 = vsel %vm4394_vm12, %v4386_v36, %v4402_v61  ;;  %v8973_v57 = vld [vmem:[#allocation7 + $0x40] sm:$0xff]  ;;  %5143 = vmatpush.msrb.mxu3 %v6062_v50  ;;  %v4201_v31 = vadd.f32 %v4191_v20, %v4106_v63 }
 0x594   : > { %v8975_v7 = vld [vmem:[#allocation7 + $0x41] sm:$0xff]  ;;  %4419 = vst.msk [vmem:[#allocation7 + $0x51] sm:$0xff] %vm442_vm4, %v4410_v26  ;;  %v4279_v18 = vpop.f32.mrf.mxu2  ;;  %5936 = vmatmul.msk.f32.gmra.mxu0 %vm442_vm4, %v8973_v57  ;;  %5995 = vmatmul.msk.f32.gmra.mxu3 %vm442_vm4, %v8973_v57 }
 0x595   : > { %v8977_v12 = vld [vmem:[#allocation7 + $0x42] sm:$0xff]  ;;  %v4373_v23 = vpop.f32.mrf.mxu3  ;;  %5956 = vmatmul.msk.f32.gmra.mxu1 %vm442_vm4, %v8975_v7  ;;  %v4293_v58 = vadd.f32 %v4279_v18, %v4199_v43  ;;  %5144 = vmatpush.msrb.mxu3 %v6061_v19  ;;  %v6086_v18 = vld [vmem:[%s9270_s10 + $0x330] sm:$0xff] }
 0x596   : > { %5976 = vmatmul.msk.f32.gmra.mxu2 %vm442_vm4, %v8977_v12  ;;  %v6088_v61 = vld [vmem:[%s9270_s10 + $0x340] sm:$0xff] }
 0x597   : > { %v4387_v15 = vadd.f32 %v4373_v23, %v4293_v58  ;;  %5145 = vmatpush.msrb.mxu3 %v6060_v56  ;;  %5231 = vmatpush.msra.mxu0 %v6088_v61 }
 0x599   : > { %vm4395_vm13 = vcmp.ge.f32.partialorder %v4387_v15, 0.0  ;;  %v4403_v22 = vmul.f32 0.2, %v4387_v15  ;;  %5232 = vmatpush.msra.mxu0 %v6087_v29 }
 0x59b   : > { %v4411_v34 = vsel %vm4395_vm13, %v4387_v15, %v4403_v22  ;;  %v9021_v28 = vld [vmem:[#allocation7 + $0x50] sm:$0xff]  ;;  %5233 = vmatpush.msra.mxu0 %v6086_v18 }
 0x59c   : > { %v9023_v5 = vld [vmem:[#allocation7 + $0x51] sm:$0xff]  ;;  %4420 = vst.msk [vmem:[#allocation7 + $0x61] sm:$0xff] %vm442_vm4, %v4411_v34  ;;  %v4282_v0 = vpop.f32.mrf.mxu2  ;;  %5937 = vmatmul.msk.f32.gmra.mxu0 %vm442_vm4, %v9021_v28  ;;  %5996 = vmatmul.msk.f32.gmra.mxu3 %vm442_vm4, %v9021_v28 }
 0x59d   : > { %v9025_v17 = vld [vmem:[#allocation7 + $0x52] sm:$0xff]  ;;  %v4376_v24 = vpop.f32.mrf.mxu3  ;;  %5957 = vmatmul.msk.f32.gmra.mxu1 %vm442_vm4, %v9023_v5  ;;  %v4294_v32 = vadd.f32 %v4282_v0, %v4200_v62  ;;  %5234 = vmatpush.msra.mxu0 %v6085_v45 }
 0x59e   : > { %5977 = vmatmul.msk.f32.gmra.mxu2 %vm442_vm4, %v9025_v17  ;;  %v5186_v22 = vld [vmem:[#allocation7 + $0x92] sm:$0xff] }
 0x59f   : > { %v4388_v25 = vadd.f32 %v4376_v24, %v4294_v32  ;;  %5235 = vmatpush.msra.mxu0 %v6084_v11 }
 0x5a1   : > { %vm4396_vm14 = vcmp.ge.f32.partialorder %v4388_v25, 0.0  ;;  %v4404_v8 = vmul.f32 0.2, %v4388_v25 }
 0x5a3   : > { %v4412_v9 = vsel %vm4396_vm14, %v4388_v25, %v4404_v8  ;;  %v4433_v36 = vld [vmem:[#allocation7 + $0x60] sm:$0xff] }
 0x5a4   : > { %v9045_v16 = vld [vmem:[#allocation7 + $0x61] sm:$0xff]  ;;  %4421 = vst.msk [vmem:[#allocation7 + $0x71] sm:$0xff] %vm442_vm4, %v4412_v9  ;;  %v4285_v42 = vpop.f32.mrf.mxu2  ;;  %5938 = vmatmul.msk.f32.gmra.mxu0 %vm442_vm4, %v4433_v36  ;;  %5997 = vmatmul.msk.f32.gmra.mxu3 %vm442_vm4, %v4433_v36 }
 0x5a5   : > { %v9047_v38 = vld [vmem:[#allocation7 + $0x62] sm:$0xff]  ;;  %5958 = vmatmul.msk.f32.gmra.mxu1 %vm442_vm4, %v9045_v16  ;;  %v4379_v10 = vpop.f32.mrf.mxu3  ;;  %v4295_v14 = vadd.f32 %v4285_v42, %v4201_v31 }
 0x5a6   : > { %5978 = vmatmul.msk.f32.gmra.mxu2 %vm442_vm4, %v9047_v38 }
 0x5a7   : > { %v4389_v44 = vadd.f32 %v4379_v10, %v4295_v14 }
 0x5a9   : > { %vm4397_vm5 = vcmp.ge.f32.partialorder %v4389_v44, 0.0  ;;  %v4405_v59 = vmul.f32 0.2, %v4389_v44 }
 0x5ab   : > { %v4413_v43 = vsel %vm4397_vm5, %v4389_v44, %v4405_v59  ;;  %v4434_v13 = vld [vmem:[#allocation7 + $0x70] sm:$0xff] }
 0x5ac   : > { %v4527_v52 = vld [vmem:[#allocation7 + $0x71] sm:$0xff]  ;;  %4422 = vst.msk [vmem:[#allocation7 + $0x81] sm:$0xff] %vm442_vm4, %v4413_v43  ;;  %5939 = vmatmul.msk.f32.gmra.mxu0 %vm442_vm4, %v4434_v13  ;;  %5998 = vmatmul.msk.f32.gmra.mxu3 %vm442_vm4, %v4434_v13 }
 0x5ad   : > { %v9062_v26 = vld [vmem:[#allocation7 + $0x72] sm:$0xff]  ;;  %5959 = vmatmul.msk.f32.gmra.mxu1 %vm442_vm4, %v4527_v52 }
 0x5ae   : > { %5979 = vmatmul.msk.f32.gmra.mxu2 %vm442_vm4, %v9062_v26 }
 0x5b2   : > { %v4582_v40 = vpop.f32.mrf.mxu1 }
 0x5b3   : > { %v4715_v23 = vld [vmem:[#allocation7 + $0x80] sm:$0xff] }
 0x5b4   : > { %6012 = vmatmul.msk.f32.vlgmr.msrb.gmra.mxu0 %vm442_vm4, %v8815_v48  ;;  %5999 = vmatmul.msk.f32.gmra.mxu3 %vm442_vm4, %v4715_v23  ;;  %v6083_v48 = vld [vmem:[%s9270_s10 + $0x318] sm:$0xff] }
 0x5b5   : > { %6032 = vmatmul.msk.f32.vlgmr.msra.gmra.mxu1 %vm442_vm4, %v8817_v51  ;;  %5236 = vmatpush.msra.mxu0 %v6083_v48  ;;  %v6082_v51 = vld [vmem:[%s9270_s10 + $0x310] sm:$0xff]  ;;  %v4676_v1 = vpop.f32.mrf.mxu2 }
 0x5b6   : > { %6052 = vmatmul.msk.f32.vlgmr.msra.gmra.mxu2 %vm442_vm4, %v8859_v54  ;;  %v6081_v54 = vld [vmem:[%s9270_s10 + $0x308] sm:$0xff] }
 0x5b7   : > { %5237 = vmatpush.msra.mxu0 %v6082_v51 }
 0x5b9   : > { %5238 = vmatpush.msra.mxu0 %v6081_v54 }
 0x5bc   : > { %6013 = vmatmul.msk.f32.gmra.mxu0 %vm442_vm4, %v8861_v30  ;;  %6072 = vmatmul.msk.f32.vlgmr.msrb.gmra.mxu3 %vm442_vm4, %v8861_v30  ;;  %v6080_v30 = vld [vmem:[%s9270_s10 + $0x300] sm:$0xff] }
 0x5bd   : > { %6033 = vmatmul.msk.f32.gmra.mxu1 %vm442_vm4, %v8863_v46  ;;  %5239 = vmatpush.msra.mxu0 %v6080_v30 }
 0x5be   : > { %6053 = vmatmul.msk.f32.gmra.mxu2 %vm442_vm4, %v8920_v41  ;;  %v4998_v41 = vld [vmem:[#allocation7 + $0x90] sm:$0xff] }
 0x5c4   : > { %6014 = vmatmul.msk.f32.gmra.mxu0 %vm442_vm4, %v8922_v21  ;;  %6073 = vmatmul.msk.f32.gmra.mxu3 %vm442_vm4, %v8922_v21  ;;  %v4809_v21 = vld [vmem:[#allocation7 + $0x81] sm:$0xff] }
 0x5c5   : > { %6034 = vmatmul.msk.f32.gmra.mxu1 %vm442_vm4, %v8924_v49 }
 0x5c6   : > { %6054 = vmatmul.msk.f32.gmra.mxu2 %vm442_vm4, %v8973_v57  ;;  %v4903_v57 = vld [vmem:[#allocation7 + $0x82] sm:$0xff] }
 0x5cc   : > { %6015 = vmatmul.msk.f32.gmra.mxu0 %vm442_vm4, %v8975_v7  ;;  %6074 = vmatmul.msk.f32.gmra.mxu3 %vm442_vm4, %v8975_v7  ;;  %v4488_v7 = vpop.f32.mrf.mxu0 }
 0x5cd   : > { %6035 = vmatmul.msk.f32.gmra.mxu1 %vm442_vm4, %v8977_v12 }
 0x5ce   : > { %6055 = vmatmul.msk.f32.gmra.mxu2 %vm442_vm4, %v9021_v28 }
 0x5d4   : > { %6016 = vmatmul.msk.f32.gmra.mxu0 %vm442_vm4, %v9023_v5  ;;  %6075 = vmatmul.msk.f32.gmra.mxu3 %vm442_vm4, %v9023_v5 }
 0x5d5   : > { %6036 = vmatmul.msk.f32.gmra.mxu1 %vm442_vm4, %v9025_v17 }
 0x5d6   : > { %6056 = vmatmul.msk.f32.gmra.mxu2 %vm442_vm4, %v4433_v36  ;;  %v9203_v36 = vld [vmem:[%s9271_s11] ss:$0 sm:$0xff] }
 0x5dc   : > { %6017 = vmatmul.msk.f32.gmra.mxu0 %vm442_vm4, %v9045_v16  ;;  %6076 = vmatmul.msk.f32.gmra.mxu3 %vm442_vm4, %v9045_v16 }
 0x5dd   : > { %6037 = vmatmul.msk.f32.gmra.mxu1 %vm442_vm4, %v9047_v38 }
 0x5de   : > { %6057 = vmatmul.msk.f32.gmra.mxu2 %vm442_vm4, %v4434_v13 }
 0x5e4   : > { %6018 = vmatmul.msk.f32.gmra.mxu0 %vm442_vm4, %v4527_v52  ;;  %6077 = vmatmul.msk.f32.gmra.mxu3 %vm442_vm4, %v4527_v52 }
 0x5e5   : > { %6038 = vmatmul.msk.f32.gmra.mxu1 %vm442_vm4, %v9062_v26 }
 0x5e6   : > { %6058 = vmatmul.msk.f32.gmra.mxu2 %vm442_vm4, %v4715_v23 }
 0x5ec   : > { %6019 = vmatmul.msk.f32.gmra.mxu0 %vm442_vm4, %v4809_v21  ;;  %6078 = vmatmul.msk.f32.gmra.mxu3 %vm442_vm4, %v4809_v21 }
 0x5ed   : > { %6039 = vmatmul.msk.f32.gmra.mxu1 %vm442_vm4, %v4903_v57 }
 0x5ee   : > { %6059 = vmatmul.msk.f32.gmra.mxu2 %vm442_vm4, %v4998_v41 }
 0x5f4   : > { %6092 = vmatmul.msk.f32.vlgmr.msra.gmra.mxu0 %vm442_vm4, %v8863_v46  ;;  %6079 = vmatmul.msk.f32.gmra.mxu3 %vm442_vm4, %v5092_v6 }
 0x5f9   : > { %v4491_v58 = vpop.f32.mrf.mxu0 }
 0x5fa   : > { %v4585_v46 = vpop.f32.mrf.mxu1  ;;  %v4513_v59 = vadd.f32 %v9203_v36, %v4491_v58 }
 0x5fc   : > { %6093 = vmatmul.msk.f32.gmra.mxu0 %vm442_vm4, %v8924_v49  ;;  %v4607_v45 = vadd.f32 %v4585_v46, %v4513_v59 }
 0x5ff   : > { %v4770_v47 = vpop.f32.mrf.mxu3 }
 0x601   : > { %v4494_v3 = vpop.f32.mrf.mxu0  ;;  %v4679_v27 = vpop.f32.mrf.mxu2 }
 0x602   : > { %v4701_v11 = vadd.f32 %v4679_v27, %v4607_v45  ;;  %v4514_v51 = vadd.f32 %v9203_v36, %v4494_v3 }
 0x604   : > { %6094 = vmatmul.msk.f32.gmra.mxu0 %vm442_vm4, %v8977_v12  ;;  %v4588_v12 = vpop.f32.mrf.mxu1 }
 0x605   : > { %v4608_v58 = vadd.f32 %v4588_v12, %v4514_v51 }
 0x607   : > { %v4773_v49 = vpop.f32.mrf.mxu3 }
 0x608   : > { %v4795_v54 = vadd.f32 %v4773_v49, %v4701_v11 }
 0x609   : > { %v9152_v2 = vpop.f32.mrf.mxu0  ;;  %v4682_v53 = vpop.f32.mrf.mxu2 }
 0x60a   : > { %v4515_v46 = vadd.f32 %v9203_v36, %v9152_v2 }
 0x60c   : > { %6095 = vmatmul.msk.f32.gmra.mxu0 %vm442_vm4, %v9025_v17  ;;  %v4591_v50 = vpop.f32.mrf.mxu1 }
 0x60f   : > { %v4776_v55 = vpop.f32.mrf.mxu3 }
 0x611   : > { %v9156_v4 = vpop.f32.mrf.mxu0  ;;  %v9169_v62 = vpop.f32.mrf.mxu2 }
 0x614   : > { %6096 = vmatmul.msk.f32.gmra.mxu0 %vm442_vm4, %v9047_v38  ;;  %v9174_v28 = vpop.f32.mrf.mxu1  ;;  %v4512_v38 = vadd.f32 %v9203_v36, %v4488_v7 }
 0x616   : > { %v4606_v61 = vadd.f32 %v4582_v40, %v4512_v38  ;;  %v4609_v38 = vadd.f32 %v4591_v50, %v4515_v46 }
 0x617   : > { %v9172_v39 = vpop.f32.mrf.mxu3 }
 0x618   : > { %v4700_v44 = vadd.f32 %v4676_v1, %v4606_v61  ;;  %v4703_v2 = vadd.f32 %v9169_v62, %v4609_v38 }
 0x619   : > { %v9160_v15 = vpop.f32.mrf.mxu0  ;;  %v9176_v5 = vpop.f32.mrf.mxu2 }
 0x61a   : > { %v4794_v43 = vadd.f32 %v4770_v47, %v4700_v44  ;;  %v4702_v47 = vadd.f32 %v4682_v53, %v4608_v58  ;;  %v4797_v61 = vadd.f32 %v9172_v39, %v4703_v2 }
 0x61c   : > { %6097 = vmatmul.msk.f32.gmra.mxu0 %vm442_vm4, %v9062_v26  ;;  %v9180_v24 = vpop.f32.mrf.mxu1  ;;  %v4796_v27 = vadd.f32 %v4776_v55, %v4702_v47 }
 0x61f   : > { %v9178_v17 = vpop.f32.mrf.mxu3 }
 0x621   : > { %v9164_v33 = vpop.f32.mrf.mxu0  ;;  %v9182_v32 = vpop.f32.mrf.mxu2 }
 0x624   : > { %6098 = vmatmul.msk.f32.gmra.mxu0 %vm442_vm4, %v4903_v57  ;;  %v9186_v37 = vpop.f32.mrf.mxu1 }
 0x627   : > { %v9184_v19 = vpop.f32.mrf.mxu3 }
 0x629   : > { %v9167_v35 = vpop.f32.mrf.mxu0  ;;  %v9188_v63 = vpop.f32.mrf.mxu2 }
 0x62c   : > { %6099 = vmatmul.msk.f32.gmra.mxu0 %vm442_vm4, %v5186_v22  ;;  %v9194_v8 = vpop.f32.mrf.mxu1 }
 0x62f   : > { %v9190_v56 = vpop.f32.mrf.mxu3 }
 0x631   : > { %v4864_v34 = vpop.f32.mrf.mxu0  ;;  %v9196_v31 = vpop.f32.mrf.mxu2 }
 0x632   : > { %v4888_v26 = vadd.f32 %v4864_v34, %v4794_v43 }
 0x634   : > { %v4958_v42 = vpop.f32.mrf.mxu1 }
 0x635   : > { %v4982_v48 = vadd.f32 %v4958_v42, %v4888_v26 }
 0x637   : > { %v9198_v9 = vpop.f32.mrf.mxu3 }
 0x639   : > { %v4867_v0 = vpop.f32.mrf.mxu0  ;;  %v5053_v10 = vpop.f32.mrf.mxu2 }
 0x63a   : > { %v5077_v30 = vadd.f32 %v5053_v10, %v4982_v48  ;;  %v4889_v41 = vadd.f32 %v4867_v0, %v4795_v54 }
 0x63c   : > { %v4961_v13 = vpop.f32.mrf.mxu1 }
 0x63d   : > { %v4983_v22 = vadd.f32 %v4961_v13, %v4889_v41 }
 0x63f   : > { %v5147_v14 = vpop.f32.mrf.mxu3 }
 0x640   : > { %v5171_v21 = vadd.f32 %v5147_v14, %v5077_v30  ;;  %v4516_v14 = vadd.f32 %v9203_v36, %v9156_v4  ;;  %v4517_v4 = vadd.f32 %v9203_v36, %v9160_v15  ;;  %v4518_v15 = vadd.f32 %v9203_v36, %v9164_v33 }
 0x641   : > { %v4870_v60 = vpop.f32.mrf.mxu0  ;;  %v5056_v52 = vpop.f32.mrf.mxu2  ;;  %v4519_v33 = vadd.f32 %v9203_v36, %v9167_v35 }
 0x642   : > { %v5078_v34 = vadd.f32 %v5056_v52, %v4983_v22  ;;  %v4890_v3 = vadd.f32 %v4870_v60, %v4796_v27  ;;  %v4610_v52 = vadd.f32 %v9174_v28, %v4516_v14  ;;  %v4611_v41 = vadd.f32 %v9180_v24, %v4517_v4 }
 0x643   : > { %v4612_v22 = vadd.f32 %v9186_v37, %v4518_v15  ;;  %v4613_v38 = vadd.f32 %v9194_v8, %v4519_v33 }
 0x644   : > { %v4964_v57 = vpop.f32.mrf.mxu1  ;;  %v4704_v62 = vadd.f32 %v9176_v5, %v4610_v52  ;;  %v4705_v5 = vadd.f32 %v9182_v32, %v4611_v41 }
 0x645   : > { %v4984_v55 = vadd.f32 %v4964_v57, %v4890_v3  ;;  %v4706_v32 = vadd.f32 %v9188_v63, %v4612_v22 }
 0x646   : > { %v4798_v39 = vadd.f32 %v9178_v17, %v4704_v62  ;;  %v4799_v17 = vadd.f32 %v9184_v19, %v4705_v5 }
 0x647   : > { %v5150_v18 = vpop.f32.mrf.mxu3  ;;  %v4800_v19 = vadd.f32 %v9190_v56, %v4706_v32 }
 0x648   : > { %v5172_v49 = vadd.f32 %v5150_v18, %v5078_v34 }
 0x649   : > { %v4873_v25 = vpop.f32.mrf.mxu0  ;;  %v5059_v7 = vpop.f32.mrf.mxu2 }
 0x64a   : > { %v5079_v44 = vadd.f32 %v5059_v7, %v4984_v55  ;;  %v4891_v59 = vadd.f32 %v4873_v25, %v4797_v61 }
 0x64c   : > { %v4967_v53 = vpop.f32.mrf.mxu1 }
 0x64d   : > { %v4985_v18 = vadd.f32 %v4967_v53, %v4891_v59 }
 0x64f   : > { %v5153_v1 = vpop.f32.mrf.mxu3 }
 0x650   : > { %v5173_v43 = vadd.f32 %v5153_v1, %v5079_v44 }
 0x651   : > { %v9192_v20 = vpop.f32.mrf.mxu0  ;;  %v5062_v10 = vpop.f32.mrf.mxu2 }
 0x652   : > { %v5080_v25 = vadd.f32 %v5062_v10, %v4985_v18  ;;  %v4892_v51 = vadd.f32 %v9192_v20, %v4798_v39 }
 0x654   : > { %v4970_v45 = vpop.f32.mrf.mxu1 }
 0x655   : > { %v4986_v57 = vadd.f32 %v4970_v45, %v4892_v51 }
 0x657   : > { %v5156_v60 = vpop.f32.mrf.mxu3 }
 0x658   : > { %v5174_v54 = vadd.f32 %v5156_v60, %v5080_v25 }
 0x659   : > { %v9205_v16 = vpop.f32.mrf.mxu0  ;;  %v5065_v11 = vpop.f32.mrf.mxu2 }
 0x65a   : > { %v5081_v7 = vadd.f32 %v5065_v11, %v4986_v57  ;;  %v4893_v58 = vadd.f32 %v9205_v16, %v4799_v17 }
 0x65f   : > { %v5159_v48 = vpop.f32.mrf.mxu3 }
 0x661   : > { %v9208_v29 = vpop.f32.mrf.mxu0  ;;  %v5068_v20 = vpop.f32.mrf.mxu2 }
 0x662   : > { %v4894_v16 = vadd.f32 %v9208_v29, %v4800_v19 }
 0x667   : > { %v5162_v1 = vpop.f32.mrf.mxu3 }
 0x669   : > { %v9211_v23 = vpop.f32.mrf.mxu0 }
 0x66f   : > { %v5165_v63 = vpop.f32.mrf.mxu3 }
 0x671   : > { %v5241_v6 = vpop.f32.mrf.mxu0 }
 0x672   : > { %v5265_v40 = vadd.f32 %v5241_v6, %v5171_v21  ;;  %v4973_v6 = vpop.f32.mrf.mxu1 }
 0x673   : > { %v4987_v27 = vadd.f32 %v4973_v6, %v4893_v58 }
 0x674   : > { %6132 = vtanh.f32 %v5265_v40  ;;  %v5175_v40 = vadd.f32 %v5159_v48, %v5081_v7 }
 0x675   : > { %v5082_v34 = vadd.f32 %v5068_v20, %v4987_v27 }
 0x677   : > { %v5168_v44 = vpop.f32.mrf.mxu3 }
 0x679   : > { %v5244_v12 = vpop.f32.mrf.mxu0 }
 0x67a   : > { %v6133_v0 = vpop.eup %6132  ;;  %v5266_v42 = vadd.f32 %v5244_v12, %v5172_v49  ;;  %v4976_v3 = vpop.f32.mrf.mxu1  ;;  %v5176_v49 = vadd.f32 %v5162_v1, %v5082_v34 }
 0x67b   : > { %5281 = vst [vmem:[%s9221_s14] sm:$0xff] %v6133_v0  ;;  %v5071_v12 = vpop.f32.mrf.mxu2  ;;  %v4988_v10 = vadd.f32 %v4976_v3, %v4894_v16 }
 0x67c   : > { %6134 = vtanh.f32 %v5266_v42  ;;  %v4707_v42 = vadd.f32 %v9196_v31, %v4613_v38 }
 0x67d   : > { %v5083_v56 = vadd.f32 %v5071_v12, %v4988_v10 }
 0x67e   : > { %v4801_v35 = vadd.f32 %v9198_v9, %v4707_v42 }
 0x67f   : > { %v5177_v29 = vadd.f32 %v5165_v63, %v5083_v56 }
 0x680   : > { %v4895_v36 = vadd.f32 %v9211_v23, %v4801_v35 }
 0x681   : > { %v5247_v13 = vpop.f32.mrf.mxu0 }
 0x682   : > { %v6135_v50 = vpop.eup %6134  ;;  %v5267_v26 = vadd.f32 %v5247_v13, %v5173_v43  ;;  %v4979_v8 = vpop.f32.mrf.mxu1 }
 0x683   : > { %5282 = vst [vmem:[%s9221_s14 + $0x8] sm:$0xff] %v6135_v50  ;;  %v5074_v14 = vpop.f32.mrf.mxu2  ;;  %v4989_v61 = vadd.f32 %v4979_v8, %v4895_v36 }
 0x684   : > { %6136 = vtanh.f32 %v5267_v26 }
 0x685   : > { %v5084_v31 = vadd.f32 %v5074_v14, %v4989_v61 }
 0x687   : > { %v5178_v59 = vadd.f32 %v5168_v44, %v5084_v31 }
 0x689   : > { %v5250_v28 = vpop.f32.mrf.mxu0 }
 0x68a   : > { %v6137_v30 = vpop.eup %6136  ;;  %v5268_v21 = vadd.f32 %v5250_v28, %v5174_v54 }
 0x68b   : > { %5283 = vst [vmem:[%s9221_s14 + $0x10] sm:$0xff] %v6137_v30 }
 0x68c   : > { %6138 = vtanh.f32 %v5268_v21 }
 0x691   : > { %v5253_v24 = vpop.f32.mrf.mxu0 }
 0x692   : > { %v6139_v47 = vpop.eup %6138  ;;  %v5269_v46 = vadd.f32 %v5253_v24, %v5175_v40 }
 0x693   : > { %5284 = vst [vmem:[%s9221_s14 + $0x18] sm:$0xff] %v6139_v47 }
 0x694   : > { %6140 = vtanh.f32 %v5269_v46 }
 0x699   : > { %v5256_v0 = vpop.f32.mrf.mxu0 }
 0x69a   : > { %v6141_v37 = vpop.eup %6140  ;;  %v5270_v53 = vadd.f32 %v5256_v0, %v5176_v49 }
 0x69b   : > { %5285 = vst [vmem:[%s9221_s14 + $0x20] sm:$0xff] %v6141_v37 }
 0x69c   : > { %6142 = vtanh.f32 %v5270_v53 }
 0x6a1   : > { %v5259_v2 = vpop.f32.mrf.mxu0 }
 0x6a2   : > { %v6143_v55 = vpop.eup %6142  ;;  %v5271_v60 = vadd.f32 %v5259_v2, %v5177_v29 }
 0x6a3   : > { %5286 = vst [vmem:[%s9221_s14 + $0x28] sm:$0xff] %v6143_v55 }
 0x6a4   : > { %6144 = vtanh.f32 %v5271_v60 }
 0x6a9   : > { %v5262_v43 = vpop.f32.mrf.mxu0 }
 0x6aa   : > { %v6145_v13 = vpop.eup %6144  ;;  %v5272_v9 = vadd.f32 %v5262_v43, %v5178_v59 }
 0x6ab   : > { %5287 = vst [vmem:[%s9221_s14 + $0x30] sm:$0xff] %v6145_v13 }
 0x6ac   : > { %6146 = vtanh.f32 %v5272_v9 }
 0x6b2   : > { %v6147_v23 = vpop.eup %6146 }
 0x6b3   : > { %5288 = vst [vmem:[%s9221_s14 + $0x38] sm:$0xff] %v6147_v23 }
 0x6b4 PF: > { %s22_s21 = sadd.s32 1, %s6154_s21  }
 0x6b5   : > { %p19_p4 = scmp.ge.s32.totalorder %s22_s21, 4  }
 0x6b7   :  { %21 = sbr.rel (!%p19_p4) target bundleno = 1 (0x1), region = 159 }

</bundles_post_ra>
